<compile_context>
chip_gen: v5e
topology: v5e:2x2
jax: 0.10.0
libtpu: 0.0.40
codegen_flags: <defaults>
</compile_context>

<pallas_src>
import math

import jax
import jax.numpy as jnp
from jax.experimental import pallas as pl
from jax.experimental.pallas import tpu as pltpu


def _bilstm_kernel(len_ref, embf_ref, embb_ref,
                   wxf_ref, whf_ref, bf_ref,
                   wxb_ref, whb_ref, bb_ref,
                   outf_ref, outb_ref,
                   hf_ref, cf_ref, hb_ref, cb_ref,
                   gxf_s, gxb_s):
    i = pl.program_id(0)
    num_chunks = pl.num_programs(0)
    t_tile, b_pad, h_pad = outf_ref.shape          # per-direction, lane-padded

    # Initialize the carried states (resident accumulator outputs) once.
    @pl.when(i == 0)
    def _():
        z = jnp.zeros((b_pad, h_pad), jnp.float32)
        hf_ref[...] = z
        cf_ref[...] = z
        hb_ref[...] = z
        cb_ref[...] = z

    lengths = len_ref[...]                         # (b_pad, 1) int32

    # --- Hoisted input->hidden projection (bias folded in): one big matmul
    #     per direction per chunk instead of 2*T tiny matmuls in the loop. ---
    gxf_s[...] = (jnp.dot(embf_ref[...], wxf_ref[...],
                          preferred_element_type=jnp.float32) + bf_ref[...])
    gxb_s[...] = (jnp.dot(embb_ref[...], wxb_ref[...],
                          preferred_element_type=jnp.float32) + bb_ref[...])

    # Hoist recurrent-weight loads out of the loop.
    whf = whf_ref[...]                             # (h_pad, 4*h_pad) bf16
    whb = whb_ref[...]

    t0_f = i * t_tile                              # global start of fwd chunk
    t0_b = (num_chunks - 1 - i) * t_tile           # global start of bwd chunk

    def lstm_step(gx_t, h, c, wh, t_glob):
        # gates layout: [i | f | g | o], each slice lane-aligned (h_pad % 128 == 0)
        gates = gx_t + jnp.dot(h.astype(wh.dtype), wh,
                               preferred_element_type=jnp.float32)
        ig = jax.nn.sigmoid(gates[:, 0 * h_pad:1 * h_pad])
        fg = jax.nn.sigmoid(gates[:, 1 * h_pad:2 * h_pad])
        gg = jnp.tanh(gates[:, 2 * h_pad:3 * h_pad])
        og = jax.nn.sigmoid(gates[:, 3 * h_pad:4 * h_pad])
        c_new = fg * c + ig * gg
        h_new = og * jnp.tanh(c_new)
        valid = t_glob < lengths                   # (b_pad, 1) packed-seq mask
        return (jnp.where(valid, h_new, h),
                jnp.where(valid, c_new, c),
                jnp.where(valid, h_new, jnp.zeros_like(h_new)))

    def step(lt, carry):
        hf, cf, hb, cb = carry
        # forward direction, local step lt
        rf = pl.multiple_of(lt * b_pad, b_pad)
        hf, cf, yf = lstm_step(gxf_s[pl.ds(rf, b_pad), :], hf, cf, whf,
                               t0_f + lt)
        outf_ref[lt] = yf
        # backward direction (reverse local order), interleaved with the
        # forward chain so the two independent recurrences hide latency.
        ltb = t_tile - 1 - lt
        rb = pl.multiple_of(ltb * b_pad, b_pad)
        hb, cb, yb = lstm_step(gxb_s[pl.ds(rb, b_pad), :], hb, cb, whb,
                               t0_b + ltb)
        outb_ref[ltb] = yb
        return hf, cf, hb, cb

    carry = (hf_ref[...], cf_ref[...], hb_ref[...], cb_ref[...])
    hf, cf, hb, cb = jax.lax.fori_loop(0, t_tile, step, carry, unroll=True)
    hf_ref[...] = hf
    cf_ref[...] = cf
    hb_ref[...] = hb
    cb_ref[...] = cb


def init_params(key, src_vocab_size, hidden_size, padding_idx):
    """PyTorch-style LSTM weights, repacked lane-padded / transposed / bf16."""
    H = hidden_size // 2            # per-direction hidden size
    D = hidden_size                 # embedding / LSTM input size
    H_pad = ((H + 127) // 128) * 128
    k = 1.0 / math.sqrt(H)
    keys = jax.random.split(key, 9)

    def u(kk, shape):
        return jax.random.uniform(kk, shape, jnp.float32, -k, k)

    emb = jax.random.normal(keys[0], (src_vocab_size, D), jnp.float32) * 0.1
    emb = emb.at[padding_idx].set(0.0)            # nn.Embedding padding_idx row

    def pack_dir(kw, kh, kb1, kb2):
        wih = u(kw, (4 * H, D))                   # PyTorch layout, gates i,f,g,o
        whh = u(kh, (4 * H, H))
        b = u(kb1, (4 * H,)) + u(kb2, (4 * H,))   # bih + bhh
        # Transpose to (in, 4H) and pad each gate block to H_pad lanes so every
        # gate slice starts on a 128-lane boundary; zero padding keeps the
        # padded state lanes exactly zero through the recurrence.
        wx = jnp.transpose(wih).reshape(D, 4, H)
        wx = jnp.pad(wx, ((0, 0), (0, 0), (0, H_pad - H))).reshape(D, 4 * H_pad)
        wh = jnp.transpose(whh).reshape(H, 4, H)
        wh = jnp.pad(wh, ((0, H_pad - H), (0, 0), (0, H_pad - H)))
        wh = wh.reshape(H_pad, 4 * H_pad)
        bb = jnp.pad(b.reshape(4, H), ((0, 0), (0, H_pad - H)))
        bb = bb.reshape(1, 4 * H_pad)
        return (wx.astype(jnp.bfloat16), wh.astype(jnp.bfloat16),
                bb.astype(jnp.float32))

    wx_f, wh_f, b_f = pack_dir(keys[1], keys[2], keys[3], keys[4])
    wx_b, wh_b, b_b = pack_dir(keys[5], keys[6], keys[7], keys[8])

    return dict(embedding=emb, padding_idx=padding_idx, H=H, H_pad=H_pad,
                wx_f=wx_f, wh_f=wh_f, b_f=b_f,
                wx_b=wx_b, wh_b=wh_b, b_b=b_b)


def encoder_forward(params, src, lengths, *, t_tile=4):
    """src: (B, T) int32 token ids; lengths: (B,) int32 valid lengths."""
    emb_table = params["embedding"]               # (V, D) float32
    B, T = src.shape
    D = emb_table.shape[1]
    H = params["H"]
    H_pad = params["H_pad"]
    padding_idx = params["padding_idx"]

    B_pad = ((B + 7) // 8) * 8                    # >= 8 sublanes
    t_tile = max(1, min(t_tile, T))
    T_pad = ((T + t_tile - 1) // t_tile) * t_tile
    num_chunks = T_pad // t_tile
    TB = t_tile * B_pad

    # Time-major gather straight from (T, B) token ids; dropout == identity.
    src_tm = jnp.pad(jnp.transpose(src), ((0, T_pad - T), (0, B_pad - B)),
                     constant_values=padding_idx)           # (T_pad, B_pad)
    emb_tm = jnp.take(emb_table, src_tm, axis=0)            # (T_pad, B_pad, D)
    emb2d = emb_tm.astype(jnp.bfloat16).reshape(T_pad * B_pad, D)

    len_pad = jnp.zeros((B_pad, 1), jnp.int32).at[:B, 0].set(
        lengths.astype(jnp.int32))

    out_shapes = [
        jax.ShapeDtypeStruct((T_pad, B_pad, H_pad), jnp.float32),  # out fwd
        jax.ShapeDtypeStruct((T_pad, B_pad, H_pad), jnp.float32),  # out bwd
        jax.ShapeDtypeStruct((B_pad, H_pad), jnp.float32),         # h fwd
        jax.ShapeDtypeStruct((B_pad, H_pad), jnp.float32),         # c fwd
        jax.ShapeDtypeStruct((B_pad, H_pad), jnp.float32),         # h bwd
        jax.ShapeDtypeStruct((B_pad, H_pad), jnp.float32),         # c bwd
    ]
    in_specs = [
        pl.BlockSpec((B_pad, 1), lambda i: (0, 0)),                      # lens
        pl.BlockSpec((TB, D), lambda i: (i, 0)),                         # emb fwd chunk
        pl.BlockSpec((TB, D), lambda i: (num_chunks - 1 - i, 0)),        # emb bwd chunk
        pl.BlockSpec((D, 4 * H_pad), lambda i: (0, 0)),                  # Wx fwd
        pl.BlockSpec((H_pad, 4 * H_pad), lambda i: (0, 0)),              # Wh fwd
        pl.BlockSpec((1, 4 * H_pad), lambda i: (0, 0)),                  # b fwd
        pl.BlockSpec((D, 4 * H_pad), lambda i: (0, 0)),                  # Wx bwd
        pl.BlockSpec((H_pad, 4 * H_pad), lambda i: (0, 0)),              # Wh bwd
        pl.BlockSpec((1, 4 * H_pad), lambda i: (0, 0)),                  # b bwd
    ]
    out_specs = [
        pl.BlockSpec((t_tile, B_pad, H_pad), lambda i: (i, 0, 0)),
        pl.BlockSpec((t_tile, B_pad, H_pad), lambda i: (num_chunks - 1 - i, 0, 0)),
        pl.BlockSpec((B_pad, H_pad), lambda i: (0, 0)),   # carried / final states
        pl.BlockSpec((B_pad, H_pad), lambda i: (0, 0)),
        pl.BlockSpec((B_pad, H_pad), lambda i: (0, 0)),
        pl.BlockSpec((B_pad, H_pad), lambda i: (0, 0)),
    ]

    out_f, out_b, h_f, c_f, h_b, c_b = pl.pallas_call(
        _bilstm_kernel,
        grid=(num_chunks,),
        out_shape=out_shapes,
        in_specs=in_specs,
        out_specs=out_specs,
        scratch_shapes=[pltpu.VMEM((TB, 4 * H_pad), jnp.float32),
                        pltpu.VMEM((TB, 4 * H_pad), jnp.float32)],
        compiler_params=pltpu.CompilerParams(
            dimension_semantics=("arbitrary",)),   # T axis carries recurrence
    )(len_pad, emb2d, emb2d,
      params["wx_f"], params["wh_f"], params["b_f"],
      params["wx_b"], params["wh_b"], params["b_b"])

    enc_f = jnp.transpose(out_f, (1, 0, 2))[:B, :T, :H]
    enc_b = jnp.transpose(out_b, (1, 0, 2))[:B, :T, :H]
    enc_output = jnp.concatenate([enc_f, enc_b], axis=-1)   # (B, T, 2H)
    # NOTE: pad_packed_sequence trims to max(lengths); we return the full-T
    # tensor (padding positions are exactly zero) to stay jit-friendly.

    # merge_tensor: concat fwd/bwd final states along the feature dim.
    h_n = jnp.concatenate([h_f[:B, :H], h_b[:B, :H]], axis=-1)[None]   # (1,B,2H)
    c_n = jnp.concatenate([c_f[:B, :H], c_b[:B, :H]], axis=-1)[None]
    return enc_output, (h_n, c_n)


if __name__ == "__main__":
    src_vocab_size, hidden_size, padding_idx = 50, 32, 0
    B, T = 2, 8

    key = jax.random.PRNGKey(0)
    pkey, skey = jax.random.split(key)
    params = init_params(pkey, src_vocab_size, hidden_size, padding_idx)

    src = jax.random.randint(skey, (B, T), 1, src_vocab_size, dtype=jnp.int32)
    lengths = jnp.array([T, 5], dtype=jnp.int32)
    # positions past each sequence's length are padding tokens
    t_ids = jnp.arange(T)[None, :]
    src = jnp.where(t_ids < lengths[:, None], src, padding_idx)

    # Whole forward pass is jittable (no host sync on lengths).
    fwd = jax.jit(lambda s, l: encoder_forward(params, s, l))
    enc_output, (h_n, c_n) = fwd(src, lengths)
    jax.block_until_ready((enc_output, h_n, c_n))

    assert enc_output.shape == (B, T, hidden_size)
    assert h_n.shape == (1, B, hidden_size) and c_n.shape == (1, B, hidden_size)
    print("KERNEL_OK")
</pallas_src>

<mosaic_0001>
module attributes {stable_mosaic.version = 11 : i64} {
  func.func @_bilstm_kernel(%arg0: i32, %arg1: memref<8x1xi32, #tpu.memory_space<vmem>>, %arg2: memref<32x32xbf16, #tpu.memory_space<vmem>>, %arg3: memref<32x32xbf16, #tpu.memory_space<vmem>>, %arg4: memref<32x512xbf16, #tpu.memory_space<vmem>>, %arg5: memref<128x512xbf16, #tpu.memory_space<vmem>>, %arg6: memref<1x512xf32, #tpu.memory_space<vmem>>, %arg7: memref<32x512xbf16, #tpu.memory_space<vmem>>, %arg8: memref<128x512xbf16, #tpu.memory_space<vmem>>, %arg9: memref<1x512xf32, #tpu.memory_space<vmem>>, %arg10: memref<4x8x128xf32, #tpu.memory_space<vmem>>, %arg11: memref<4x8x128xf32, #tpu.memory_space<vmem>>, %arg12: memref<8x128xf32, #tpu.memory_space<vmem>>, %arg13: memref<8x128xf32, #tpu.memory_space<vmem>>, %arg14: memref<8x128xf32, #tpu.memory_space<vmem>>, %arg15: memref<8x128xf32, #tpu.memory_space<vmem>>, %arg16: memref<32x512xf32, #tpu.memory_space<vmem>>, %arg17: memref<32x512xf32, #tpu.memory_space<vmem>>) attributes {dimension_semantics = [#tpu.dimension_semantics<arbitrary>], iteration_bounds = array<i64: 2>, scalar_prefetch = 0 : i64, scratch_operands = 2 : i64, tpu.core_type = #tpu.core_type<tc>, window_params = [{pipeline_mode = #tpu.pipeline_mode<synchronous>, transform_indices = @transform_0, window_bounds = array<i64: 8, 1>}, {transform_indices = @transform_1, window_bounds = array<i64: 32, 32>}, {transform_indices = @transform_2, window_bounds = array<i64: 32, 32>}, {pipeline_mode = #tpu.pipeline_mode<synchronous>, transform_indices = @transform_3, window_bounds = array<i64: 32, 512>}, {pipeline_mode = #tpu.pipeline_mode<synchronous>, transform_indices = @transform_4, window_bounds = array<i64: 128, 512>}, {pipeline_mode = #tpu.pipeline_mode<synchronous>, transform_indices = @transform_5, window_bounds = array<i64: 1, 512>}, {pipeline_mode = #tpu.pipeline_mode<synchronous>, transform_indices = @transform_6, window_bounds = array<i64: 32, 512>}, {pipeline_mode = #tpu.pipeline_mode<synchronous>, transform_indices = @transform_7, window_bounds = array<i64: 128, 512>}, {pipeline_mode = #tpu.pipeline_mode<synchronous>, transform_indices = @transform_8, window_bounds = array<i64: 1, 512>}, {transform_indices = @transform_9, window_bounds = array<i64: 4, 8, 128>}, {transform_indices = @transform_10, window_bounds = array<i64: 4, 8, 128>}, {pipeline_mode = #tpu.pipeline_mode<synchronous>, transform_indices = @transform_11, window_bounds = array<i64: 8, 128>}, {pipeline_mode = #tpu.pipeline_mode<synchronous>, transform_indices = @transform_12, window_bounds = array<i64: 8, 128>}, {pipeline_mode = #tpu.pipeline_mode<synchronous>, transform_indices = @transform_13, window_bounds = array<i64: 8, 128>}, {pipeline_mode = #tpu.pipeline_mode<synchronous>, transform_indices = @transform_14, window_bounds = array<i64: 8, 128>}]} {
    %c0_i32 = arith.constant 0 : i32
    %0 = arith.cmpi eq, %arg0, %c0_i32 : i32
    %1 = arith.extui %0 : i1 to i32
    %c0_i32_0 = arith.constant 0 : i32
    %2 = arith.cmpi ne, %1, %c0_i32_0 : i32
    scf.if %2 {
      %cst_118 = arith.constant 0.000000e+00 : f32
      %427 = vector.broadcast %cst_118 : f32 to vector<8x128xf32>
      %c0_119 = arith.constant 0 : index
      %c0_120 = arith.constant 0 : index
      %428 = vector.load %arg12[%c0_119, %c0_120] : memref<8x128xf32, #tpu.memory_space<vmem>>, vector<8x128xf32>
      tpu.vector_store %arg12[%c0_119, %c0_120], %427 {strides = array<i32>} : memref<8x128xf32, #tpu.memory_space<vmem>>, vector<8x128xf32>,
      %c0_121 = arith.constant 0 : index
      %c0_122 = arith.constant 0 : index
      %429 = vector.load %arg13[%c0_121, %c0_122] : memref<8x128xf32, #tpu.memory_space<vmem>>, vector<8x128xf32>
      tpu.vector_store %arg13[%c0_121, %c0_122], %427 {strides = array<i32>} : memref<8x128xf32, #tpu.memory_space<vmem>>, vector<8x128xf32>,
      %c0_123 = arith.constant 0 : index
      %c0_124 = arith.constant 0 : index
      %430 = vector.load %arg14[%c0_123, %c0_124] : memref<8x128xf32, #tpu.memory_space<vmem>>, vector<8x128xf32>
      tpu.vector_store %arg14[%c0_123, %c0_124], %427 {strides = array<i32>} : memref<8x128xf32, #tpu.memory_space<vmem>>, vector<8x128xf32>,
      %c0_125 = arith.constant 0 : index
      %c0_126 = arith.constant 0 : index
      %431 = vector.load %arg15[%c0_125, %c0_126] : memref<8x128xf32, #tpu.memory_space<vmem>>, vector<8x128xf32>
      tpu.vector_store %arg15[%c0_125, %c0_126], %427 {strides = array<i32>} : memref<8x128xf32, #tpu.memory_space<vmem>>, vector<8x128xf32>,
    } else {
    }
    %c0 = arith.constant 0 : index
    %c0_1 = arith.constant 0 : index
    %3 = vector.load %arg1[%c0, %c0_1] : memref<8x1xi32, #tpu.memory_space<vmem>>, vector<8x1xi32>
    %c0_2 = arith.constant 0 : index
    %c0_3 = arith.constant 0 : index
    %4 = vector.load %arg2[%c0_2, %c0_3] : memref<32x32xbf16, #tpu.memory_space<vmem>>, vector<32x32xbf16>
    %c0_4 = arith.constant 0 : index
    %c0_5 = arith.constant 0 : index
    %5 = vector.load %arg4[%c0_4, %c0_5] : memref<32x512xbf16, #tpu.memory_space<vmem>>, vector<32x512xbf16>
    %cst = arith.constant dense<0.000000e+00> : vector<32x512xf32>
    %6 = tpu.matmul %4, %5, %cst {dimension_numbers = #tpu.dot_dimension_numbers<[1], [0], [0], [1], [0, 0, 1, 1], [], []>} : vector<32x32xbf16>, vector<32x512xbf16>, vector<32x512xf32> -> vector<32x512xf32>
    %c0_6 = arith.constant 0 : index
    %c0_7 = arith.constant 0 : index
    %7 = vector.load %arg6[%c0_6, %c0_7] : memref<1x512xf32, #tpu.memory_space<vmem>>, vector<1x512xf32>
    %8 = vector.broadcast %7 : vector<1x512xf32> to vector<32x512xf32>
    %9 = arith.addf %6, %8 : vector<32x512xf32>
    %c0_8 = arith.constant 0 : index
    %c0_9 = arith.constant 0 : index
    %10 = vector.load %arg16[%c0_8, %c0_9] : memref<32x512xf32, #tpu.memory_space<vmem>>, vector<32x512xf32>
    tpu.vector_store %arg16[%c0_8, %c0_9], %9 {strides = array<i32>} : memref<32x512xf32, #tpu.memory_space<vmem>>, vector<32x512xf32>,
    %c0_10 = arith.constant 0 : index
    %c0_11 = arith.constant 0 : index
    %11 = vector.load %arg3[%c0_10, %c0_11] : memref<32x32xbf16, #tpu.memory_space<vmem>>, vector<32x32xbf16>
    %c0_12 = arith.constant 0 : index
    %c0_13 = arith.constant 0 : index
    %12 = vector.load %arg7[%c0_12, %c0_13] : memref<32x512xbf16, #tpu.memory_space<vmem>>, vector<32x512xbf16>
    %cst_14 = arith.constant dense<0.000000e+00> : vector<32x512xf32>
    %13 = tpu.matmul %11, %12, %cst_14 {dimension_numbers = #tpu.dot_dimension_numbers<[1], [0], [0], [1], [0, 0, 1, 1], [], []>} : vector<32x32xbf16>, vector<32x512xbf16>, vector<32x512xf32> -> vector<32x512xf32>
    %c0_15 = arith.constant 0 : index
    %c0_16 = arith.constant 0 : index
    %14 = vector.load %arg9[%c0_15, %c0_16] : memref<1x512xf32, #tpu.memory_space<vmem>>, vector<1x512xf32>
    %15 = vector.broadcast %14 : vector<1x512xf32> to vector<32x512xf32>
    %16 = arith.addf %13, %15 : vector<32x512xf32>
    %c0_17 = arith.constant 0 : index
    %c0_18 = arith.constant 0 : index
    %17 = vector.load %arg17[%c0_17, %c0_18] : memref<32x512xf32, #tpu.memory_space<vmem>>, vector<32x512xf32>
    tpu.vector_store %arg17[%c0_17, %c0_18], %16 {strides = array<i32>} : memref<32x512xf32, #tpu.memory_space<vmem>>, vector<32x512xf32>,
    %c0_19 = arith.constant 0 : index
    %c0_20 = arith.constant 0 : index
    %18 = vector.load %arg5[%c0_19, %c0_20] : memref<128x512xbf16, #tpu.memory_space<vmem>>, vector<128x512xbf16>
    %c0_21 = arith.constant 0 : index
    %c0_22 = arith.constant 0 : index
    %19 = vector.load %arg8[%c0_21, %c0_22] : memref<128x512xbf16, #tpu.memory_space<vmem>>, vector<128x512xbf16>
    %c4_i32 = arith.constant 4 : i32
    %20 = arith.muli %arg0, %c4_i32 : i32
    %c1_i32 = arith.constant 1 : i32
    %21 = arith.subi %c1_i32, %arg0 : i32
    %c4_i32_23 = arith.constant 4 : i32
    %22 = arith.muli %21, %c4_i32_23 : i32
    %c0_24 = arith.constant 0 : index
    %c0_25 = arith.constant 0 : index
    %23 = vector.load %arg12[%c0_24, %c0_25] : memref<8x128xf32, #tpu.memory_space<vmem>>, vector<8x128xf32>
    %c0_26 = arith.constant 0 : index
    %c0_27 = arith.constant 0 : index
    %24 = vector.load %arg13[%c0_26, %c0_27] : memref<8x128xf32, #tpu.memory_space<vmem>>, vector<8x128xf32>
    %c0_28 = arith.constant 0 : index
    %c0_29 = arith.constant 0 : index
    %25 = vector.load %arg14[%c0_28, %c0_29] : memref<8x128xf32, #tpu.memory_space<vmem>>, vector<8x128xf32>
    %c0_30 = arith.constant 0 : index
    %c0_31 = arith.constant 0 : index
    %26 = vector.load %arg15[%c0_30, %c0_31] : memref<8x128xf32, #tpu.memory_space<vmem>>, vector<8x128xf32>
    %c0_i32_32 = arith.constant 0 : i32
    %c8_i32 = arith.constant 8 : i32
    %27 = arith.muli %c0_i32_32, %c8_i32 : i32
    %28 = tpu.assume_multiple %27, 8 : i32
    %29 = arith.index_cast %28 : i32 to index
    %c0_33 = arith.constant 0 : index
    %30 = vector.load %arg16[%29, %c0_33] : memref<32x512xf32, #tpu.memory_space<vmem>>, vector<8x512xf32>
    %31 = arith.addi %20, %c0_i32_32 : i32
    %32 = arith.truncf %23 : vector<8x128xf32> to vector<8x128xbf16>
    %cst_34 = arith.constant dense<0.000000e+00> : vector<8x512xf32>
    %33 = tpu.matmul %32, %18, %cst_34 {dimension_numbers = #tpu.dot_dimension_numbers<[1], [0], [0], [1], [0, 0, 1, 1], [], []>} : vector<8x128xbf16>, vector<128x512xbf16>, vector<8x512xf32> -> vector<8x512xf32>
    %34 = arith.addf %30, %33 : vector<8x512xf32>
    %35 = vector.extract_strided_slice %34 {offsets = [0, 0], sizes = [8, 128], strides = [1, 1]} : vector<8x512xf32> to vector<8x128xf32>
    %36 = arith.negf %35 : vector<8x128xf32>
    %37 = math.exp %36 : vector<8x128xf32>
    %cst_35 = arith.constant 1.000000e+00 : f32
    %38 = vector.broadcast %cst_35 : f32 to vector<8x128xf32>
    %39 = arith.addf %38, %37 : vector<8x128xf32>
    %40 = arith.divf %38, %39 : vector<8x128xf32>
    %41 = vector.extract_strided_slice %34 {offsets = [0, 128], sizes = [8, 128], strides = [1, 1]} : vector<8x512xf32> to vector<8x128xf32>
    %42 = arith.negf %41 : vector<8x128xf32>
    %43 = math.exp %42 : vector<8x128xf32>
    %cst_36 = arith.constant 1.000000e+00 : f32
    %44 = vector.broadcast %cst_36 : f32 to vector<8x128xf32>
    %45 = arith.addf %44, %43 : vector<8x128xf32>
    %46 = arith.divf %44, %45 : vector<8x128xf32>
    %47 = vector.extract_strided_slice %34 {offsets = [0, 256], sizes = [8, 128], strides = [1, 1]} : vector<8x512xf32> to vector<8x128xf32>
    %48 = math.tanh %47 : vector<8x128xf32>
    %49 = vector.extract_strided_slice %34 {offsets = [0, 384], sizes = [8, 128], strides = [1, 1]} : vector<8x512xf32> to vector<8x128xf32>
    %50 = arith.negf %49 : vector<8x128xf32>
    %51 = math.exp %50 : vector<8x128xf32>
    %cst_37 = arith.constant 1.000000e+00 : f32
    %52 = vector.broadcast %cst_37 : f32 to vector<8x128xf32>
    %53 = arith.addf %52, %51 : vector<8x128xf32>
    %54 = arith.divf %52, %53 : vector<8x128xf32>
    %55 = arith.mulf %46, %24 : vector<8x128xf32>
    %56 = arith.mulf %40, %48 : vector<8x128xf32>
    %57 = arith.addf %55, %56 : vector<8x128xf32>
    %58 = math.tanh %57 : vector<8x128xf32>
    %59 = arith.mulf %54, %58 : vector<8x128xf32>
    %60 = vector.broadcast %31 : i32 to vector<8x1xi32>
    %61 = arith.cmpi slt, %60, %3 : vector<8x1xi32>
    %62 = vector.shape_cast %61 : vector<8x1xi1> to vector<8x1xi1>
    %63 = vector.broadcast %62 : vector<8x1xi1> to vector<8x128xi1>
    %64 = arith.select %63, %59, %23 : vector<8x128xi1>, vector<8x128xf32>
    %65 = vector.shape_cast %61 : vector<8x1xi1> to vector<8x1xi1>
    %66 = vector.broadcast %65 : vector<8x1xi1> to vector<8x128xi1>
    %67 = arith.select %66, %57, %24 : vector<8x128xi1>, vector<8x128xf32>
    %cst_38 = arith.constant 0.000000e+00 : f32
    %68 = vector.broadcast %cst_38 : f32 to vector<8x128xf32>
    %69 = vector.shape_cast %61 : vector<8x1xi1> to vector<8x1xi1>
    %70 = vector.broadcast %69 : vector<8x1xi1> to vector<8x128xi1>
    %71 = arith.select %70, %59, %68 : vector<8x128xi1>, vector<8x128xf32>
    %72 = arith.index_cast %c0_i32_32 : i32 to index
    %c0_39 = arith.constant 0 : index
    %c0_40 = arith.constant 0 : index
    %73 = vector.load %arg10[%72, %c0_39, %c0_40] : memref<4x8x128xf32, #tpu.memory_space<vmem>>, vector<1x8x128xf32>
    %74 = vector.shape_cast %73 : vector<1x8x128xf32> to vector<8x128xf32>
    %75 = vector.shape_cast %71 : vector<8x128xf32> to vector<1x8x128xf32>
    tpu.vector_store %arg10[%72, %c0_39, %c0_40], %75 {strides = array<i32>} : memref<4x8x128xf32, #tpu.memory_space<vmem>>, vector<1x8x128xf32>,
    %c3_i32 = arith.constant 3 : i32
    %76 = arith.subi %c3_i32, %c0_i32_32 : i32
    %c8_i32_41 = arith.constant 8 : i32
    %77 = arith.muli %76, %c8_i32_41 : i32
    %78 = tpu.assume_multiple %77, 8 : i32
    %79 = arith.index_cast %78 : i32 to index
    %c0_42 = arith.constant 0 : index
    %80 = vector.load %arg17[%79, %c0_42] : memref<32x512xf32, #tpu.memory_space<vmem>>, vector<8x512xf32>
    %81 = arith.addi %22, %76 : i32
    %82 = arith.truncf %25 : vector<8x128xf32> to vector<8x128xbf16>
    %cst_43 = arith.constant dense<0.000000e+00> : vector<8x512xf32>
    %83 = tpu.matmul %82, %19, %cst_43 {dimension_numbers = #tpu.dot_dimension_numbers<[1], [0], [0], [1], [0, 0, 1, 1], [], []>} : vector<8x128xbf16>, vector<128x512xbf16>, vector<8x512xf32> -> vector<8x512xf32>
    %84 = arith.addf %80, %83 : vector<8x512xf32>
    %85 = vector.extract_strided_slice %84 {offsets = [0, 0], sizes = [8, 128], strides = [1, 1]} : vector<8x512xf32> to vector<8x128xf32>
    %86 = arith.negf %85 : vector<8x128xf32>
    %87 = math.exp %86 : vector<8x128xf32>
    %cst_44 = arith.constant 1.000000e+00 : f32
    %88 = vector.broadcast %cst_44 : f32 to vector<8x128xf32>
    %89 = arith.addf %88, %87 : vector<8x128xf32>
    %90 = arith.divf %88, %89 : vector<8x128xf32>
    %91 = vector.extract_strided_slice %84 {offsets = [0, 128], sizes = [8, 128], strides = [1, 1]} : vector<8x512xf32> to vector<8x128xf32>
    %92 = arith.negf %91 : vector<8x128xf32>
    %93 = math.exp %92 : vector<8x128xf32>
    %cst_45 = arith.constant 1.000000e+00 : f32
    %94 = vector.broadcast %cst_45 : f32 to vector<8x128xf32>
    %95 = arith.addf %94, %93 : vector<8x128xf32>
    %96 = arith.divf %94, %95 : vector<8x128xf32>
    %97 = vector.extract_strided_slice %84 {offsets = [0, 256], sizes = [8, 128], strides = [1, 1]} : vector<8x512xf32> to vector<8x128xf32>
    %98 = math.tanh %97 : vector<8x128xf32>
    %99 = vector.extract_strided_slice %84 {offsets = [0, 384], sizes = [8, 128], strides = [1, 1]} : vector<8x512xf32> to vector<8x128xf32>
    %100 = arith.negf %99 : vector<8x128xf32>
    %101 = math.exp %100 : vector<8x128xf32>
    %cst_46 = arith.constant 1.000000e+00 : f32
    %102 = vector.broadcast %cst_46 : f32 to vector<8x128xf32>
    %103 = arith.addf %102, %101 : vector<8x128xf32>
    %104 = arith.divf %102, %103 : vector<8x128xf32>
    %105 = arith.mulf %96, %26 : vector<8x128xf32>
    %106 = arith.mulf %90, %98 : vector<8x128xf32>
    %107 = arith.addf %105, %106 : vector<8x128xf32>
    %108 = math.tanh %107 : vector<8x128xf32>
    %109 = arith.mulf %104, %108 : vector<8x128xf32>
    %110 = vector.broadcast %81 : i32 to vector<8x1xi32>
    %111 = arith.cmpi slt, %110, %3 : vector<8x1xi32>
    %112 = vector.shape_cast %111 : vector<8x1xi1> to vector<8x1xi1>
    %113 = vector.broadcast %112 : vector<8x1xi1> to vector<8x128xi1>
    %114 = arith.select %113, %109, %25 : vector<8x128xi1>, vector<8x128xf32>
    %115 = vector.shape_cast %111 : vector<8x1xi1> to vector<8x1xi1>
    %116 = vector.broadcast %115 : vector<8x1xi1> to vector<8x128xi1>
    %117 = arith.select %116, %107, %26 : vector<8x128xi1>, vector<8x128xf32>
    %cst_47 = arith.constant 0.000000e+00 : f32
    %118 = vector.broadcast %cst_47 : f32 to vector<8x128xf32>
    %119 = vector.shape_cast %111 : vector<8x1xi1> to vector<8x1xi1>
    %120 = vector.broadcast %119 : vector<8x1xi1> to vector<8x128xi1>
    %121 = arith.select %120, %109, %118 : vector<8x128xi1>, vector<8x128xf32>
    %122 = arith.index_cast %76 : i32 to index
    %c0_48 = arith.constant 0 : index
    %c0_49 = arith.constant 0 : index
    %123 = vector.load %arg11[%122, %c0_48, %c0_49] : memref<4x8x128xf32, #tpu.memory_space<vmem>>, vector<1x8x128xf32>
    %124 = vector.shape_cast %123 : vector<1x8x128xf32> to vector<8x128xf32>
    %125 = vector.shape_cast %121 : vector<8x128xf32> to vector<1x8x128xf32>
    tpu.vector_store %arg11[%122, %c0_48, %c0_49], %125 {strides = array<i32>} : memref<4x8x128xf32, #tpu.memory_space<vmem>>, vector<1x8x128xf32>,
    %c1_i32_50 = arith.constant 1 : i32
    %c8_i32_51 = arith.constant 8 : i32
    %126 = arith.muli %c1_i32_50, %c8_i32_51 : i32
    %127 = tpu.assume_multiple %126, 8 : i32
    %128 = arith.index_cast %127 : i32 to index
    %c0_52 = arith.constant 0 : index
    %129 = vector.load %arg16[%128, %c0_52] : memref<32x512xf32, #tpu.memory_space<vmem>>, vector<8x512xf32>
    %130 = arith.addi %20, %c1_i32_50 : i32
    %131 = arith.truncf %64 : vector<8x128xf32> to vector<8x128xbf16>
    %cst_53 = arith.constant dense<0.000000e+00> : vector<8x512xf32>
    %132 = tpu.matmul %131, %18, %cst_53 {dimension_numbers = #tpu.dot_dimension_numbers<[1], [0], [0], [1], [0, 0, 1, 1], [], []>} : vector<8x128xbf16>, vector<128x512xbf16>, vector<8x512xf32> -> vector<8x512xf32>
    %133 = arith.addf %129, %132 : vector<8x512xf32>
    %134 = vector.extract_strided_slice %133 {offsets = [0, 0], sizes = [8, 128], strides = [1, 1]} : vector<8x512xf32> to vector<8x128xf32>
    %135 = arith.negf %134 : vector<8x128xf32>
    %136 = math.exp %135 : vector<8x128xf32>
    %cst_54 = arith.constant 1.000000e+00 : f32
    %137 = vector.broadcast %cst_54 : f32 to vector<8x128xf32>
    %138 = arith.addf %137, %136 : vector<8x128xf32>
    %139 = arith.divf %137, %138 : vector<8x128xf32>
    %140 = vector.extract_strided_slice %133 {offsets = [0, 128], sizes = [8, 128], strides = [1, 1]} : vector<8x512xf32> to vector<8x128xf32>
    %141 = arith.negf %140 : vector<8x128xf32>
    %142 = math.exp %141 : vector<8x128xf32>
    %cst_55 = arith.constant 1.000000e+00 : f32
    %143 = vector.broadcast %cst_55 : f32 to vector<8x128xf32>
    %144 = arith.addf %143, %142 : vector<8x128xf32>
    %145 = arith.divf %143, %144 : vector<8x128xf32>
    %146 = vector.extract_strided_slice %133 {offsets = [0, 256], sizes = [8, 128], strides = [1, 1]} : vector<8x512xf32> to vector<8x128xf32>
    %147 = math.tanh %146 : vector<8x128xf32>
    %148 = vector.extract_strided_slice %133 {offsets = [0, 384], sizes = [8, 128], strides = [1, 1]} : vector<8x512xf32> to vector<8x128xf32>
    %149 = arith.negf %148 : vector<8x128xf32>
    %150 = math.exp %149 : vector<8x128xf32>
    %cst_56 = arith.constant 1.000000e+00 : f32
    %151 = vector.broadcast %cst_56 : f32 to vector<8x128xf32>
    %152 = arith.addf %151, %150 : vector<8x128xf32>
    %153 = arith.divf %151, %152 : vector<8x128xf32>
    %154 = arith.mulf %145, %67 : vector<8x128xf32>
    %155 = arith.mulf %139, %147 : vector<8x128xf32>
    %156 = arith.addf %154, %155 : vector<8x128xf32>
    %157 = math.tanh %156 : vector<8x128xf32>
    %158 = arith.mulf %153, %157 : vector<8x128xf32>
    %159 = vector.broadcast %130 : i32 to vector<8x1xi32>
    %160 = arith.cmpi slt, %159, %3 : vector<8x1xi32>
    %161 = vector.shape_cast %160 : vector<8x1xi1> to vector<8x1xi1>
    %162 = vector.broadcast %161 : vector<8x1xi1> to vector<8x128xi1>
    %163 = arith.select %162, %158, %64 : vector<8x128xi1>, vector<8x128xf32>
    %164 = vector.shape_cast %160 : vector<8x1xi1> to vector<8x1xi1>
    %165 = vector.broadcast %164 : vector<8x1xi1> to vector<8x128xi1>
    %166 = arith.select %165, %156, %67 : vector<8x128xi1>, vector<8x128xf32>
    %cst_57 = arith.constant 0.000000e+00 : f32
    %167 = vector.broadcast %cst_57 : f32 to vector<8x128xf32>
    %168 = vector.shape_cast %160 : vector<8x1xi1> to vector<8x1xi1>
    %169 = vector.broadcast %168 : vector<8x1xi1> to vector<8x128xi1>
    %170 = arith.select %169, %158, %167 : vector<8x128xi1>, vector<8x128xf32>
    %171 = arith.index_cast %c1_i32_50 : i32 to index
    %c0_58 = arith.constant 0 : index
    %c0_59 = arith.constant 0 : index
    %172 = vector.load %arg10[%171, %c0_58, %c0_59] : memref<4x8x128xf32, #tpu.memory_space<vmem>>, vector<1x8x128xf32>
    %173 = vector.shape_cast %172 : vector<1x8x128xf32> to vector<8x128xf32>
    %174 = vector.shape_cast %170 : vector<8x128xf32> to vector<1x8x128xf32>
    tpu.vector_store %arg10[%171, %c0_58, %c0_59], %174 {strides = array<i32>} : memref<4x8x128xf32, #tpu.memory_space<vmem>>, vector<1x8x128xf32>,
    %c3_i32_60 = arith.constant 3 : i32
    %175 = arith.subi %c3_i32_60, %c1_i32_50 : i32
    %c8_i32_61 = arith.constant 8 : i32
    %176 = arith.muli %175, %c8_i32_61 : i32
    %177 = tpu.assume_multiple %176, 8 : i32
    %178 = arith.index_cast %177 : i32 to index
    %c0_62 = arith.constant 0 : index
    %179 = vector.load %arg17[%178, %c0_62] : memref<32x512xf32, #tpu.memory_space<vmem>>, vector<8x512xf32>
    %180 = arith.addi %22, %175 : i32
    %181 = arith.truncf %114 : vector<8x128xf32> to vector<8x128xbf16>
    %cst_63 = arith.constant dense<0.000000e+00> : vector<8x512xf32>
    %182 = tpu.matmul %181, %19, %cst_63 {dimension_numbers = #tpu.dot_dimension_numbers<[1], [0], [0], [1], [0, 0, 1, 1], [], []>} : vector<8x128xbf16>, vector<128x512xbf16>, vector<8x512xf32> -> vector<8x512xf32>
    %183 = arith.addf %179, %182 : vector<8x512xf32>
    %184 = vector.extract_strided_slice %183 {offsets = [0, 0], sizes = [8, 128], strides = [1, 1]} : vector<8x512xf32> to vector<8x128xf32>
    %185 = arith.negf %184 : vector<8x128xf32>
    %186 = math.exp %185 : vector<8x128xf32>
    %cst_64 = arith.constant 1.000000e+00 : f32
    %187 = vector.broadcast %cst_64 : f32 to vector<8x128xf32>
    %188 = arith.addf %187, %186 : vector<8x128xf32>
    %189 = arith.divf %187, %188 : vector<8x128xf32>
    %190 = vector.extract_strided_slice %183 {offsets = [0, 128], sizes = [8, 128], strides = [1, 1]} : vector<8x512xf32> to vector<8x128xf32>
    %191 = arith.negf %190 : vector<8x128xf32>
    %192 = math.exp %191 : vector<8x128xf32>
    %cst_65 = arith.constant 1.000000e+00 : f32
    %193 = vector.broadcast %cst_65 : f32 to vector<8x128xf32>
    %194 = arith.addf %193, %192 : vector<8x128xf32>
    %195 = arith.divf %193, %194 : vector<8x128xf32>
    %196 = vector.extract_strided_slice %183 {offsets = [0, 256], sizes = [8, 128], strides = [1, 1]} : vector<8x512xf32> to vector<8x128xf32>
    %197 = math.tanh %196 : vector<8x128xf32>
    %198 = vector.extract_strided_slice %183 {offsets = [0, 384], sizes = [8, 128], strides = [1, 1]} : vector<8x512xf32> to vector<8x128xf32>
    %199 = arith.negf %198 : vector<8x128xf32>
    %200 = math.exp %199 : vector<8x128xf32>
    %cst_66 = arith.constant 1.000000e+00 : f32
    %201 = vector.broadcast %cst_66 : f32 to vector<8x128xf32>
    %202 = arith.addf %201, %200 : vector<8x128xf32>
    %203 = arith.divf %201, %202 : vector<8x128xf32>
    %204 = arith.mulf %195, %117 : vector<8x128xf32>
    %205 = arith.mulf %189, %197 : vector<8x128xf32>
    %206 = arith.addf %204, %205 : vector<8x128xf32>
    %207 = math.tanh %206 : vector<8x128xf32>
    %208 = arith.mulf %203, %207 : vector<8x128xf32>
    %209 = vector.broadcast %180 : i32 to vector<8x1xi32>
    %210 = arith.cmpi slt, %209, %3 : vector<8x1xi32>
    %211 = vector.shape_cast %210 : vector<8x1xi1> to vector<8x1xi1>
    %212 = vector.broadcast %211 : vector<8x1xi1> to vector<8x128xi1>
    %213 = arith.select %212, %208, %114 : vector<8x128xi1>, vector<8x128xf32>
    %214 = vector.shape_cast %210 : vector<8x1xi1> to vector<8x1xi1>
    %215 = vector.broadcast %214 : vector<8x1xi1> to vector<8x128xi1>
    %216 = arith.select %215, %206, %117 : vector<8x128xi1>, vector<8x128xf32>
    %cst_67 = arith.constant 0.000000e+00 : f32
    %217 = vector.broadcast %cst_67 : f32 to vector<8x128xf32>
    %218 = vector.shape_cast %210 : vector<8x1xi1> to vector<8x1xi1>
    %219 = vector.broadcast %218 : vector<8x1xi1> to vector<8x128xi1>
    %220 = arith.select %219, %208, %217 : vector<8x128xi1>, vector<8x128xf32>
    %221 = arith.index_cast %175 : i32 to index
    %c0_68 = arith.constant 0 : index
    %c0_69 = arith.constant 0 : index
    %222 = vector.load %arg11[%221, %c0_68, %c0_69] : memref<4x8x128xf32, #tpu.memory_space<vmem>>, vector<1x8x128xf32>
    %223 = vector.shape_cast %222 : vector<1x8x128xf32> to vector<8x128xf32>
    %224 = vector.shape_cast %220 : vector<8x128xf32> to vector<1x8x128xf32>
    tpu.vector_store %arg11[%221, %c0_68, %c0_69], %224 {strides = array<i32>} : memref<4x8x128xf32, #tpu.memory_space<vmem>>, vector<1x8x128xf32>,
    %c2_i32 = arith.constant 2 : i32
    %c8_i32_70 = arith.constant 8 : i32
    %225 = arith.muli %c2_i32, %c8_i32_70 : i32
    %226 = tpu.assume_multiple %225, 8 : i32
    %227 = arith.index_cast %226 : i32 to index
    %c0_71 = arith.constant 0 : index
    %228 = vector.load %arg16[%227, %c0_71] : memref<32x512xf32, #tpu.memory_space<vmem>>, vector<8x512xf32>
    %229 = arith.addi %20, %c2_i32 : i32
    %230 = arith.truncf %163 : vector<8x128xf32> to vector<8x128xbf16>
    %cst_72 = arith.constant dense<0.000000e+00> : vector<8x512xf32>
    %231 = tpu.matmul %230, %18, %cst_72 {dimension_numbers = #tpu.dot_dimension_numbers<[1], [0], [0], [1], [0, 0, 1, 1], [], []>} : vector<8x128xbf16>, vector<128x512xbf16>, vector<8x512xf32> -> vector<8x512xf32>
    %232 = arith.addf %228, %231 : vector<8x512xf32>
    %233 = vector.extract_strided_slice %232 {offsets = [0, 0], sizes = [8, 128], strides = [1, 1]} : vector<8x512xf32> to vector<8x128xf32>
    %234 = arith.negf %233 : vector<8x128xf32>
    %235 = math.exp %234 : vector<8x128xf32>
    %cst_73 = arith.constant 1.000000e+00 : f32
    %236 = vector.broadcast %cst_73 : f32 to vector<8x128xf32>
    %237 = arith.addf %236, %235 : vector<8x128xf32>
    %238 = arith.divf %236, %237 : vector<8x128xf32>
    %239 = vector.extract_strided_slice %232 {offsets = [0, 128], sizes = [8, 128], strides = [1, 1]} : vector<8x512xf32> to vector<8x128xf32>
    %240 = arith.negf %239 : vector<8x128xf32>
    %241 = math.exp %240 : vector<8x128xf32>
    %cst_74 = arith.constant 1.000000e+00 : f32
    %242 = vector.broadcast %cst_74 : f32 to vector<8x128xf32>
    %243 = arith.addf %242, %241 : vector<8x128xf32>
    %244 = arith.divf %242, %243 : vector<8x128xf32>
    %245 = vector.extract_strided_slice %232 {offsets = [0, 256], sizes = [8, 128], strides = [1, 1]} : vector<8x512xf32> to vector<8x128xf32>
    %246 = math.tanh %245 : vector<8x128xf32>
    %247 = vector.extract_strided_slice %232 {offsets = [0, 384], sizes = [8, 128], strides = [1, 1]} : vector<8x512xf32> to vector<8x128xf32>
    %248 = arith.negf %247 : vector<8x128xf32>
    %249 = math.exp %248 : vector<8x128xf32>
    %cst_75 = arith.constant 1.000000e+00 : f32
    %250 = vector.broadcast %cst_75 : f32 to vector<8x128xf32>
    %251 = arith.addf %250, %249 : vector<8x128xf32>
    %252 = arith.divf %250, %251 : vector<8x128xf32>
    %253 = arith.mulf %244, %166 : vector<8x128xf32>
    %254 = arith.mulf %238, %246 : vector<8x128xf32>
    %255 = arith.addf %253, %254 : vector<8x128xf32>
    %256 = math.tanh %255 : vector<8x128xf32>
    %257 = arith.mulf %252, %256 : vector<8x128xf32>
    %258 = vector.broadcast %229 : i32 to vector<8x1xi32>
    %259 = arith.cmpi slt, %258, %3 : vector<8x1xi32>
    %260 = vector.shape_cast %259 : vector<8x1xi1> to vector<8x1xi1>
    %261 = vector.broadcast %260 : vector<8x1xi1> to vector<8x128xi1>
    %262 = arith.select %261, %257, %163 : vector<8x128xi1>, vector<8x128xf32>
    %263 = vector.shape_cast %259 : vector<8x1xi1> to vector<8x1xi1>
    %264 = vector.broadcast %263 : vector<8x1xi1> to vector<8x128xi1>
    %265 = arith.select %264, %255, %166 : vector<8x128xi1>, vector<8x128xf32>
    %cst_76 = arith.constant 0.000000e+00 : f32
    %266 = vector.broadcast %cst_76 : f32 to vector<8x128xf32>
    %267 = vector.shape_cast %259 : vector<8x1xi1> to vector<8x1xi1>
    %268 = vector.broadcast %267 : vector<8x1xi1> to vector<8x128xi1>
    %269 = arith.select %268, %257, %266 : vector<8x128xi1>, vector<8x128xf32>
    %270 = arith.index_cast %c2_i32 : i32 to index
    %c0_77 = arith.constant 0 : index
    %c0_78 = arith.constant 0 : index
    %271 = vector.load %arg10[%270, %c0_77, %c0_78] : memref<4x8x128xf32, #tpu.memory_space<vmem>>, vector<1x8x128xf32>
    %272 = vector.shape_cast %271 : vector<1x8x128xf32> to vector<8x128xf32>
    %273 = vector.shape_cast %269 : vector<8x128xf32> to vector<1x8x128xf32>
    tpu.vector_store %arg10[%270, %c0_77, %c0_78], %273 {strides = array<i32>} : memref<4x8x128xf32, #tpu.memory_space<vmem>>, vector<1x8x128xf32>,
    %c3_i32_79 = arith.constant 3 : i32
    %274 = arith.subi %c3_i32_79, %c2_i32 : i32
    %c8_i32_80 = arith.constant 8 : i32
    %275 = arith.muli %274, %c8_i32_80 : i32
    %276 = tpu.assume_multiple %275, 8 : i32
    %277 = arith.index_cast %276 : i32 to index
    %c0_81 = arith.constant 0 : index
    %278 = vector.load %arg17[%277, %c0_81] : memref<32x512xf32, #tpu.memory_space<vmem>>, vector<8x512xf32>
    %279 = arith.addi %22, %274 : i32
    %280 = arith.truncf %213 : vector<8x128xf32> to vector<8x128xbf16>
    %cst_82 = arith.constant dense<0.000000e+00> : vector<8x512xf32>
    %281 = tpu.matmul %280, %19, %cst_82 {dimension_numbers = #tpu.dot_dimension_numbers<[1], [0], [0], [1], [0, 0, 1, 1], [], []>} : vector<8x128xbf16>, vector<128x512xbf16>, vector<8x512xf32> -> vector<8x512xf32>
    %282 = arith.addf %278, %281 : vector<8x512xf32>
    %283 = vector.extract_strided_slice %282 {offsets = [0, 0], sizes = [8, 128], strides = [1, 1]} : vector<8x512xf32> to vector<8x128xf32>
    %284 = arith.negf %283 : vector<8x128xf32>
    %285 = math.exp %284 : vector<8x128xf32>
    %cst_83 = arith.constant 1.000000e+00 : f32
    %286 = vector.broadcast %cst_83 : f32 to vector<8x128xf32>
    %287 = arith.addf %286, %285 : vector<8x128xf32>
    %288 = arith.divf %286, %287 : vector<8x128xf32>
    %289 = vector.extract_strided_slice %282 {offsets = [0, 128], sizes = [8, 128], strides = [1, 1]} : vector<8x512xf32> to vector<8x128xf32>
    %290 = arith.negf %289 : vector<8x128xf32>
    %291 = math.exp %290 : vector<8x128xf32>
    %cst_84 = arith.constant 1.000000e+00 : f32
    %292 = vector.broadcast %cst_84 : f32 to vector<8x128xf32>
    %293 = arith.addf %292, %291 : vector<8x128xf32>
    %294 = arith.divf %292, %293 : vector<8x128xf32>
    %295 = vector.extract_strided_slice %282 {offsets = [0, 256], sizes = [8, 128], strides = [1, 1]} : vector<8x512xf32> to vector<8x128xf32>
    %296 = math.tanh %295 : vector<8x128xf32>
    %297 = vector.extract_strided_slice %282 {offsets = [0, 384], sizes = [8, 128], strides = [1, 1]} : vector<8x512xf32> to vector<8x128xf32>
    %298 = arith.negf %297 : vector<8x128xf32>
    %299 = math.exp %298 : vector<8x128xf32>
    %cst_85 = arith.constant 1.000000e+00 : f32
    %300 = vector.broadcast %cst_85 : f32 to vector<8x128xf32>
    %301 = arith.addf %300, %299 : vector<8x128xf32>
    %302 = arith.divf %300, %301 : vector<8x128xf32>
    %303 = arith.mulf %294, %216 : vector<8x128xf32>
    %304 = arith.mulf %288, %296 : vector<8x128xf32>
    %305 = arith.addf %303, %304 : vector<8x128xf32>
    %306 = math.tanh %305 : vector<8x128xf32>
    %307 = arith.mulf %302, %306 : vector<8x128xf32>
    %308 = vector.broadcast %279 : i32 to vector<8x1xi32>
    %309 = arith.cmpi slt, %308, %3 : vector<8x1xi32>
    %310 = vector.shape_cast %309 : vector<8x1xi1> to vector<8x1xi1>
    %311 = vector.broadcast %310 : vector<8x1xi1> to vector<8x128xi1>
    %312 = arith.select %311, %307, %213 : vector<8x128xi1>, vector<8x128xf32>
    %313 = vector.shape_cast %309 : vector<8x1xi1> to vector<8x1xi1>
    %314 = vector.broadcast %313 : vector<8x1xi1> to vector<8x128xi1>
    %315 = arith.select %314, %305, %216 : vector<8x128xi1>, vector<8x128xf32>
    %cst_86 = arith.constant 0.000000e+00 : f32
    %316 = vector.broadcast %cst_86 : f32 to vector<8x128xf32>
    %317 = vector.shape_cast %309 : vector<8x1xi1> to vector<8x1xi1>
    %318 = vector.broadcast %317 : vector<8x1xi1> to vector<8x128xi1>
    %319 = arith.select %318, %307, %316 : vector<8x128xi1>, vector<8x128xf32>
    %320 = arith.index_cast %274 : i32 to index
    %c0_87 = arith.constant 0 : index
    %c0_88 = arith.constant 0 : index
    %321 = vector.load %arg11[%320, %c0_87, %c0_88] : memref<4x8x128xf32, #tpu.memory_space<vmem>>, vector<1x8x128xf32>
    %322 = vector.shape_cast %321 : vector<1x8x128xf32> to vector<8x128xf32>
    %323 = vector.shape_cast %319 : vector<8x128xf32> to vector<1x8x128xf32>
    tpu.vector_store %arg11[%320, %c0_87, %c0_88], %323 {strides = array<i32>} : memref<4x8x128xf32, #tpu.memory_space<vmem>>, vector<1x8x128xf32>,
    %c3_i32_89 = arith.constant 3 : i32
    %c8_i32_90 = arith.constant 8 : i32
    %324 = arith.muli %c3_i32_89, %c8_i32_90 : i32
    %325 = tpu.assume_multiple %324, 8 : i32
    %326 = arith.index_cast %325 : i32 to index
    %c0_91 = arith.constant 0 : index
    %327 = vector.load %arg16[%326, %c0_91] : memref<32x512xf32, #tpu.memory_space<vmem>>, vector<8x512xf32>
    %328 = arith.addi %20, %c3_i32_89 : i32
    %329 = arith.truncf %262 : vector<8x128xf32> to vector<8x128xbf16>
    %cst_92 = arith.constant dense<0.000000e+00> : vector<8x512xf32>
    %330 = tpu.matmul %329, %18, %cst_92 {dimension_numbers = #tpu.dot_dimension_numbers<[1], [0], [0], [1], [0, 0, 1, 1], [], []>} : vector<8x128xbf16>, vector<128x512xbf16>, vector<8x512xf32> -> vector<8x512xf32>
    %331 = arith.addf %327, %330 : vector<8x512xf32>
    %332 = vector.extract_strided_slice %331 {offsets = [0, 0], sizes = [8, 128], strides = [1, 1]} : vector<8x512xf32> to vector<8x128xf32>
    %333 = arith.negf %332 : vector<8x128xf32>
    %334 = math.exp %333 : vector<8x128xf32>
    %cst_93 = arith.constant 1.000000e+00 : f32
    %335 = vector.broadcast %cst_93 : f32 to vector<8x128xf32>
    %336 = arith.addf %335, %334 : vector<8x128xf32>
    %337 = arith.divf %335, %336 : vector<8x128xf32>
    %338 = vector.extract_strided_slice %331 {offsets = [0, 128], sizes = [8, 128], strides = [1, 1]} : vector<8x512xf32> to vector<8x128xf32>
    %339 = arith.negf %338 : vector<8x128xf32>
    %340 = math.exp %339 : vector<8x128xf32>
    %cst_94 = arith.constant 1.000000e+00 : f32
    %341 = vector.broadcast %cst_94 : f32 to vector<8x128xf32>
    %342 = arith.addf %341, %340 : vector<8x128xf32>
    %343 = arith.divf %341, %342 : vector<8x128xf32>
    %344 = vector.extract_strided_slice %331 {offsets = [0, 256], sizes = [8, 128], strides = [1, 1]} : vector<8x512xf32> to vector<8x128xf32>
    %345 = math.tanh %344 : vector<8x128xf32>
    %346 = vector.extract_strided_slice %331 {offsets = [0, 384], sizes = [8, 128], strides = [1, 1]} : vector<8x512xf32> to vector<8x128xf32>
    %347 = arith.negf %346 : vector<8x128xf32>
    %348 = math.exp %347 : vector<8x128xf32>
    %cst_95 = arith.constant 1.000000e+00 : f32
    %349 = vector.broadcast %cst_95 : f32 to vector<8x128xf32>
    %350 = arith.addf %349, %348 : vector<8x128xf32>
    %351 = arith.divf %349, %350 : vector<8x128xf32>
    %352 = arith.mulf %343, %265 : vector<8x128xf32>
    %353 = arith.mulf %337, %345 : vector<8x128xf32>
    %354 = arith.addf %352, %353 : vector<8x128xf32>
    %355 = math.tanh %354 : vector<8x128xf32>
    %356 = arith.mulf %351, %355 : vector<8x128xf32>
    %357 = vector.broadcast %328 : i32 to vector<8x1xi32>
    %358 = arith.cmpi slt, %357, %3 : vector<8x1xi32>
    %359 = vector.shape_cast %358 : vector<8x1xi1> to vector<8x1xi1>
    %360 = vector.broadcast %359 : vector<8x1xi1> to vector<8x128xi1>
    %361 = arith.select %360, %356, %262 : vector<8x128xi1>, vector<8x128xf32>
    %362 = vector.shape_cast %358 : vector<8x1xi1> to vector<8x1xi1>
    %363 = vector.broadcast %362 : vector<8x1xi1> to vector<8x128xi1>
    %364 = arith.select %363, %354, %265 : vector<8x128xi1>, vector<8x128xf32>
    %cst_96 = arith.constant 0.000000e+00 : f32
    %365 = vector.broadcast %cst_96 : f32 to vector<8x128xf32>
    %366 = vector.shape_cast %358 : vector<8x1xi1> to vector<8x1xi1>
    %367 = vector.broadcast %366 : vector<8x1xi1> to vector<8x128xi1>
    %368 = arith.select %367, %356, %365 : vector<8x128xi1>, vector<8x128xf32>
    %369 = arith.index_cast %c3_i32_89 : i32 to index
    %c0_97 = arith.constant 0 : index
    %c0_98 = arith.constant 0 : index
    %370 = vector.load %arg10[%369, %c0_97, %c0_98] : memref<4x8x128xf32, #tpu.memory_space<vmem>>, vector<1x8x128xf32>
    %371 = vector.shape_cast %370 : vector<1x8x128xf32> to vector<8x128xf32>
    %372 = vector.shape_cast %368 : vector<8x128xf32> to vector<1x8x128xf32>
    tpu.vector_store %arg10[%369, %c0_97, %c0_98], %372 {strides = array<i32>} : memref<4x8x128xf32, #tpu.memory_space<vmem>>, vector<1x8x128xf32>,
    %c3_i32_99 = arith.constant 3 : i32
    %373 = arith.subi %c3_i32_99, %c3_i32_89 : i32
    %c8_i32_100 = arith.constant 8 : i32
    %374 = arith.muli %373, %c8_i32_100 : i32
    %375 = tpu.assume_multiple %374, 8 : i32
    %376 = arith.index_cast %375 : i32 to index
    %c0_101 = arith.constant 0 : index
    %377 = vector.load %arg17[%376, %c0_101] : memref<32x512xf32, #tpu.memory_space<vmem>>, vector<8x512xf32>
    %378 = arith.addi %22, %373 : i32
    %379 = arith.truncf %312 : vector<8x128xf32> to vector<8x128xbf16>
    %cst_102 = arith.constant dense<0.000000e+00> : vector<8x512xf32>
    %380 = tpu.matmul %379, %19, %cst_102 {dimension_numbers = #tpu.dot_dimension_numbers<[1], [0], [0], [1], [0, 0, 1, 1], [], []>} : vector<8x128xbf16>, vector<128x512xbf16>, vector<8x512xf32> -> vector<8x512xf32>
    %381 = arith.addf %377, %380 : vector<8x512xf32>
    %382 = vector.extract_strided_slice %381 {offsets = [0, 0], sizes = [8, 128], strides = [1, 1]} : vector<8x512xf32> to vector<8x128xf32>
    %383 = arith.negf %382 : vector<8x128xf32>
    %384 = math.exp %383 : vector<8x128xf32>
    %cst_103 = arith.constant 1.000000e+00 : f32
    %385 = vector.broadcast %cst_103 : f32 to vector<8x128xf32>
    %386 = arith.addf %385, %384 : vector<8x128xf32>
    %387 = arith.divf %385, %386 : vector<8x128xf32>
    %388 = vector.extract_strided_slice %381 {offsets = [0, 128], sizes = [8, 128], strides = [1, 1]} : vector<8x512xf32> to vector<8x128xf32>
    %389 = arith.negf %388 : vector<8x128xf32>
    %390 = math.exp %389 : vector<8x128xf32>
    %cst_104 = arith.constant 1.000000e+00 : f32
    %391 = vector.broadcast %cst_104 : f32 to vector<8x128xf32>
    %392 = arith.addf %391, %390 : vector<8x128xf32>
    %393 = arith.divf %391, %392 : vector<8x128xf32>
    %394 = vector.extract_strided_slice %381 {offsets = [0, 256], sizes = [8, 128], strides = [1, 1]} : vector<8x512xf32> to vector<8x128xf32>
    %395 = math.tanh %394 : vector<8x128xf32>
    %396 = vector.extract_strided_slice %381 {offsets = [0, 384], sizes = [8, 128], strides = [1, 1]} : vector<8x512xf32> to vector<8x128xf32>
    %397 = arith.negf %396 : vector<8x128xf32>
    %398 = math.exp %397 : vector<8x128xf32>
    %cst_105 = arith.constant 1.000000e+00 : f32
    %399 = vector.broadcast %cst_105 : f32 to vector<8x128xf32>
    %400 = arith.addf %399, %398 : vector<8x128xf32>
    %401 = arith.divf %399, %400 : vector<8x128xf32>
    %402 = arith.mulf %393, %315 : vector<8x128xf32>
    %403 = arith.mulf %387, %395 : vector<8x128xf32>
    %404 = arith.addf %402, %403 : vector<8x128xf32>
    %405 = math.tanh %404 : vector<8x128xf32>
    %406 = arith.mulf %401, %405 : vector<8x128xf32>
    %407 = vector.broadcast %378 : i32 to vector<8x1xi32>
    %408 = arith.cmpi slt, %407, %3 : vector<8x1xi32>
    %409 = vector.shape_cast %408 : vector<8x1xi1> to vector<8x1xi1>
    %410 = vector.broadcast %409 : vector<8x1xi1> to vector<8x128xi1>
    %411 = arith.select %410, %406, %312 : vector<8x128xi1>, vector<8x128xf32>
    %412 = vector.shape_cast %408 : vector<8x1xi1> to vector<8x1xi1>
    %413 = vector.broadcast %412 : vector<8x1xi1> to vector<8x128xi1>
    %414 = arith.select %413, %404, %315 : vector<8x128xi1>, vector<8x128xf32>
    %cst_106 = arith.constant 0.000000e+00 : f32
    %415 = vector.broadcast %cst_106 : f32 to vector<8x128xf32>
    %416 = vector.shape_cast %408 : vector<8x1xi1> to vector<8x1xi1>
    %417 = vector.broadcast %416 : vector<8x1xi1> to vector<8x128xi1>
    %418 = arith.select %417, %406, %415 : vector<8x128xi1>, vector<8x128xf32>
    %419 = arith.index_cast %373 : i32 to index
    %c0_107 = arith.constant 0 : index
    %c0_108 = arith.constant 0 : index
    %420 = vector.load %arg11[%419, %c0_107, %c0_108] : memref<4x8x128xf32, #tpu.memory_space<vmem>>, vector<1x8x128xf32>
    %421 = vector.shape_cast %420 : vector<1x8x128xf32> to vector<8x128xf32>
    %422 = vector.shape_cast %418 : vector<8x128xf32> to vector<1x8x128xf32>
    tpu.vector_store %arg11[%419, %c0_107, %c0_108], %422 {strides = array<i32>} : memref<4x8x128xf32, #tpu.memory_space<vmem>>, vector<1x8x128xf32>,
    %c4_i32_109 = arith.constant 4 : i32
    %c0_110 = arith.constant 0 : index
    %c0_111 = arith.constant 0 : index
    %423 = vector.load %arg12[%c0_110, %c0_111] : memref<8x128xf32, #tpu.memory_space<vmem>>, vector<8x128xf32>
    tpu.vector_store %arg12[%c0_110, %c0_111], %361 {strides = array<i32>} : memref<8x128xf32, #tpu.memory_space<vmem>>, vector<8x128xf32>,
    %c0_112 = arith.constant 0 : index
    %c0_113 = arith.constant 0 : index
    %424 = vector.load %arg13[%c0_112, %c0_113] : memref<8x128xf32, #tpu.memory_space<vmem>>, vector<8x128xf32>
    tpu.vector_store %arg13[%c0_112, %c0_113], %364 {strides = array<i32>} : memref<8x128xf32, #tpu.memory_space<vmem>>, vector<8x128xf32>,
    %c0_114 = arith.constant 0 : index
    %c0_115 = arith.constant 0 : index
    %425 = vector.load %arg14[%c0_114, %c0_115] : memref<8x128xf32, #tpu.memory_space<vmem>>, vector<8x128xf32>
    tpu.vector_store %arg14[%c0_114, %c0_115], %411 {strides = array<i32>} : memref<8x128xf32, #tpu.memory_space<vmem>>, vector<8x128xf32>,
    %c0_116 = arith.constant 0 : index
    %c0_117 = arith.constant 0 : index
    %426 = vector.load %arg15[%c0_116, %c0_117] : memref<8x128xf32, #tpu.memory_space<vmem>>, vector<8x128xf32>
    tpu.vector_store %arg15[%c0_116, %c0_117], %414 {strides = array<i32>} : memref<8x128xf32, #tpu.memory_space<vmem>>, vector<8x128xf32>,
    return
  }
  func.func @transform_0(%arg0: i32) -> (i32, i32) {
    %c0_i32 = arith.constant 0 : i32
    %c0_i32_0 = arith.constant 0 : i32
    %c0_i32_1 = arith.constant 0 : i32
    return %c0_i32, %c0_i32_0 : i32, i32
  }
  func.func @transform_1(%arg0: i32) -> (i32, i32) {
    %c0_i32 = arith.constant 0 : i32
    %c0_i32_0 = arith.constant 0 : i32
    return %arg0, %c0_i32 : i32, i32
  }
  func.func @transform_2(%arg0: i32) -> (i32, i32) {
    %c1_i32 = arith.constant 1 : i32
    %0 = arith.subi %c1_i32, %arg0 : i32
    %c0_i32 = arith.constant 0 : i32
    %c0_i32_0 = arith.constant 0 : i32
    return %0, %c0_i32 : i32, i32
  }
  func.func @transform_3(%arg0: i32) -> (i32, i32) {
    %c0_i32 = arith.constant 0 : i32
    %c0_i32_0 = arith.constant 0 : i32
    %c0_i32_1 = arith.constant 0 : i32
    return %c0_i32, %c0_i32_0 : i32, i32
  }
  func.func @transform_4(%arg0: i32) -> (i32, i32) {
    %c0_i32 = arith.constant 0 : i32
    %c0_i32_0 = arith.constant 0 : i32
    %c0_i32_1 = arith.constant 0 : i32
    return %c0_i32, %c0_i32_0 : i32, i32
  }
  func.func @transform_5(%arg0: i32) -> (i32, i32) {
    %c0_i32 = arith.constant 0 : i32
    %c0_i32_0 = arith.constant 0 : i32
    %c0_i32_1 = arith.constant 0 : i32
    return %c0_i32, %c0_i32_0 : i32, i32
  }
  func.func @transform_6(%arg0: i32) -> (i32, i32) {
    %c0_i32 = arith.constant 0 : i32
    %c0_i32_0 = arith.constant 0 : i32
    %c0_i32_1 = arith.constant 0 : i32
    return %c0_i32, %c0_i32_0 : i32, i32
  }
  func.func @transform_7(%arg0: i32) -> (i32, i32) {
    %c0_i32 = arith.constant 0 : i32
    %c0_i32_0 = arith.constant 0 : i32
    %c0_i32_1 = arith.constant 0 : i32
    return %c0_i32, %c0_i32_0 : i32, i32
  }
  func.func @transform_8(%arg0: i32) -> (i32, i32) {
    %c0_i32 = arith.constant 0 : i32
    %c0_i32_0 = arith.constant 0 : i32
    %c0_i32_1 = arith.constant 0 : i32
    return %c0_i32, %c0_i32_0 : i32, i32
  }
  func.func @transform_9(%arg0: i32) -> (i32, i32, i32) {
    %c0_i32 = arith.constant 0 : i32
    %c0_i32_0 = arith.constant 0 : i32
    %c0_i32_1 = arith.constant 0 : i32
    return %arg0, %c0_i32, %c0_i32_0 : i32, i32, i32
  }
  func.func @transform_10(%arg0: i32) -> (i32, i32, i32) {
    %c1_i32 = arith.constant 1 : i32
    %0 = arith.subi %c1_i32, %arg0 : i32
    %c0_i32 = arith.constant 0 : i32
    %c0_i32_0 = arith.constant 0 : i32
    %c0_i32_1 = arith.constant 0 : i32
    return %0, %c0_i32, %c0_i32_0 : i32, i32, i32
  }
  func.func @transform_11(%arg0: i32) -> (i32, i32) {
    %c0_i32 = arith.constant 0 : i32
    %c0_i32_0 = arith.constant 0 : i32
    %c0_i32_1 = arith.constant 0 : i32
    return %c0_i32, %c0_i32_0 : i32, i32
  }
  func.func @transform_12(%arg0: i32) -> (i32, i32) {
    %c0_i32 = arith.constant 0 : i32
    %c0_i32_0 = arith.constant 0 : i32
    %c0_i32_1 = arith.constant 0 : i32
    return %c0_i32, %c0_i32_0 : i32, i32
  }
  func.func @transform_13(%arg0: i32) -> (i32, i32) {
    %c0_i32 = arith.constant 0 : i32
    %c0_i32_0 = arith.constant 0 : i32
    %c0_i32_1 = arith.constant 0 : i32
    return %c0_i32, %c0_i32_0 : i32, i32
  }
  func.func @transform_14(%arg0: i32) -> (i32, i32) {
    %c0_i32 = arith.constant 0 : i32
    %c0_i32_0 = arith.constant 0 : i32
    %c0_i32_1 = arith.constant 0 : i32
    return %c0_i32, %c0_i32_0 : i32, i32
  }
}

</mosaic_0001>

<bundles_post_ra>
// kernel: _lambda_.1
= control target key start
LH: loop header
LB: loop body
LE: loop exit
PB: predicated region body
PF: predicated region fallthrough
CT: control target
= control target key end

     0   :  { %s4505_s0 = inlined_call_operand.vmem [shape: s32[8,1], index: 0, kind: input, shape index: {}]   ;;  %s4506_s1 = inlined_call_operand.vmem [shape: bf16[64,32], index: 1, kind: input, shape index: {}, may-alias: {1,2}]   ;;  %s4507_s2 = inlined_call_operand.vmem [shape: bf16[64,32], index: 2, kind: input, shape index: {}, may-alias: {1,2}]   ;;  %s4508_s3 = inlined_call_operand.vmem [shape: bf16[32,512], index: 3, kind: input, shape index: {}]   ;;  %s4509_s4 = inlined_call_operand.hbm [shape: bf16[128,512], index: 4, kind: input, shape index: {}]   ;;  %s4510_s5 = inlined_call_operand.vmem [shape: f32[1,512], index: 5, kind: input, shape index: {}]   ;;  %s4511_s6 = inlined_call_operand.vmem [shape: bf16[32,512], index: 6, kind: input, shape index: {}]   ;;  %s4512_s7 = inlined_call_operand.vmem [shape: bf16[128,512], index: 7, kind: input, shape index: {}]   ;;  %s4513_s8 = inlined_call_operand.vmem [shape: f32[1,512], index: 8, kind: input, shape index: {}]   ;;  %s4514_s9 = inlined_call_operand.vmem [shape: f32[8,8,128], index: 9, kind: output, shape index: {0}]   ;;  %s4515_s10 = inlined_call_operand.vmem [shape: f32[8,8,128], index: 10, kind: output, shape index: {1}]   ;;  %s4516_s11 = inlined_call_operand.vmem [shape: f32[8,128], index: 11, kind: output, shape index: {2}]   ;;  %s4517_s12 = inlined_call_operand.vmem [shape: f32[8,128], index: 12, kind: output, shape index: {3}]   ;;  %s4518_s13 = inlined_call_operand.vmem [shape: f32[8,128], index: 13, kind: output, shape index: {4}]   ;;  %s4519_s14 = inlined_call_operand.vmem [shape: f32[8,128], index: 14, kind: output, shape index: {5}]  }
   0x1   :  { %4594 = sst [smem:[#allocation67_spill]] %s4505_s0 }
   0x2   :  { %4595 = sst [smem:[#allocation68_spill]] %s4509_s4 }
   0x3   :  { %4596 = sst [smem:[#allocation69_spill]] %s4510_s5 }
   0x4   :  { %4597 = sst [smem:[#allocation70_spill]] %s4513_s8 }
   0x5   :  { %20 = vsyncpa [#allocation5], 0  ;;  %s3292_s29 = smov 0  }
   0x6 LB: > { %4598 = sst [smem:[#allocation7_spill]] %s3210_s29  ;;  %s3301_s17 = sadd.s32 4294967295, %s3210_s29   ;;  %s3210_s29 = sphi %s3292_s29, %s26_s29  }
   0x7   : > { %s4599_s4 = sld [smem:[#allocation68_spill]]  ;;  %p2531_p0 = scmp.ge.s32.totalorder %s3210_s29, 1 }
   0x8   : > { %p370_p1 = scmp.lt.s32.totalorder %s3210_s29, 3  ;;  %p2532_p2 = scmp.ne.s32.totalorder %s3301_s17, 0 }
   0x9   : > { %p3023_p3 = scmp.eq.s32.totalorder %s3301_s17, 0  ;;  %s3212_s18 = smov [#allocation4]  }
   0xa   : > { %p371_p4 = pnand %p2531_p0, %p370_p1  ;;  %s389_s19 = sshll.u32 %s3212_s18, 4  ;;  %s390_s19 = int_to_ptr.vmem [resolvable:$true] %s389_s19 }
   0xb   : > { %s3213_s20 = smov 256   ;;  %s3214_s21 = smov 16  }
   0xc   : > { %p3019_p5 = pneg %p371_p4  ;;  %437 = sbr.rel (%p371_p4) target bundleno = 828 (0x33c), region = 56 }
   0xd   : > { %s387_s16 = sshll.u32 %s4599_s4, 4  ;;  %s388_s16 = int_to_ptr.hbm [resolvable:$true] %s387_s16 }
   0xe   : > { %p3020_p6 = pnand %p3023_p3, %p3019_p5 }
  0x10   : > { %3022 = dma.hbm_to_vmem [thread:$0]  (!%p3020_p6), %s388_s16, 4096, %s390_s19, [#allocation5], %s3213_s20, %s3213_s20, %s3214_s21  }
  0x11   : > { %3205 = dma.done.wait (%p3023_p3), [#allocation5], 4096  }
  0x12   : > { %3207 = vsyncadd (%p3023_p3), [#allocation5], 4294963200  ;;  %s3308_s22 = sshll.u32 %s3301_s17, 2  ;;  %s502_s23 = ssub.s32 1, %s3301_s17 }
  0x13   : > { %p497_p7 = scmp.lt.s32.totalorder %s3308_s22, 7  ;;  %s3312_s24 = sshll.u32 %s502_s23, 2 }
  0x14   : > { %p504_p8 = scmp.lt.s32.totalorder %s3312_s24, 7 }
  0x15   : > { %s498_s25 = scalar_select %p497_p7, %s3308_s22, 7 }
  0x16   : > { %s505_s26 = scalar_select %p504_p8, %s3312_s24, 7 }
  0x17   : > { %s2537_s27 = sshll.u32 %s498_s25, 2  ;;  %s2541_s28 = sshll.u32 %s498_s25, 3 }
  0x18   : > { %s3320_s16 = scalar_lea.vmem %s4506_s1, %s2537_s27  ;;  %s2539_s18 = sshll.u32 %s505_s26, 2 }
  0x19   : > { %s3325_s21 = scalar_lea.vmem %s4507_s2, %s2539_s18  ;;  %s3330_s29 = scalar_lea.vmem %s4514_s9, %s2541_s28 }
  0x1a   : > { %s2543_s8 = sshll.u32 %s505_s26, 3  ;;  %528 = sbr.rel (%p2532_p2) target bundleno = 36 (0x24), region = 64 }
  0x1b   : > { %s3335_s25 = scalar_lea.vmem %s4515_s10, %s2543_s8 }
  0x1f   : > { %v3215_v0 = vmov 0.0  }
  0x20   : > { %529 = vst [vmem:[%s4516_s11] sm:$0xff] %v3215_v0 }
  0x21   : > { %530 = vst [vmem:[%s4517_s12] sm:$0xff] %v3215_v0 }
  0x22   : > { %531 = vst [vmem:[%s4518_s13] sm:$0xff] %v3215_v0 }
  0x23   : > { %532 = vst [vmem:[%s4519_s14] sm:$0xff] %v3215_v0 }
  0x24 PF: > { %v2571_v1 = vld [vmem:[%s4508_s3 + $0x20] sm:$0xf]  ;;  %v2939_v2 = vld [vmem:[%s4508_s3 + $0x2c] sm:$0xf0]  ;;  %v2937_v3 = vld [vmem:[%s4508_s3 + $0x24] sm:$0xf] }
  0x25   : > { %v2572_v4 = vor.u32 %v2939_v2, %v2571_v1  ;;  %v2573_v5 = vld [vmem:[%s4508_s3 + $0x30] sm:$0xf0]  ;;  %v2579_v6 = vld [vmem:[%s4508_s3 + $0x28] sm:$0xf]  ;;  %v2940_v7 = vld [vmem:[%s4508_s3 + $0x34] sm:$0xf0] }
  0x26   : > { %v2576_v8 = vor.u32 %v2937_v3, %v2573_v5  ;;  %v2580_v9 = vor.u32 %v2940_v7, %v2579_v6  ;;  %v2938_v10 = vld [vmem:[%s4508_s3 + $0x2c] sm:$0xf]  ;;  %v2581_v11 = vld [vmem:[%s4508_s3 + $0x38] sm:$0xf0]  ;;  %v2555_v12 = vld [vmem:[%s4508_s3] sm:$0xf] }
  0x27   : > { %619 = vmatpush.bf16.msra.mxu0 %v2572_v4  ;;  %v2584_v13 = vor.u32 %v2938_v10, %v2581_v11  ;;  %v2935_v14 = vld [vmem:[%s4508_s3 + $0xc] sm:$0xf0]  ;;  %v2933_v15 = vld [vmem:[%s4508_s3 + $0x4] sm:$0xf]  ;;  %v2557_v16 = vld [vmem:[%s4508_s3 + $0x10] sm:$0xf0] }
  0x28   : > { %638 = vmatpush.bf16.msra.mxu1 %v2576_v8  ;;  %657 = vmatpush.bf16.msra.mxu2 %v2580_v9  ;;  %v2556_v17 = vor.u32 %v2935_v14, %v2555_v12  ;;  %v2560_v18 = vor.u32 %v2933_v15, %v2557_v16  ;;  %v2563_v19 = vld [vmem:[%s4508_s3 + $0x8] sm:$0xf]  ;;  %v2936_v20 = vld [vmem:[%s4508_s3 + $0x14] sm:$0xf0]  ;;  %v2934_v21 = vld [vmem:[%s4508_s3 + $0xc] sm:$0xf] }
  0x29   : > { %676 = vmatpush.bf16.msra.mxu3 %v2584_v13  ;;  %v2564_v22 = vor.u32 %v2936_v20, %v2563_v19  ;;  %v2565_v23 = vld [vmem:[%s4508_s3 + $0x18] sm:$0xf0]  ;;  %v2931_v24 = vld [vmem:[%s3320_s16] sm:$0xff]  ;;  %vm606_vm0 = vcmask 261120   ;;  %v2949_v27 = vld [vmem:[%s4511_s6 + $0x2c] sm:$0xf0] }
  0x2a   : > { %v2619_v25 = vld [vmem:[%s4511_s6 + $0x20] sm:$0xf]  ;;  %v2568_v26 = vor.u32 %v2934_v21, %v2565_v23  ;;  %v2947_v28 = vld [vmem:[%s4511_s6 + $0x24] sm:$0xf]  ;;  %v2621_v29 = vld [vmem:[%s4511_s6 + $0x30] sm:$0xf0] }
  0x2b   : > { %620 = vmatpush.bf16.msra.mxu0 %v2556_v17  ;;  %v2620_v30 = vor.u32 %v2949_v27, %v2619_v25  ;;  %v2624_v31 = vor.u32 %v2947_v28, %v2621_v29  ;;  %v2948_v32 = vld [vmem:[%s4511_s6 + $0x2c] sm:$0xf]  ;;  %v2629_v33 = vld [vmem:[%s4511_s6 + $0x38] sm:$0xf0]  ;;  %v2627_v34 = vld [vmem:[%s4511_s6 + $0x28] sm:$0xf] }
  0x2c   : > { %639 = vmatpush.bf16.msra.mxu1 %v2560_v18  ;;  %658 = vmatpush.bf16.msra.mxu2 %v2564_v22  ;;  %v2950_v35 = vld [vmem:[%s4511_s6 + $0x34] sm:$0xf0]  ;;  %v2603_v36 = vld [vmem:[%s4511_s6] sm:$0xf]  ;;  %v2632_v37 = vor.u32 %v2948_v32, %v2629_v33  ;;  %v2945_v39 = vld [vmem:[%s4511_s6 + $0xc] sm:$0xf0] }
  0x2d   : > { %677 = vmatpush.bf16.msra.mxu3 %v2568_v26  ;;  %v2628_v38 = vor.u32 %v2950_v35, %v2627_v34  ;;  %v2943_v40 = vld [vmem:[%s4511_s6 + $0x4] sm:$0xf]  ;;  %v2605_v41 = vld [vmem:[%s4511_s6 + $0x10] sm:$0xf0]  ;;  %v2604_v42 = vor.u32 %v2945_v39, %v2603_v36  ;;  %v2611_v44 = vld [vmem:[%s4511_s6 + $0x8] sm:$0xf] }
  0x2e   : > { %2585 = vmatmul.msk.bf16.vlgmr.msra.gmra.mxu0 %vm606_vm0, %v2931_v24  ;;  %v2608_v43 = vor.u32 %v2943_v40, %v2605_v41  ;;  %v2946_v45 = vld [vmem:[%s4511_s6 + $0x14] sm:$0xf0]  ;;  %v2944_v46 = vld [vmem:[%s4511_s6 + $0xc] sm:$0xf]  ;;  %v2613_v47 = vld [vmem:[%s4511_s6 + $0x18] sm:$0xf0] }
  0x2f   : > { %789 = vmatpush.bf16.msrb.mxu0 %v2620_v30  ;;  %2587 = vmatmul.msk.bf16.vlgmr.msra.gmra.mxu1 %vm606_vm0, %v2931_v24  ;;  %v2757_v48 = vld [vmem:[#allocation4 + $0xe0] sm:$0xf]  ;;  %v2981_v49 = vld [vmem:[#allocation4 + $0xec] sm:$0xf0]  ;;  %v2612_v50 = vor.u32 %v2946_v45, %v2611_v44  ;;  %v2979_v52 = vld [vmem:[#allocation4 + $0xe4] sm:$0xf]  ;;  %v2616_v55 = vor.u32 %v2944_v46, %v2613_v47 }
  0x30   : > { %808 = vmatpush.bf16.msrb.mxu1 %v2624_v31  ;;  %2589 = vmatmul.msk.bf16.vlgmr.msra.gmra.mxu2 %vm606_vm0, %v2931_v24  ;;  %v3452_v51 = vor.u32 %v2981_v49, %v2757_v48  ;;  %v2759_v53 = vld [vmem:[#allocation4 + $0xf0] sm:$0xf0]  ;;  %v2765_v54 = vld [vmem:[#allocation4 + $0xe8] sm:$0xf]  ;;  %v2982_v57 = vld [vmem:[#allocation4 + $0xf4] sm:$0xf0] }
  0x31   : > { %2591 = vmatmul.msk.bf16.vlgmr.msra.gmra.mxu3 %vm606_vm0, %v2931_v24  ;;  %827 = vmatpush.bf16.msrb.mxu2 %v2628_v38  ;;  %v3454_v56 = vor.u32 %v2979_v52, %v2759_v53  ;;  %v2980_v58 = vld [vmem:[#allocation4 + $0xec] sm:$0xf]  ;;  %v2767_v59 = vld [vmem:[#allocation4 + $0xf8] sm:$0xf0]  ;;  %v3457_v60 = vor.u32 %v2982_v57, %v2765_v54  ;;  %v2741_v62 = vld [vmem:[#allocation4 + $0xc0] sm:$0xf] }
  0x32   : > { %846 = vmatpush.bf16.msrb.mxu3 %v2632_v37  ;;  %v3459_v61 = vor.u32 %v2980_v58, %v2767_v59  ;;  %v2977_v63 = vld [vmem:[#allocation4 + $0xcc] sm:$0xf0]  ;;  %v2975_v0 = vld [vmem:[#allocation4 + $0xc4] sm:$0xf]  ;;  %v2743_v2 = vld [vmem:[#allocation4 + $0xd0] sm:$0xf0] }
  0x33   : > { %790 = vmatpush.bf16.msrb.mxu0 %v2604_v42  ;;  %v3462_v1 = vor.u32 %v2977_v63, %v2741_v62  ;;  %v2749_v3 = vld [vmem:[#allocation4 + $0xc8] sm:$0xf]  ;;  %v2978_v4 = vld [vmem:[#allocation4 + $0xd4] sm:$0xf0]  ;;  %v3464_v5 = vor.u32 %v2975_v0, %v2743_v2  ;;  %v2976_v6 = vld [vmem:[#allocation4 + $0xcc] sm:$0xf] }
  0x34   : > { %809 = vmatpush.bf16.msrb.mxu1 %v2608_v43  ;;  %v2751_v7 = vld [vmem:[#allocation4 + $0xd8] sm:$0xf0]  ;;  %v2725_v8 = vld [vmem:[#allocation4 + $0xa0] sm:$0xf]  ;;  %v3467_v9 = vor.u32 %v2978_v4, %v2749_v3  ;;  %v2973_v10 = vld [vmem:[#allocation4 + $0xac] sm:$0xf0] }
  0x35   : > { %828 = vmatpush.bf16.msrb.mxu2 %v2612_v50  ;;  %v2971_v11 = vld [vmem:[#allocation4 + $0xa4] sm:$0xf]  ;;  %v2727_v12 = vld [vmem:[#allocation4 + $0xb0] sm:$0xf0]  ;;  %v3471_v13 = vor.u32 %v2976_v6, %v2751_v7  ;;  %v3473_v14 = vor.u32 %v2973_v10, %v2725_v8  ;;  %v2733_v15 = vld [vmem:[#allocation4 + $0xa8] sm:$0xf] }
  0x36   : > { %847 = vmatpush.bf16.msrb.mxu3 %v2616_v55  ;;  %v2974_v16 = vld [vmem:[#allocation4 + $0xb4] sm:$0xf0]  ;;  %v3476_v17 = vor.u32 %v2971_v11, %v2727_v12  ;;  %v2972_v18 = vld [vmem:[#allocation4 + $0xac] sm:$0xf]  ;;  %v2735_v19 = vld [vmem:[#allocation4 + $0xb8] sm:$0xf0] }
  0x37   : > { %1114 = vmatpush.bf16.msra.mxu0 %v3452_v51  ;;  %v2932_v20 = vld [vmem:[%s3320_s16 + $0x8] sm:$0xff]  ;;  %v3480_v21 = vor.u32 %v2974_v16, %v2733_v15  ;;  %v2709_v22 = vld [vmem:[#allocation4 + $0x80] sm:$0xf]  ;;  %v2969_v23 = vld [vmem:[#allocation4 + $0x8c] sm:$0xf0]  ;;  %v3484_v25 = vor.u32 %v2972_v18, %v2735_v19  ;;  %s1251_s4 = sadd.s32 3, %s3312_s24 }
  0x38   : > { %1127 = vmatpush.bf16.msra.mxu1 %v3454_v56  ;;  %v2967_v24 = vld [vmem:[#allocation4 + $0x84] sm:$0xf]  ;;  %v2711_v26 = vld [vmem:[#allocation4 + $0x90] sm:$0xf0]  ;;  %v2717_v27 = vld [vmem:[#allocation4 + $0x88] sm:$0xf]  ;;  %v3487_v31 = vor.u32 %v2969_v23, %v2709_v22 }
  0x39   : > { %1140 = vmatpush.bf16.msra.mxu2 %v3457_v60  ;;  %v2970_v28 = vld [vmem:[#allocation4 + $0x94] sm:$0xf0]  ;;  %v2968_v29 = vld [vmem:[#allocation4 + $0x8c] sm:$0xf]  ;;  %v2719_v30 = vld [vmem:[#allocation4 + $0x98] sm:$0xf0]  ;;  %v3490_v32 = vor.u32 %v2967_v24, %v2711_v26 }
  0x3a   : > { %1153 = vmatpush.bf16.msra.mxu3 %v3459_v61  ;;  %v3492_v33 = vor.u32 %v2970_v28, %v2717_v27  ;;  %v2693_v34 = vld [vmem:[#allocation4 + $0x60] sm:$0xf]  ;;  %v2965_v35 = vld [vmem:[#allocation4 + $0x6c] sm:$0xf0]  ;;  %v2963_v36 = vld [vmem:[#allocation4 + $0x64] sm:$0xf]  ;;  %v3496_v37 = vor.u32 %v2968_v29, %v2719_v30 }
  0x3b   : > { %1115 = vmatpush.bf16.msra.mxu0 %v3462_v1  ;;  %v2695_v38 = vld [vmem:[#allocation4 + $0x70] sm:$0xf0]  ;;  %v2701_v39 = vld [vmem:[#allocation4 + $0x68] sm:$0xf]  ;;  %v2966_v40 = vld [vmem:[#allocation4 + $0x74] sm:$0xf0]  ;;  %v3502_v43 = vor.u32 %v2965_v35, %v2693_v34 }
  0x3c   : > { %1128 = vmatpush.bf16.msra.mxu1 %v3464_v5  ;;  %v2964_v41 = vld [vmem:[#allocation4 + $0x6c] sm:$0xf]  ;;  %v2703_v42 = vld [vmem:[#allocation4 + $0x78] sm:$0xf0]  ;;  %v3506_v44 = vor.u32 %v2963_v36, %v2695_v38  ;;  %v3508_v45 = vor.u32 %v2966_v40, %v2701_v39  ;;  %v2677_v46 = vld [vmem:[#allocation4 + $0x40] sm:$0xf] }
  0x3d   : > { %1141 = vmatpush.bf16.msra.mxu2 %v3467_v9  ;;  %v2961_v47 = vld [vmem:[#allocation4 + $0x4c] sm:$0xf0]  ;;  %v2959_v48 = vld [vmem:[#allocation4 + $0x44] sm:$0xf]  ;;  %v3511_v49 = vor.u32 %v2964_v41, %v2703_v42  ;;  %v2679_v50 = vld [vmem:[#allocation4 + $0x50] sm:$0xf0] }
  0x3e   : > { %1154 = vmatpush.bf16.msra.mxu3 %v3471_v13  ;;  %2586 = vmatmul.msk.bf16.gmra.mxu0 %vm606_vm0, %v2932_v20  ;;  %v2685_v52 = vld [vmem:[#allocation4 + $0x48] sm:$0xf]  ;;  %v2962_v53 = vld [vmem:[#allocation4 + $0x54] sm:$0xf0]  ;;  %v2960_v54 = vld [vmem:[#allocation4 + $0x4c] sm:$0xf]  ;;  %v3514_v57 = vor.u32 %v2961_v47, %v2677_v46  ;;  %v3518_v58 = vor.u32 %v2959_v48, %v2679_v50 }
  0x3f   : > { %1116 = vmatpush.bf16.msra.mxu0 %v3473_v14  ;;  %2588 = vmatmul.msk.bf16.gmra.mxu1 %vm606_vm0, %v2932_v20  ;;  %v2687_v55 = vld [vmem:[#allocation4 + $0x58] sm:$0xf0]  ;;  %v3520_v59 = vor.u32 %v2962_v53, %v2685_v52  ;;  %v2661_v62 = vld [vmem:[#allocation4 + $0x20] sm:$0xf]  ;;  %v2957_v63 = vld [vmem:[#allocation4 + $0x2c] sm:$0xf0] }
  0x40   : > { %1129 = vmatpush.bf16.msra.mxu1 %v3476_v17  ;;  %2590 = vmatmul.msk.bf16.gmra.mxu2 %vm606_vm0, %v2932_v20  ;;  %v2955_v0 = vld [vmem:[#allocation4 + $0x24] sm:$0xf]  ;;  %v3523_v2 = vor.u32 %v2960_v54, %v2687_v55  ;;  %v2663_v3 = vld [vmem:[#allocation4 + $0x30] sm:$0xf0]  ;;  %v2669_v4 = vld [vmem:[#allocation4 + $0x28] sm:$0xf]  ;;  %v3527_v11 = vor.u32 %v2957_v63, %v2661_v62 }
  0x41   : > { %1142 = vmatpush.bf16.msra.mxu2 %v3480_v21  ;;  %2592 = vmatmul.msk.bf16.gmra.mxu3 %vm606_vm0, %v2932_v20  ;;  %v2958_v6 = vld [vmem:[#allocation4 + $0x34] sm:$0xf0]  ;;  %v2956_v7 = vld [vmem:[#allocation4 + $0x2c] sm:$0xf]  ;;  %v2671_v8 = vld [vmem:[#allocation4 + $0x38] sm:$0xf0]  ;;  %v3531_v16 = vor.u32 %v2955_v0, %v2663_v3 }
  0x42   : > { %1155 = vmatpush.bf16.msra.mxu3 %v3484_v25  ;;  %v2941_v10 = vld [vmem:[%s3325_s21] sm:$0xff]  ;;  %v2953_v15 = vld [vmem:[#allocation4 + $0xc] sm:$0xf0]  ;;  %v3533_v18 = vor.u32 %v2958_v6, %v2669_v4  ;;  %v2647_v20 = vld [vmem:[#allocation4 + $0x10] sm:$0xf0]  ;;  %v3536_v23 = vor.u32 %v2956_v7, %v2671_v8  ;;  %s4619_s8 = sld [smem:[#allocation67_spill]] }
  0x43   : > { %1117 = vmatpush.bf16.msra.mxu0 %v3487_v31  ;;  %v2645_v12 = vld [vmem:[#allocation4] sm:$0xf]  ;;  %v2951_v19 = vld [vmem:[#allocation4 + $0x4] sm:$0xf]  ;;  %v2653_v22 = vld [vmem:[#allocation4 + $0x8] sm:$0xf] }
  0x44   : > { %1130 = vmatpush.bf16.msra.mxu1 %v3490_v32  ;;  %v2954_v24 = vld [vmem:[#allocation4 + $0x14] sm:$0xf0]  ;;  %v2952_v26 = vld [vmem:[#allocation4 + $0xc] sm:$0xf]  ;;  %v2655_v27 = vld [vmem:[#allocation4 + $0x18] sm:$0xf0]  ;;  %v3548_v34 = vor.u32 %v2953_v15, %v2645_v12  ;;  %v3561_v39 = vor.u32 %v2951_v19, %v2647_v20 }
  0x45   : > { %1143 = vmatpush.bf16.msra.mxu2 %v3492_v33  ;;  %v2888_v28 = vld [vmem:[%s4512_s7 + $0xe0] sm:$0xf]  ;;  %v3013_v29 = vld [vmem:[%s4512_s7 + $0xec] sm:$0xf0]  ;;  %v3011_v30 = vld [vmem:[%s4512_s7 + $0xe4] sm:$0xf]  ;;  %v3563_v40 = vor.u32 %v2954_v24, %v2653_v22  ;;  %v3573_v46 = vor.u32 %v2952_v26, %v2655_v27 }
  0x46   : > { %1156 = vmatpush.bf16.msra.mxu3 %v3496_v37  ;;  %v2890_v35 = vld [vmem:[%s4512_s7 + $0xf0] sm:$0xf0]  ;;  %v2896_v36 = vld [vmem:[%s4512_s7 + $0xe8] sm:$0xf]  ;;  %v3014_v38 = vld [vmem:[%s4512_s7 + $0xf4] sm:$0xf0]  ;;  %v3575_v47 = vor.u32 %v3013_v29, %v2888_v28 }
  0x47   : > { %1118 = vmatpush.bf16.msra.mxu0 %v3502_v43  ;;  %4600 = vst [vmem:[#allocation8_spill] sm:$0xff] %v3563_v40  ;;  %v3012_v41 = vld [vmem:[%s4512_s7 + $0xec] sm:$0xf]  ;;  %v2898_v42 = vld [vmem:[%s4512_s7 + $0xf8] sm:$0xf0]  ;;  %v3579_v48 = vor.u32 %v3011_v30, %v2890_v35  ;;  %v3581_v50 = vor.u32 %v3014_v38, %v2896_v36  ;;  %s2108_s19 = sadd.s32 3, %s3308_s22 }
  0x48   : > { %1131 = vmatpush.bf16.msra.mxu1 %v3506_v44  ;;  %4601 = vst [vmem:[#allocation9_spill] sm:$0xff] %v3573_v46  ;;  %v2872_v52 = vld [vmem:[%s4512_s7 + $0xc0] sm:$0xf]  ;;  %v3009_v53 = vld [vmem:[%s4512_s7 + $0xcc] sm:$0xf0]  ;;  %v3594_v55 = vor.u32 %v3012_v41, %v2898_v42  ;;  %v2942_v35 = vld [vmem:[%s3325_s21 + $0x8] sm:$0xff] }
  0x49   : > { %1144 = vmatpush.bf16.msra.mxu2 %v3508_v45  ;;  %4602 = vst [vmem:[#allocation10_spill] sm:$0xff] %v3575_v47  ;;  %v3007_v54 = vld [vmem:[%s4512_s7 + $0xc4] sm:$0xf]  ;;  %v2874_v62 = vld [vmem:[%s4512_s7 + $0xd0] sm:$0xf0]  ;;  %v3615_v6 = vor.u32 %v3009_v53, %v2872_v52  ;;  %s4650_s15 = sld [smem:[#allocation69_spill]] }
  0x4a   : > { %1157 = vmatpush.bf16.msra.mxu3 %v3511_v49  ;;  %4603 = vst [vmem:[#allocation11_spill] sm:$0xff] %v3579_v48  ;;  %v2880_v63 = vld [vmem:[%s4512_s7 + $0xc8] sm:$0xf]  ;;  %v3010_v0 = vld [vmem:[%s4512_s7 + $0xd4] sm:$0xf0]  ;;  %v3619_v7 = vor.u32 %v3007_v54, %v2874_v62  ;;  %s4661_s26 = sld [smem:[#allocation70_spill]] }
  0x4b   : > { %1119 = vmatpush.bf16.msra.mxu0 %v3514_v57  ;;  %4604 = vst [vmem:[#allocation12_spill] sm:$0xff] %v3581_v50  ;;  %v3008_v3 = vld [vmem:[%s4512_s7 + $0xcc] sm:$0xf]  ;;  %v2882_v4 = vld [vmem:[%s4512_s7 + $0xd8] sm:$0xf0]  ;;  %v3621_v8 = vor.u32 %v3010_v0, %v2880_v63  ;;  %s1691_s17 = sadd.s32 2, %s3312_s24 }
  0x4c   : > { %1132 = vmatpush.bf16.msra.mxu1 %v3518_v58  ;;  %4605 = vst [vmem:[#allocation13_spill] sm:$0xff] %v3594_v55  ;;  %v3005_v12 = vld [vmem:[%s4512_s7 + $0xac] sm:$0xf0]  ;;  %v3003_v15 = vld [vmem:[%s4512_s7 + $0xa4] sm:$0xf]  ;;  %v3633_v19 = vor.u32 %v3008_v3, %v2882_v4  ;;  %s1830_s23 = sadd.s32 2, %s3308_s22 }
  0x4d   : > { %1145 = vmatpush.bf16.msra.mxu2 %v3520_v59  ;;  %4606 = vst [vmem:[#allocation14_spill] sm:$0xff] %v3615_v6  ;;  %v2858_v20 = vld [vmem:[%s4512_s7 + $0xb0] sm:$0xf0]  ;;  %v2864_v22 = vld [vmem:[%s4512_s7 + $0xa8] sm:$0xf]  ;;  %s1969_s27 = sadd.s32 1, %s3312_s24 }
  0x4e   : > { %1158 = vmatpush.bf16.msra.mxu3 %v3523_v2  ;;  %2633 = vmatmul.msk.bf16.vlgmr.msrb.gmra.mxu0 %vm606_vm0, %v2941_v10  ;;  %4607 = vst [vmem:[#allocation15_spill] sm:$0xff] %v3619_v7  ;;  %v3006_v24 = vld [vmem:[%s4512_s7 + $0xb4] sm:$0xf0]  ;;  %v3004_v26 = vld [vmem:[%s4512_s7 + $0xac] sm:$0xf]  ;;  %v3655_v29 = vor.u32 %v3003_v15, %v2858_v20 }
  0x4f   : > { %1120 = vmatpush.bf16.msra.mxu0 %v3527_v11  ;;  %2635 = vmatmul.msk.bf16.vlgmr.msrb.gmra.mxu1 %vm606_vm0, %v2941_v10  ;;  %4608 = vst [vmem:[#allocation16_spill] sm:$0xff] %v3621_v8  ;;  %v2866_v27 = vld [vmem:[%s4512_s7 + $0xb8] sm:$0xf0]  ;;  %v3657_v30 = vor.u32 %v3006_v24, %v2864_v22  ;;  %v2840_v38 = vld [vmem:[%s4512_s7 + $0x80] sm:$0xf] }
  0x50   : > { %1133 = vmatpush.bf16.msra.mxu1 %v3531_v16  ;;  %2637 = vmatmul.msk.bf16.vlgmr.msrb.gmra.mxu2 %vm606_vm0, %v2941_v10  ;;  %4609 = vst [vmem:[#allocation17_spill] sm:$0xff] %v3633_v19  ;;  %v3661_v36 = vor.u32 %v3004_v26, %v2866_v27  ;;  %v3001_v41 = vld [vmem:[%s4512_s7 + $0x8c] sm:$0xf0]  ;;  %v2999_v42 = vld [vmem:[%s4512_s7 + $0x84] sm:$0xf] }
  0x51   : > { %1146 = vmatpush.bf16.msra.mxu2 %v3533_v18  ;;  %2639 = vmatmul.msk.bf16.vlgmr.msrb.gmra.mxu3 %vm606_vm0, %v2941_v10  ;;  %v2856_v10 = vld [vmem:[%s4512_s7 + $0xa0] sm:$0xf]  ;;  %4611 = vst [vmem:[#allocation19_spill] sm:$0xff] %v3655_v29  ;;  %v2842_v52 = vld [vmem:[%s4512_s7 + $0x90] sm:$0xf0]  ;;  %v3691_v0 = vor.u32 %v3001_v41, %v2840_v38 }
  0x52   : > { %1159 = vmatpush.bf16.msra.mxu3 %v3536_v23  ;;  %v3651_v28 = vor.u32 %v3005_v12, %v2856_v10  ;;  %4612 = vst [vmem:[#allocation20_spill] sm:$0xff] %v3657_v30  ;;  %v2848_v53 = vld [vmem:[%s4512_s7 + $0x88] sm:$0xf]  ;;  %v3002_v54 = vld [vmem:[%s4512_s7 + $0x94] sm:$0xf0]  ;;  %v3693_v3 = vor.u32 %v2999_v42, %v2842_v52  ;;  %v3737_v52 = vld [vmem:[%s4619_s8] sm:$0xff] }
  0x53   : > { %1121 = vmatpush.bf16.msra.mxu0 %v3548_v34  ;;  %4613 = vst [vmem:[#allocation21_spill] sm:$0xff] %v3661_v36  ;;  %v3000_v62 = vld [vmem:[%s4512_s7 + $0x8c] sm:$0xf]  ;;  %v2850_v63 = vld [vmem:[%s4512_s7 + $0x98] sm:$0xf0]  ;;  %v3695_v4 = vor.u32 %v3002_v54, %v2848_v53  ;;  %v1233_v53 = vstv %s3308_s22 }
  0x54   : > { %1134 = vmatpush.bf16.msra.mxu1 %v3561_v39  ;;  %4610 = vst [vmem:[#allocation18_spill] sm:$0xff] %v3651_v28  ;;  %v2824_v10 = vld [vmem:[%s4512_s7 + $0x60] sm:$0xf]  ;;  %v2997_v12 = vld [vmem:[%s4512_s7 + $0x6c] sm:$0xf0]  ;;  %v3707_v20 = vor.u32 %v3000_v62, %v2850_v63  ;;  %vm1234_vm1 = vcmp.lt.s32.totalorder %v1233_v53, %v3737_v52 }
  0x55   : > { %1147 = vmatpush.bf16.msra.mxu2 %v3563_v40  ;;  %4614 = vst [vmem:[#allocation22_spill] sm:$0xff] %v3691_v0  ;;  %v2995_v15 = vld [vmem:[%s4512_s7 + $0x64] sm:$0xf]  ;;  %v2826_v22 = vld [vmem:[%s4512_s7 + $0x70] sm:$0xf0]  ;;  %v3729_v41 = vor.u32 %v2997_v12, %v2824_v10 }
  0x56   : > { %1160 = vmatpush.bf16.msra.mxu3 %v3573_v46  ;;  %4615 = vst [vmem:[#allocation23_spill] sm:$0xff] %v3693_v3  ;;  %v2832_v24 = vld [vmem:[%s4512_s7 + $0x68] sm:$0xf]  ;;  %v2998_v26 = vld [vmem:[%s4512_s7 + $0x74] sm:$0xf0]  ;;  %v3742_v54 = vor.u32 %v2995_v15, %v2826_v22 }
  0x57   : > { %1413 = vmatpush.bf16.msrb.mxu0 %v3575_v47  ;;  %4616 = vst [vmem:[#allocation24_spill] sm:$0xff] %v3695_v4  ;;  %v2996_v27 = vld [vmem:[%s4512_s7 + $0x6c] sm:$0xf]  ;;  %v2834_v38 = vld [vmem:[%s4512_s7 + $0x78] sm:$0xf0] }
  0x58   : > { %1426 = vmatpush.bf16.msrb.mxu1 %v3579_v48  ;;  %4617 = vst [vmem:[#allocation25_spill] sm:$0xff] %v3707_v20  ;;  %v2808_v42 = vld [vmem:[%s4512_s7 + $0x40] sm:$0xf]  ;;  %v2993_v62 = vld [vmem:[%s4512_s7 + $0x4c] sm:$0xf0]  ;;  %v3757_v12 = vor.u32 %v2996_v27, %v2834_v38 }
  0x59   : > { %1439 = vmatpush.bf16.msrb.mxu2 %v3581_v50  ;;  %4618 = vst [vmem:[#allocation26_spill] sm:$0xff] %v3729_v41  ;;  %v2991_v63 = vld [vmem:[%s4512_s7 + $0x44] sm:$0xf]  ;;  %v2810_v10 = vld [vmem:[%s4512_s7 + $0x50] sm:$0xf0]  ;;  %v3775_v38 = vor.u32 %v2993_v62, %v2808_v42 }
  0x5a   : > { %1452 = vmatpush.bf16.msrb.mxu3 %v3594_v55  ;;  %4620 = vst [vmem:[#allocation27_spill] sm:$0xff] %v3742_v54  ;;  %v2816_v15 = vld [vmem:[%s4512_s7 + $0x48] sm:$0xf]  ;;  %v2994_v22 = vld [vmem:[%s4512_s7 + $0x54] sm:$0xf0] }
  0x5b   : > { %1414 = vmatpush.bf16.msrb.mxu0 %v3615_v6  ;;  %4622 = vst [vmem:[#allocation29_spill] sm:$0xff] %v3757_v12  ;;  %v2992_v53 = vld [vmem:[%s4512_s7 + $0x4c] sm:$0xf]  ;;  %v2818_v27 = vld [vmem:[%s4512_s7 + $0x58] sm:$0xf0] }
  0x5c   : > { %1427 = vmatpush.bf16.msrb.mxu1 %v3619_v7  ;;  %4623 = vst [vmem:[#allocation30_spill] sm:$0xff] %v3775_v38  ;;  %v2989_v42 = vld [vmem:[%s4512_s7 + $0x2c] sm:$0xf0]  ;;  %v2987_v62 = vld [vmem:[%s4512_s7 + $0x24] sm:$0xf] }
  0x5d   : > { %1440 = vmatpush.bf16.msrb.mxu2 %v3621_v8 }
  0x5e   : > { %1453 = vmatpush.bf16.msrb.mxu3 %v3633_v19  ;;  %2634 = vmatmul.msk.bf16.gmra.mxu0 %vm606_vm0, %v2942_v35 }
  0x5f   : > { %1415 = vmatpush.bf16.msrb.mxu0 %v3651_v28  ;;  %2636 = vmatmul.msk.bf16.gmra.mxu1 %vm606_vm0, %v2942_v35 }
  0x60   : > { %1428 = vmatpush.bf16.msrb.mxu1 %v3655_v29  ;;  %2638 = vmatmul.msk.bf16.gmra.mxu2 %vm606_vm0, %v2942_v35 }
  0x61   : > { %1441 = vmatpush.bf16.msrb.mxu2 %v3657_v30  ;;  %2640 = vmatmul.msk.bf16.gmra.mxu3 %vm606_vm0, %v2942_v35  ;;  %v3744_v35 = vor.u32 %v2998_v26, %v2832_v24  ;;  %v4528_v24 = vmov 0  }
  0x62   : > { %1454 = vmatpush.bf16.msrb.mxu3 %v3661_v36  ;;  %3038 = vset.pattern.permute.xlu0 %v4528_v24  ;;  %v1235_v26 = vsel %vm1234_vm1, 1, %v4528_v24 }
  0x63   : > { %1416 = vmatpush.bf16.msrb.mxu0 %v3691_v0  ;;  %4621 = vst [vmem:[#allocation28_spill] sm:$0xff] %v3744_v35  ;;  %1237 = vperm.xlu0 %3038, %v1235_v26   ;;  %v2792_v26 = vld [vmem:[%s4512_s7 + $0x20] sm:$0xf] }
  0x64   : > { %1429 = vmatpush.bf16.msrb.mxu1 %v3693_v3  ;;  %3039 = vset.pattern.permute.xlu1 %v4528_v24  ;;  %v3782_v3 = vor.u32 %v2994_v22, %v2816_v15  ;;  %v2800_v15 = vld [vmem:[%s4512_s7 + $0x28] sm:$0xf]  ;;  %v2990_v22 = vld [vmem:[%s4512_s7 + $0x34] sm:$0xf0]  ;;  %v2776_v0 = vld [vmem:[%s4512_s7] sm:$0xf] }
  0x65   : > { %1442 = vmatpush.bf16.msrb.mxu2 %v3695_v4  ;;  %v1532_v4 = vstv %s1251_s4  ;;  %3040 = vset.pattern.permute.xlu2 %v4528_v24  ;;  %v3819_v24 = vor.u32 %v2989_v42, %v2792_v26  ;;  %v2983_v26 = vld [vmem:[%s4512_s7 + $0x4] sm:$0xf]  ;;  %s1551_s4 = sadd.s32 1, %s3308_s22 }
  0x66   : > { %1455 = vmatpush.bf16.msrb.mxu3 %v3707_v20  ;;  %v3780_v20 = vor.u32 %v2991_v63, %v2810_v10  ;;  %4625 = vst [vmem:[#allocation32_spill] sm:$0xff] %v3782_v3  ;;  %vm1533_vm2 = vcmp.lt.s32.totalorder %v1532_v4, %v3737_v52  ;;  %v3795_v63 = vor.u32 %v2992_v53, %v2818_v27  ;;  %v2794_v10 = vld [vmem:[%s4512_s7 + $0x30] sm:$0xf0]  ;;  %v3809_v4 = vld [vmem:[%s4516_s11] sm:$0xff]  ;;  %v2988_v53 = vld [vmem:[%s4512_s7 + $0x2c] sm:$0xf] }
  0x67   : > { %1417 = vmatpush.bf16.msrb.mxu0 %v3729_v41  ;;  %4627 = vst [vmem:[#allocation34_spill] sm:$0xff] %v3809_v4  ;;  %v2802_v27 = vld [vmem:[%s4512_s7 + $0x38] sm:$0xf0]  ;;  %v3826_v41 = vor.u32 %v2990_v22, %v2800_v15  ;;  %v953_v42 = vpack.c.bf16 %v3809_v4, %v3809_v4  ;;  %v2784_v15 = vld [vmem:[%s4512_s7 + $0x8] sm:$0xf] }
  0x68   : > { %1430 = vmatpush.bf16.msrb.mxu1 %v3742_v54  ;;  %4624 = vst [vmem:[#allocation31_spill] sm:$0xff] %v3780_v20  ;;  %v3824_v54 = vor.u32 %v2987_v62, %v2794_v10  ;;  %v3840_v62 = vor.u32 %v2988_v53, %v2802_v27  ;;  %v2778_v10 = vld [vmem:[%s4512_s7 + $0x10] sm:$0xf0]  ;;  %v2986_v22 = vld [vmem:[%s4512_s7 + $0x14] sm:$0xf0] }
  0x69   : > { %1443 = vmatpush.bf16.msrb.mxu2 %v3744_v35  ;;  %4626 = vst [vmem:[#allocation33_spill] sm:$0xff] %v3795_v63  ;;  %v2984_v4 = vld [vmem:[%s4512_s7 + $0xc] sm:$0xf]  ;;  %v2786_v53 = vld [vmem:[%s4512_s7 + $0x18] sm:$0xf0] }
  0x6a   : > { %1456 = vmatpush.bf16.msrb.mxu3 %v3757_v12  ;;  %4628 = vst [vmem:[#allocation35_spill] sm:$0xff] %v3819_v24  ;;  %v4629_v12 = vmov 0   ;;  %v3868_v36 = vor.u32 %v2984_v4, %v2786_v53  ;;  %v4638_v4 = vld [vmem:[#allocation22_spill] sm:$0xff]  ;;  %v4644_v53 = vld [vmem:[#allocation28_spill] sm:$0xff] }
  0x6b   : > { %1418 = vmatpush.bf16.msrb.mxu0 %v3775_v38  ;;  %v1534_v35 = vsel %vm1533_vm2, 1, %v4629_v12  ;;  %4630 = vst [vmem:[#allocation36_spill] sm:$0xff] %v3824_v54  ;;  %v2985_v38 = vld [vmem:[%s4512_s7 + $0xc] sm:$0xf0] }
  0x6c   : > { %1431 = vmatpush.bf16.msrb.mxu1 %v3780_v20  ;;  %4631 = vst [vmem:[#allocation37_spill] sm:$0xff] %v3826_v41  ;;  %1536 = vperm.xlu0 %3038, %v1534_v35   ;;  %v3858_v27 = vor.u32 %v2985_v38, %v2776_v0  ;;  %v3864_v20 = vor.u32 %v2986_v22, %v2784_v15  ;;  %v4637_v38 = vld [vmem:[#allocation21_spill] sm:$0xff]  ;;  %v4642_v15 = vld [vmem:[#allocation26_spill] sm:$0xff]  ;;  %v4643_v22 = vld [vmem:[#allocation27_spill] sm:$0xff] }
  0x6d   : > { %1444 = vmatpush.bf16.msrb.mxu2 %v3782_v3  ;;  %4632 = vst [vmem:[#allocation38_spill] sm:$0xff] %v3840_v62  ;;  %v2229_v3 = vstv %s2108_s19 }
  0x6e   : > { %1457 = vmatpush.bf16.msrb.mxu3 %v3795_v63  ;;  %4633 = vst [vmem:[#allocation39_spill] sm:$0xff] %v3858_v27  ;;  %v3862_v63 = vor.u32 %v2983_v26, %v2778_v10  ;;  %vm2230_vm3 = vcmp.lt.s32.totalorder %v2229_v3, %v3737_v52  ;;  %1122 = vmatmul.bf16.vlgmr.msra.gmra.mxu0 %v953_v42  ;;  %v3883_v3 = vld [vmem:[%s4518_s13] sm:$0xff]  ;;  %v4639_v26 = vld [vmem:[#allocation23_spill] sm:$0xff]  ;;  %v4641_v10 = vld [vmem:[#allocation25_spill] sm:$0xff] }
  0x6f   : > { %1419 = vmatpush.bf16.msrb.mxu0 %v3819_v24  ;;  %4635 = vst [vmem:[#allocation41_spill] sm:$0xff] %v3864_v20  ;;  %1135 = vmatmul.bf16.vlgmr.msra.gmra.mxu1 %v953_v42  ;;  %v2231_v0 = vsel %vm2230_vm3, 1, %v4629_v12  ;;  %v1252_v35 = vpack.c.bf16 %v3883_v3, %v3883_v3 }
  0x70   : > { %1432 = vmatpush.bf16.msrb.mxu1 %v3824_v54  ;;  %4634 = vst [vmem:[#allocation40_spill] sm:$0xff] %v3862_v63  ;;  %1148 = vmatmul.bf16.vlgmr.msra.gmra.mxu2 %v953_v42 }
  0x71   : > { %1445 = vmatpush.bf16.msrb.mxu2 %v3826_v41  ;;  %4636 = vst [vmem:[#allocation42_spill] sm:$0xff] %v3868_v36  ;;  %1161 = vmatmul.bf16.vlgmr.msra.gmra.mxu3 %v953_v42  ;;  %v4640_v42 = vld [vmem:[#allocation24_spill] sm:$0xff] }
  0x72   : > { %1458 = vmatpush.bf16.msrb.mxu3 %v3840_v62 }
  0x73   : > { %1420 = vmatpush.bf16.msrb.mxu0 %v3858_v27 }
  0x74   : > { %1433 = vmatpush.bf16.msrb.mxu1 %v3862_v63  ;;  %2233 = vperm.xlu0 %3038, %v2231_v0   ;;  %v4645_v0 = vld [vmem:[#allocation29_spill] sm:$0xff] }
  0x75   : > { %1446 = vmatpush.bf16.msrb.mxu2 %v3864_v20 }
  0x76   : > { %1459 = vmatpush.bf16.msrb.mxu3 %v3868_v36 }
  0x77   : > { %1553 = vmatpush.bf16.msra.mxu0 %v3452_v51 }
  0x78   : > { %1566 = vmatpush.bf16.msra.mxu1 %v3454_v56 }
  0x79   : > { %1579 = vmatpush.bf16.msra.mxu2 %v3457_v60 }
  0x7a   : > { %1592 = vmatpush.bf16.msra.mxu3 %v3459_v61 }
  0x7b   : > { %1554 = vmatpush.bf16.msra.mxu0 %v3462_v1 }
  0x7c   : > { %1567 = vmatpush.bf16.msra.mxu1 %v3464_v5 }
  0x7d   : > { %1580 = vmatpush.bf16.msra.mxu2 %v3467_v9 }
  0x7e   : > { %1593 = vmatpush.bf16.msra.mxu3 %v3471_v13  ;;  %1421 = vmatmul.bf16.vlgmr.msrb.gmra.mxu0 %v1252_v35 }
  0x7f   : > { %1555 = vmatpush.bf16.msra.mxu0 %v3473_v14  ;;  %1434 = vmatmul.bf16.vlgmr.msrb.gmra.mxu1 %v1252_v35 }
  0x80   : > { %1568 = vmatpush.bf16.msra.mxu1 %v3476_v17  ;;  %1447 = vmatmul.bf16.vlgmr.msrb.gmra.mxu2 %v1252_v35 }
  0x81   : > { %1581 = vmatpush.bf16.msra.mxu2 %v3480_v21  ;;  %1460 = vmatmul.bf16.vlgmr.msrb.gmra.mxu3 %v1252_v35  ;;  %v4646_v35 = vld [vmem:[#allocation30_spill] sm:$0xff] }
  0x82   : > { %1594 = vmatpush.bf16.msra.mxu3 %v3484_v25 }
  0x83   : > { %1556 = vmatpush.bf16.msra.mxu0 %v3487_v31 }
  0x84   : > { %1569 = vmatpush.bf16.msra.mxu1 %v3490_v32 }
  0x85   : > { %1582 = vmatpush.bf16.msra.mxu2 %v3492_v33 }
  0x86   : > { %1595 = vmatpush.bf16.msra.mxu3 %v3496_v37 }
  0x87   : > { %1557 = vmatpush.bf16.msra.mxu0 %v3502_v43 }
  0x88   : > { %1570 = vmatpush.bf16.msra.mxu1 %v3506_v44 }
  0x89   : > { %1583 = vmatpush.bf16.msra.mxu2 %v3508_v45 }
  0x8a   : > { %1596 = vmatpush.bf16.msra.mxu3 %v3511_v49 }
  0x8b   : > { %1558 = vmatpush.bf16.msra.mxu0 %v3514_v57 }
  0x8c   : > { %1571 = vmatpush.bf16.msra.mxu1 %v3518_v58 }
  0x8d   : > { %1584 = vmatpush.bf16.msra.mxu2 %v3520_v59 }
  0x8e   : > { %1597 = vmatpush.bf16.msra.mxu3 %v3523_v2 }
  0x8f   : > { %1559 = vmatpush.bf16.msra.mxu0 %v3527_v11 }
  0x90   : > { %1572 = vmatpush.bf16.msra.mxu1 %v3531_v16 }
  0x91   : > { %1585 = vmatpush.bf16.msra.mxu2 %v3533_v18 }
  0x92   : > { %1598 = vmatpush.bf16.msra.mxu3 %v3536_v23 }
  0x93   : > { %1560 = vmatpush.bf16.msra.mxu0 %v3548_v34 }
  0x94   : > { %1573 = vmatpush.bf16.msra.mxu1 %v3561_v39 }
  0x95   : > { %1586 = vmatpush.bf16.msra.mxu2 %v3563_v40 }
  0x96   : > { %1599 = vmatpush.bf16.msra.mxu3 %v3573_v46 }
  0x97   : > { %1693 = vmatpush.bf16.msrb.mxu0 %v3575_v47 }
  0x98   : > { %1706 = vmatpush.bf16.msrb.mxu1 %v3579_v48 }
  0x99   : > { %1719 = vmatpush.bf16.msrb.mxu2 %v3581_v50 }
  0x9a   : > { %1732 = vmatpush.bf16.msrb.mxu3 %v3594_v55 }
  0x9b   : > { %1694 = vmatpush.bf16.msrb.mxu0 %v3615_v6 }
  0x9c   : > { %1707 = vmatpush.bf16.msrb.mxu1 %v3619_v7 }
  0x9d   : > { %1720 = vmatpush.bf16.msrb.mxu2 %v3621_v8 }
  0x9e   : > { %1733 = vmatpush.bf16.msrb.mxu3 %v3633_v19 }
  0x9f   : > { %1695 = vmatpush.bf16.msrb.mxu0 %v3651_v28 }
  0xa0   : > { %1708 = vmatpush.bf16.msrb.mxu1 %v3655_v29 }
  0xa1   : > { %1721 = vmatpush.bf16.msrb.mxu2 %v3657_v30  ;;  %v4647_v30 = vld [vmem:[#allocation31_spill] sm:$0xff] }
  0xa2   : > { %1734 = vmatpush.bf16.msrb.mxu3 %v4637_v38  ;;  %v4648_v38 = vld [vmem:[#allocation32_spill] sm:$0xff] }
  0xa3   : > { %1696 = vmatpush.bf16.msrb.mxu0 %v4638_v4  ;;  %v4649_v4 = vld [vmem:[#allocation33_spill] sm:$0xff] }
  0xa4   : > { %1709 = vmatpush.bf16.msrb.mxu1 %v4639_v26 }
  0xa5   : > { %1722 = vmatpush.bf16.msrb.mxu2 %v4640_v42 }
  0xa6   : > { %1735 = vmatpush.bf16.msrb.mxu3 %v4641_v10 }
  0xa7   : > { %1697 = vmatpush.bf16.msrb.mxu0 %v4642_v15 }
  0xa8   : > { %1710 = vmatpush.bf16.msrb.mxu1 %v4643_v22 }
  0xa9   : > { %1723 = vmatpush.bf16.msrb.mxu2 %v4644_v53 }
  0xaa   : > { %1736 = vmatpush.bf16.msrb.mxu3 %v4645_v0 }
  0xab   : > { %1698 = vmatpush.bf16.msrb.mxu0 %v4646_v35  ;;  %v3939_v42 = vpop.f32.mrf.mxu0 }
  0xac   : > { %1711 = vmatpush.bf16.msrb.mxu1 %v4647_v30  ;;  %v3943_v22 = vpop.f32.mrf.mxu1 }
  0xad   : > { %1724 = vmatpush.bf16.msrb.mxu2 %v4648_v38  ;;  %v546_v38 = vld [vmem:[%s4650_s15] sm:$0xf] }
  0xae   : > { %1737 = vmatpush.bf16.msrb.mxu3 %v4649_v4  ;;  %v3961_v0 = vperm.slane %v546_v38, 2  ;;  %v3963_v53 = vperm.slane %v546_v38, 3 }
  0xaf   : > { %1699 = vmatpush.bf16.msrb.mxu0 %v3819_v24  ;;  %v548_v24 = vperm.slane %v546_v38, 0 }
  0xb0   : > { %1712 = vmatpush.bf16.msrb.mxu1 %v3824_v54 }
  0xb1   : > { %1725 = vmatpush.bf16.msrb.mxu2 %v3826_v41  ;;  %v549_v41 = vperm.slane %v546_v38, 1 }
  0xb2   : > { %1738 = vmatpush.bf16.msrb.mxu3 %v3840_v62 }
  0xb3   : > { %1700 = vmatpush.bf16.msrb.mxu0 %v3858_v27  ;;  %v3953_v54 = vpop.f32.mrf.mxu2  ;;  %v624_v30 = vpop.f32.mrf.mxu0 }
  0xb4   : > { %1713 = vmatpush.bf16.msrb.mxu1 %v3862_v63  ;;  %v3955_v4 = vpop.f32.mrf.mxu3  ;;  %v3957_v62 = vadd.f32 %v624_v30, %v548_v24  ;;  %v643_v27 = vpop.f32.mrf.mxu1 }
  0xb5   : > { %1726 = vmatpush.bf16.msrb.mxu2 %v3864_v20  ;;  %v3959_v35 = vadd.f32 %v643_v27, %v549_v41 }
  0xb6   : > { %1739 = vmatpush.bf16.msrb.mxu3 %v3868_v36  ;;  %4651 = vst [vmem:[#allocation43_spill] sm:$0xff] %v3957_v62 }
  0xb7   : > { %4652 = vst [vmem:[#allocation44_spill] sm:$0xff] %v3959_v35 }
  0xbb   : > { %v662_v63 = vpop.f32.mrf.mxu2  ;;  %v627_v15 = vpop.f32.mrf.mxu0 }
  0xbc   : > { %v3966_v20 = vadd.f32 %v662_v63, %v3961_v0  ;;  %v681_v36 = vpop.f32.mrf.mxu3  ;;  %v3971_v26 = vadd.f32 %v627_v15, %v548_v24  ;;  %v646_v30 = vpop.f32.mrf.mxu1 }
  0xbd   : > { %v3969_v10 = vadd.f32 %v681_v36, %v3963_v53  ;;  %v3973_v62 = vadd.f32 %v646_v30, %v549_v41  ;;  %v717_v36 = vld [vmem:[%s4661_s26] sm:$0xf] }
  0xbe   : > { %4653 = vst [vmem:[#allocation45_spill] sm:$0xff] %v3966_v20  ;;  %v719_v15 = vperm.slane %v717_v36, 0  ;;  %v720_v30 = vperm.slane %v717_v36, 1 }
  0xbf   : > { %4654 = vst [vmem:[#allocation46_spill] sm:$0xff] %v3969_v10 }
  0xc0   : > { %4655 = vst [vmem:[#allocation47_spill] sm:$0xff] %v3971_v26 }
  0xc1   : > { %4656 = vst [vmem:[#allocation48_spill] sm:$0xff] %v3973_v62 }
  0xc3   : > { %v665_v27 = vpop.f32.mrf.mxu2  ;;  %v629_v29 = vpop.f32.mrf.mxu0 }
  0xc4   : > { %v3976_v35 = vadd.f32 %v665_v27, %v3961_v0  ;;  %v684_v38 = vpop.f32.mrf.mxu3  ;;  %v3981_v63 = vadd.f32 %v629_v29, %v548_v24  ;;  %v648_v20 = vpop.f32.mrf.mxu1 }
  0xc5   : > { %v3979_v28 = vadd.f32 %v684_v38, %v3963_v53  ;;  %v3983_v19 = vadd.f32 %v648_v20, %v549_v41 }
  0xc6   : > { %4657 = vst [vmem:[#allocation49_spill] sm:$0xff] %v3976_v35 }
  0xc7   : > { %4658 = vst [vmem:[#allocation50_spill] sm:$0xff] %v3979_v28  ;;  %v4000_v28 = vperm.slane %v717_v36, 3 }
  0xc8   : > { %4659 = vst [vmem:[#allocation51_spill] sm:$0xff] %v3981_v63 }
  0xc9   : > { %4660 = vst [vmem:[#allocation52_spill] sm:$0xff] %v3983_v19  ;;  %v3998_v19 = vperm.slane %v717_v36, 2 }
  0xcb   : > { %v667_v62 = vpop.f32.mrf.mxu2  ;;  %v792_v26 = vpop.f32.mrf.mxu0 }
  0xcc   : > { %v3989_v27 = vadd.f32 %v667_v62, %v3961_v0  ;;  %v686_v35 = vpop.f32.mrf.mxu3  ;;  %v3994_v29 = vadd.f32 %v792_v26, %v719_v15  ;;  %v811_v63 = vpop.f32.mrf.mxu1 }
  0xcd   : > { %v3992_v38 = vadd.f32 %v686_v35, %v3963_v53  ;;  %v3996_v20 = vadd.f32 %v811_v63, %v720_v30 }
  0xce   : > { %4662 = vst [vmem:[#allocation53_spill] sm:$0xff] %v3989_v27 }
  0xcf   : > { %4663 = vst [vmem:[#allocation54_spill] sm:$0xff] %v3992_v38 }
  0xd0   : > { %4664 = vst [vmem:[#allocation55_spill] sm:$0xff] %v3994_v29 }
  0xd1   : > { %4665 = vst [vmem:[#allocation56_spill] sm:$0xff] %v3996_v20 }
  0xd3   : > { %v830_v10 = vpop.f32.mrf.mxu2  ;;  %v794_v27 = vpop.f32.mrf.mxu0 }
  0xd4   : > { %v4003_v8 = vadd.f32 %v830_v10, %v3998_v19  ;;  %v849_v62 = vpop.f32.mrf.mxu3  ;;  %v4008_v35 = vadd.f32 %v794_v27, %v719_v15  ;;  %v813_v26 = vpop.f32.mrf.mxu1 }
  0xd5   : > { %v4006_v7 = vadd.f32 %v849_v62, %v4000_v28  ;;  %v4010_v29 = vadd.f32 %v813_v26, %v720_v30 }
  0xd6   : > { %4666 = vst [vmem:[#allocation57_spill] sm:$0xff] %v4003_v8 }
  0xd7   : > { %4667 = vst [vmem:[#allocation58_spill] sm:$0xff] %v4006_v7 }
  0xd8   : > { %4668 = vst [vmem:[#allocation59_spill] sm:$0xff] %v4008_v35 }
  0xd9   : > { %4669 = vst [vmem:[#allocation60_spill] sm:$0xff] %v4010_v29 }
  0xdb   : > { %v832_v63 = vpop.f32.mrf.mxu2  ;;  %v797_v38 = vpop.f32.mrf.mxu0 }
  0xdc   : > { %v4013_v20 = vadd.f32 %v832_v63, %v3998_v19  ;;  %v851_v36 = vpop.f32.mrf.mxu3  ;;  %v4018_v10 = vadd.f32 %v797_v38, %v719_v15  ;;  %v816_v8 = vpop.f32.mrf.mxu1  ;;  %v642_v38 = vadd.f32 %v3943_v22, %v549_v41 }
  0xdd   : > { %v4016_v6 = vadd.f32 %v851_v36, %v4000_v28  ;;  %v4020_v55 = vadd.f32 %v816_v8, %v720_v30 }
  0xde   : > { %4670 = vst [vmem:[#allocation61_spill] sm:$0xff] %v4013_v20  ;;  %v623_v20 = vadd.f32 %v3939_v42, %v548_v24 }
  0xdf   : > { %4671 = vst [vmem:[#allocation62_spill] sm:$0xff] %v4016_v6 }
  0xe0   : > { %4672 = vst [vmem:[#allocation63_spill] sm:$0xff] %v4018_v10 }
  0xe1   : > { %4673 = vst [vmem:[#allocation64_spill] sm:$0xff] %v4020_v55 }
  0xe3   : > { %v835_v62 = vpop.f32.mrf.mxu2  ;;  %v799_v7 = vpop.f32.mrf.mxu0 }
  0xe4   : > { %v4023_v27 = vadd.f32 %v835_v62, %v3998_v19  ;;  %v854_v26 = vpop.f32.mrf.mxu3  ;;  %v818_v63 = vpop.f32.mrf.mxu1 }
  0xe5   : > { %v4026_v29 = vadd.f32 %v854_v26, %v4000_v28  ;;  %v680_v26 = vadd.f32 %v3955_v4, %v3963_v53 }
  0xe6   : > { %4674 = vst [vmem:[#allocation65_spill] sm:$0xff] %v4023_v27 }
  0xe7   : > { %4675 = vst [vmem:[#allocation66_spill] sm:$0xff] %v4026_v29 }
  0xeb   : > { %v4029_v35 = vpop.f32.mrf.mxu2  ;;  %v1123_v6 = vpop.f32.mrf.mxu0 }
  0xec   : > { %v856_v36 = vpop.f32.mrf.mxu3  ;;  %v1166_v8 = vadd.f32 %v1123_v6, %v623_v20  ;;  %v1136_v55 = vpop.f32.mrf.mxu1  ;;  %v819_v6 = vadd.f32 %v818_v63, %v720_v30 }
  0xed   : > { %v1167_v10 = vadd.f32 %v1136_v55, %v642_v38  ;;  %v800_v55 = vadd.f32 %v799_v7, %v719_v15  ;;  %v857_v63 = vadd.f32 %v856_v36, %v4000_v28 }
  0xee   : > { %v2771_v46 = vmul.f32 -1.442695, %v1166_v8 }
  0xef   : > { %v2772_v62 = vmul.f32 -1.442695, %v1167_v10 }
  0xf0   : > { %3041 = vpow2.f32 %v2771_v46 }
  0xf1   : > { %3043 = vpow2.f32 %v2772_v62 }
  0xf3   : > { %v1149_v27 = vpop.f32.mrf.mxu2  ;;  %v1125_v50 = vpop.f32.mrf.mxu0 }
  0xf4   : > { %v1162_v29 = vpop.f32.mrf.mxu3  ;;  %v1138_v42 = vpop.f32.mrf.mxu1  ;;  %v661_v50 = vadd.f32 %v3953_v54, %v3961_v0 }
  0xf5   : > { %v1169_v24 = vadd.f32 %v1162_v29, %v680_v26 }
  0xf6   : > { %v3042_v48 = vpop.eup %3041  ;;  %v1168_v62 = vadd.f32 %v1149_v27, %v661_v50 }
  0xf7   : > { %v2773_v47 = vmul.f32 -1.442695, %v1169_v24  ;;  %v3044_v41 = vpop.eup %3043  ;;  %v1173_v22 = vadd.f32 1.0, %v3042_v48 }
  0xf8   : > { %v4034_v40 = vadd.f32 1.0, %v3044_v41 }
  0xf9   : > { %3045 = vpow2.f32 %v2773_v47  ;;  %v1185_v42 = vand.u32 2147483648, %v1173_v22  ;;  %vm1179_vm5 = vweird.f32 %v1173_v22 }
  0xfa   : > { %3047 = vrcp.f32 %v1173_v22  ;;  %v1202_v28 = vand.u32 2147483647, %v4034_v40  ;;  %v1204_v36 = vand.u32 2147483648, %v4034_v40  ;;  %vm1198_vm9 = vweird.f32 %v4034_v40 }
  0xfb   : > { %3049 = vrcp.f32 %v4034_v40  ;;  %v1151_v46 = vpop.f32.mrf.mxu2  ;;  %v1422_v4 = vpop.f32.mrf.mxu0 }
  0xfc   : > { %v1164_v20 = vpop.f32.mrf.mxu3  ;;  %v1465_v53 = vadd.f32 %v1422_v4, %v800_v55  ;;  %v1435_v10 = vpop.f32.mrf.mxu1  ;;  %v1183_v46 = vand.u32 2147483647, %v1173_v22  ;;  %vm1203_vm11 = vcmp.eq.f32.partialorder %v1202_v28, 8.507059e+37  ;;  %v1672_v28 = vstv %s1551_s4 }
  0xfd   : > { %v1466_v29 = vadd.f32 %v1435_v10, %v819_v6  ;;  %vm1673_vm14 = vcmp.lt.s32.totalorder %v1672_v28, %v3737_v52 }
  0xfe   : > { %v2902_v8 = vmul.f32 -1.442695, %v1465_v53  ;;  %vm1184_vm8 = vcmp.eq.f32.partialorder %v1183_v46, 8.507059e+37 }
  0xff   : > { %v3046_v38 = vpop.eup %3045  ;;  %v2903_v47 = vmul.f32 -1.442695, %v1466_v29 }
 0x100   : > { %v3048_v48 = vpop.eup %3047  ;;  %v4039_v26 = vadd.f32 1.0, %v3046_v38  ;;  %3051 = vpow2.f32 %v2902_v8  ;;  %v1186_v38 = vor.u32 1.1754944e-38, %v1185_v42 }
 0x101   : > { %v3050_v7 = vpop.eup %3049  ;;  %v1175_v15 = vmul.f32 %v3048_v48, %v1173_v22  ;;  %vm1180_vm4 = vweird.f32 %v3048_v48 }
 0x102   : > { %v1194_v30 = vmul.f32 %v3050_v7, %v4034_v40  ;;  %3053 = vrcp.f32 %v4039_v26  ;;  %vm1181_vm6 = vmor %vm1179_vm5, %vm1180_vm4  ;;  %vm1199_vm7 = vweird.f32 %v3050_v7  ;;  %vm1218_vm13 = vweird.f32 %v4039_v26 }
 0x103   : > { %v1176_v24 = vsub.f32 1.0, %v1175_v15  ;;  %3055 = vpow2.f32 %v2903_v47  ;;  %v1448_v54 = vpop.f32.mrf.mxu2  ;;  %v1424_v27 = vpop.f32.mrf.mxu0  ;;  %vm1200_vm10 = vmor %vm1198_vm9, %vm1199_vm7 }
 0x104   : > { %v1195_v0 = vsub.f32 1.0, %v1194_v30  ;;  %3057 = vtanh.f32 %v1168_v62  ;;  %v1461_v41 = vpop.f32.mrf.mxu3  ;;  %v1437_v20 = vpop.f32.mrf.mxu1  ;;  %v1205_v27 = vor.u32 1.1754944e-38, %v1204_v36  ;;  %v1224_v36 = vand.u32 2147483648, %v4039_v26 }
 0x105   : > { %v1177_v55 = vmul.f32 %v3048_v48, %v1176_v24  ;;  %v1468_v6 = vadd.f32 %v1461_v41, %v857_v63 }
 0x106   : > { %v1196_v4 = vmul.f32 %v3050_v7, %v1195_v0  ;;  %v3052_v53 = vpop.eup %3051  ;;  %v838_v0 = vadd.f32 %v4029_v35, %v3998_v19 }
 0x107   : > { %v1178_v10 = vadd.f32 %v3048_v48, %v1177_v55  ;;  %v2904_v50 = vmul.f32 -1.442695, %v1468_v6  ;;  %v4048_v8 = vadd.f32 1.0, %v3052_v53 }
 0x108   : > { %v4046_v29 = vpop.eup %3053  ;;  %v1197_v62 = vadd.f32 %v3050_v7, %v1196_v4  ;;  %v1467_v20 = vadd.f32 %v1448_v54, %v838_v0  ;;  %v4065_v4 = vpop.permute.xlu0 %1237 }
 0x109   : > { %v3056_v47 = vpop.eup %3055  ;;  %v1182_v15 = vsel %vm1181_vm6, %v3048_v48, %v1178_v10  ;;  %v1214_v22 = vmul.f32 %v4046_v29, %v4039_v26  ;;  %3059 = vpow2.f32 %v2904_v50  ;;  %v943_v48 = vld [vmem:[%s4517_s12] sm:$0xff]  ;;  %vm1239_vm12 = vcmp.eq.s32.totalorder %v4065_v4, 1 }
 0x10a   : > { %v3058_v30 = vpop.eup %3057  ;;  %v1187_v63 = vsel %vm1184_vm8, %v1186_v38, %v1182_v15  ;;  %3061 = vrcp.f32 %v4048_v8  ;;  %v4053_v24 = vadd.f32 1.0, %v3056_v47  ;;  %v1201_v46 = vsel %vm1200_vm10, %v3050_v7, %v1197_v62 }
 0x10b   : > { %v1229_v42 = vmul.f32 %v3058_v30, %v1187_v63  ;;  %v1215_v41 = vsub.f32 1.0, %v1214_v22  ;;  %v1450_v55 = vpop.f32.mrf.mxu2  ;;  %v1206_v40 = vsel %vm1203_vm11, %v1205_v27, %v1201_v46  ;;  %vm1219_vm15 = vweird.f32 %v4046_v29 }
 0x10c   : > { %3063 = vrcp.f32 %v4053_v24  ;;  %v1463_v6 = vpop.f32.mrf.mxu3  ;;  %v1228_v35 = vmul.f32 %v1206_v40, %v943_v48  ;;  %v1222_v30 = vand.u32 2147483647, %v4039_v26  ;;  %v1482_v63 = vand.u32 2147483647, %v4048_v8  ;;  %vm4089_vm1 = vmor %vm1218_vm13, %vm1219_vm15 }
 0x10d   : > { %v1216_v19 = vmul.f32 %v4046_v29, %v1215_v41  ;;  %3065 = vtanh.f32 %v1467_v20  ;;  %v1484_v0 = vand.u32 2147483648, %v4048_v8  ;;  %v1812_v41 = vstv %s1691_s17 }
 0x10e   : > { %v1230_v7 = vadd.f32 %v1229_v42, %v1228_v35  ;;  %v1674_v42 = vsel %vm1673_vm14, 1, %v4629_v12  ;;  %v1225_v46 = vor.u32 1.1754944e-38, %v1224_v36  ;;  %vm1478_vm2 = vweird.f32 %v4048_v8 }
 0x10f   : > { %v3060_v53 = vpop.eup %3059  ;;  %v1217_v62 = vadd.f32 %v4046_v29, %v1216_v19  ;;  %1676 = vperm.xlu1 %3039, %v1674_v42   ;;  %v1501_v20 = vand.u32 2147483647, %v4053_v24  ;;  %v1503_v40 = vand.u32 2147483648, %v4053_v24  ;;  %vm1813_vm4 = vcmp.lt.s32.totalorder %v1812_v41, %v3737_v52  ;;  %v4678_v42 = vld [vmem:[#allocation34_spill] sm:$0xff] }
 0x110   : > { %v3062_v10 = vpop.eup %3061  ;;  %v4068_v50 = vadd.f32 1.0, %v3060_v53  ;;  %v4080_v47 = vsel %vm1239_vm12, %v1230_v7, %v943_v48  ;;  %vm1483_vm6 = vcmp.eq.f32.partialorder %v1482_v63, 8.507059e+37  ;;  %vm1223_vm7 = vcmp.eq.f32.partialorder %v1222_v30, 8.507059e+37 }
 0x111   : > { %v1474_v54 = vmul.f32 %v3062_v10, %v4048_v8  ;;  %vm1479_vm0 = vweird.f32 %v3062_v10  ;;  %v1221_v6 = vsel %vm4089_vm1, %v4046_v29, %v1217_v62  ;;  %vm1497_vm8 = vweird.f32 %v4053_v24 }
 0x112   : > { %v3064_v38 = vpop.eup %3063  ;;  %3067 = vrcp.f32 %v4068_v50  ;;  %vm1480_vm5 = vmor %vm1478_vm2, %vm1479_vm0  ;;  %v1504_v63 = vor.u32 1.1754944e-38, %v1503_v40  ;;  %vm1502_vm10 = vcmp.eq.f32.partialorder %v1501_v20, 8.507059e+37  ;;  %v1523_v4 = vand.u32 2147483648, %v4068_v50 }
 0x113   : > { %v1475_v15 = vsub.f32 1.0, %v1474_v54  ;;  %v1493_v22 = vmul.f32 %v3064_v38, %v4053_v24  ;;  %3069 = vtanh.f32 %v1230_v7  ;;  %v3066_v19 = vpop.eup %3065  ;;  %vm1498_vm3 = vweird.f32 %v3064_v38 }
 0x114   : > { %v1485_v7 = vor.u32 1.1754944e-38, %v1484_v0  ;;  %v1226_v54 = vsel %vm1223_vm7, %v1225_v46, %v1221_v6  ;;  %vm1499_vm9 = vmor %vm1497_vm8, %vm1498_vm3  ;;  %v1814_v24 = vsel %vm1813_vm4, 1, %v4629_v12  ;;  %v2367_v46 = vstv %s3312_s24 }
 0x115   : > { %v1494_v27 = vsub.f32 1.0, %v1493_v22  ;;  %v1476_v55 = vmul.f32 %v3062_v10, %v1475_v15  ;;  %v945_v22 = vld [vmem:[%s4519_s14] sm:$0xff]  ;;  %vm2368_vm11 = vcmp.lt.s32.totalorder %v2367_v46, %v3737_v52 }
 0x116   : > { %v2369_v52 = vsel %vm2368_vm11, 1, %v4629_v12  ;;  %v4691_v46 = vld [vmem:[#allocation20_spill] sm:$0xff] }
 0x117   : > { %v1477_v35 = vadd.f32 %v3062_v10, %v1476_v55  ;;  %v1495_v53 = vmul.f32 %v3064_v38, %v1494_v27  ;;  %1816 = vperm.xlu1 %3039, %v1814_v24   ;;  %v4684_v24 = vld [vmem:[#allocation13_spill] sm:$0xff] }
 0x118   : > { %v3068_v26 = vpop.eup %3067 }
 0x119   : > { %v3070_v8 = vpop.eup %3069  ;;  %v1481_v28 = vsel %vm1480_vm5, %v3062_v10, %v1477_v35  ;;  %v1513_v29 = vmul.f32 %v3068_v26, %v4068_v50  ;;  %v1496_v36 = vadd.f32 %v3064_v38, %v1495_v53  ;;  %vm1518_vm13 = vweird.f32 %v3068_v26 }
 0x11a   : > { %v1486_v62 = vsel %vm1483_vm6, %v1485_v7, %v1481_v28  ;;  %v1232_v15 = vmul.f32 %v3070_v8, %v1226_v54  ;;  %v1521_v53 = vand.u32 2147483647, %v4068_v50  ;;  %v1524_v8 = vor.u32 1.1754944e-38, %v1523_v4  ;;  %v4698_v4 = vld [vmem:[#allocation27_spill] sm:$0xff] }
 0x11b   : > { %v1528_v10 = vmul.f32 %v3066_v19, %v1486_v62  ;;  %v1514_v30 = vsub.f32 1.0, %v1513_v29  ;;  %v1500_v0 = vsel %vm1499_vm9, %v3064_v38, %v1496_v36  ;;  %v1537_v38 = vpop.permute.xlu0 %1536  ;;  %v4680_v62 = vld [vmem:[#allocation10_spill] sm:$0xff] }
 0x11c   : > { %v4112_v27 = vsel %vm1239_vm12, %v1232_v15, %v4678_v42  ;;  %v1242_v55 = vsel %vm1239_vm12, %v1232_v15, 0.0  ;;  %v1505_v48 = vsel %vm1502_vm10, %v1504_v63, %v1500_v0  ;;  %vm1538_vm14 = vcmp.eq.s32.totalorder %v1537_v38, 1  ;;  %v4681_v15 = vld [vmem:[#allocation11_spill] sm:$0xff]  ;;  %v4683_v63 = vld [vmem:[#allocation9_spill] sm:$0xff]  ;;  %v4687_v0 = vld [vmem:[#allocation16_spill] sm:$0xff] }
 0x11d   : > { %1243 = vst [vmem:[%s3330_s29] sm:$0xff] %v1242_v55  ;;  %v1552_v6 = vpack.c.bf16 %v4112_v27, %v4112_v27  ;;  %v1515_v41 = vmul.f32 %v3068_v26, %v1514_v30  ;;  %v1527_v40 = vmul.f32 %v1505_v48, %v945_v22  ;;  %vm1517_vm12 = vweird.f32 %v4068_v50  ;;  %v4686_v30 = vld [vmem:[#allocation15_spill] sm:$0xff]  ;;  %v4688_v42 = vld [vmem:[#allocation17_spill] sm:$0xff]  ;;  %v4689_v55 = vld [vmem:[#allocation18_spill] sm:$0xff] }
 0x11e   : > { %vm1519_vm15 = vmor %vm1517_vm12, %vm1518_vm13  ;;  %vm1522_vm0 = vcmp.eq.f32.partialorder %v1521_v53, 8.507059e+37  ;;  %v4690_v48 = vld [vmem:[#allocation19_spill] sm:$0xff]  ;;  %v4696_v38 = vld [vmem:[#allocation25_spill] sm:$0xff] }
 0x11f   : > { %v1529_v19 = vadd.f32 %v1528_v10, %v1527_v40  ;;  %1561 = vmatmul.bf16.vlgmr.msra.gmra.mxu0 %v1552_v6  ;;  %1574 = vmatmul.bf16.vlgmr.msra.gmra.mxu1 %v1552_v6  ;;  %v1516_v20 = vadd.f32 %v3068_v26, %v1515_v41  ;;  %v4685_v10 = vld [vmem:[#allocation14_spill] sm:$0xff]  ;;  %v4694_v40 = vld [vmem:[#allocation23_spill] sm:$0xff]  ;;  %v4699_v53 = vld [vmem:[#allocation28_spill] sm:$0xff] }
 0x120   : > { %1587 = vmatmul.bf16.vlgmr.msra.gmra.mxu2 %v1552_v6  ;;  %1600 = vmatmul.bf16.vlgmr.msra.gmra.mxu3 %v1552_v6  ;;  %v4692_v6 = vld [vmem:[#allocation21_spill] sm:$0xff]  ;;  %v4693_v41 = vld [vmem:[#allocation22_spill] sm:$0xff] }
 0x121   : > { %3071 = vtanh.f32 %v1529_v19  ;;  %v4123_v35 = vsel %vm1538_vm14, %v1529_v19, %v945_v22  ;;  %1832 = vmatpush.bf16.msra.mxu0 %v3452_v51  ;;  %1845 = vmatpush.bf16.msra.mxu1 %v3454_v56  ;;  %v1520_v7 = vsel %vm1519_vm15, %v3068_v26, %v1516_v20  ;;  %v4682_v22 = vld [vmem:[#allocation12_spill] sm:$0xff]  ;;  %v4697_v20 = vld [vmem:[#allocation26_spill] sm:$0xff] }
 0x122   : > { %1858 = vmatpush.bf16.msra.mxu2 %v3457_v60  ;;  %1871 = vmatpush.bf16.msra.mxu3 %v3459_v61  ;;  %v1525_v50 = vsel %vm1522_vm0, %v1524_v8, %v1520_v7  ;;  %v4695_v19 = vld [vmem:[#allocation24_spill] sm:$0xff]  ;;  %v4701_v7 = vld [vmem:[#allocation30_spill] sm:$0xff]  ;;  %v4702_v8 = vld [vmem:[#allocation31_spill] sm:$0xff] }
 0x123   : > { %2371 = vperm.xlu1 %3039, %v2369_v52   ;;  %v4700_v52 = vld [vmem:[#allocation29_spill] sm:$0xff] }
 0x125   : > { %1833 = vmatpush.bf16.msra.mxu0 %v3462_v1  ;;  %1846 = vmatpush.bf16.msra.mxu1 %v3464_v5 }
 0x126   : > { %1859 = vmatpush.bf16.msra.mxu2 %v3467_v9  ;;  %1872 = vmatpush.bf16.msra.mxu3 %v3471_v13 }
 0x127   : > { %v3072_v28 = vpop.eup %3071 }
 0x128   : > { %v1531_v29 = vmul.f32 %v3072_v28, %v1525_v50  ;;  %v4703_v28 = vld [vmem:[#allocation32_spill] sm:$0xff]  ;;  %v4704_v50 = vld [vmem:[#allocation33_spill] sm:$0xff] }
 0x129   : > { %1834 = vmatpush.bf16.msra.mxu0 %v3473_v14  ;;  %1847 = vmatpush.bf16.msra.mxu1 %v3476_v17 }
 0x12a   : > { %v4139_v26 = vsel %vm1538_vm14, %v1531_v29, %v3883_v3  ;;  %v1541_v54 = vsel %vm1538_vm14, %v1531_v29, 0.0  ;;  %1860 = vmatpush.bf16.msra.mxu2 %v3480_v21  ;;  %1873 = vmatpush.bf16.msra.mxu3 %v3484_v25  ;;  %v4679_v3 = vld [vmem:[#allocation8_spill] sm:$0xff]  ;;  %v4705_v29 = vld [vmem:[#allocation35_spill] sm:$0xff] }
 0x12b   : > { %2905 = vst [vmem:[%s3335_s25 + $0x18] sm:$0xff] %v1541_v54  ;;  %v1692_v36 = vpack.c.bf16 %v4139_v26, %v4139_v26  ;;  %v4706_v54 = vld [vmem:[#allocation36_spill] sm:$0xff] }
 0x12d   : > { %1835 = vmatpush.bf16.msra.mxu0 %v3487_v31  ;;  %1848 = vmatpush.bf16.msra.mxu1 %v3490_v32 }
 0x12e   : > { %1861 = vmatpush.bf16.msra.mxu2 %v3492_v33  ;;  %1874 = vmatpush.bf16.msra.mxu3 %v3496_v37 }
 0x12f   : > { %1701 = vmatmul.bf16.vlgmr.msrb.gmra.mxu0 %v1692_v36  ;;  %1714 = vmatmul.bf16.vlgmr.msrb.gmra.mxu1 %v1692_v36 }
 0x130   : > { %1727 = vmatmul.bf16.vlgmr.msrb.gmra.mxu2 %v1692_v36  ;;  %1740 = vmatmul.bf16.vlgmr.msrb.gmra.mxu3 %v1692_v36  ;;  %v4707_v36 = vld [vmem:[#allocation37_spill] sm:$0xff] }
 0x131   : > { %1836 = vmatpush.bf16.msra.mxu0 %v3502_v43  ;;  %1849 = vmatpush.bf16.msra.mxu1 %v3506_v44 }
 0x132   : > { %1862 = vmatpush.bf16.msra.mxu2 %v3508_v45  ;;  %1875 = vmatpush.bf16.msra.mxu3 %v3511_v49 }
 0x135   : > { %1837 = vmatpush.bf16.msra.mxu0 %v3514_v57  ;;  %1850 = vmatpush.bf16.msra.mxu1 %v3518_v58 }
 0x136   : > { %1863 = vmatpush.bf16.msra.mxu2 %v3520_v59  ;;  %1876 = vmatpush.bf16.msra.mxu3 %v3523_v2 }
 0x139   : > { %1838 = vmatpush.bf16.msra.mxu0 %v3527_v11  ;;  %1851 = vmatpush.bf16.msra.mxu1 %v3531_v16 }
 0x13a   : > { %1864 = vmatpush.bf16.msra.mxu2 %v3533_v18  ;;  %1877 = vmatpush.bf16.msra.mxu3 %v3536_v23 }
 0x13d   : > { %1839 = vmatpush.bf16.msra.mxu0 %v3548_v34  ;;  %1852 = vmatpush.bf16.msra.mxu1 %v3561_v39 }
 0x13e   : > { %1865 = vmatpush.bf16.msra.mxu2 %v4679_v3  ;;  %1878 = vmatpush.bf16.msra.mxu3 %v4683_v63 }
 0x141   : > { %1971 = vmatpush.bf16.msrb.mxu0 %v4680_v62  ;;  %1984 = vmatpush.bf16.msrb.mxu1 %v4681_v15 }
 0x142   : > { %1997 = vmatpush.bf16.msrb.mxu2 %v4682_v22  ;;  %2010 = vmatpush.bf16.msrb.mxu3 %v4684_v24 }
 0x145   : > { %1972 = vmatpush.bf16.msrb.mxu0 %v4685_v10  ;;  %1985 = vmatpush.bf16.msrb.mxu1 %v4686_v30 }
 0x146   : > { %1998 = vmatpush.bf16.msrb.mxu2 %v4687_v0  ;;  %2011 = vmatpush.bf16.msrb.mxu3 %v4688_v42 }
 0x149   : > { %1973 = vmatpush.bf16.msrb.mxu0 %v4689_v55  ;;  %1986 = vmatpush.bf16.msrb.mxu1 %v4690_v48 }
 0x14a   : > { %1999 = vmatpush.bf16.msrb.mxu2 %v4691_v46  ;;  %2012 = vmatpush.bf16.msrb.mxu3 %v4692_v6 }
 0x14d   : > { %1974 = vmatpush.bf16.msrb.mxu0 %v4693_v41  ;;  %1987 = vmatpush.bf16.msrb.mxu1 %v4694_v40  ;;  %v4715_v41 = vld [vmem:[#allocation46_spill] sm:$0xff] }
 0x14e   : > { %2000 = vmatpush.bf16.msrb.mxu2 %v4695_v19  ;;  %2013 = vmatpush.bf16.msrb.mxu3 %v4696_v38  ;;  %v4713_v38 = vld [vmem:[#allocation43_spill] sm:$0xff]  ;;  %v4714_v19 = vld [vmem:[#allocation44_spill] sm:$0xff] }
 0x151   : > { %1975 = vmatpush.bf16.msrb.mxu0 %v4697_v20  ;;  %1988 = vmatpush.bf16.msrb.mxu1 %v4698_v4  ;;  %v4708_v20 = vld [vmem:[#allocation38_spill] sm:$0xff]  ;;  %v4709_v4 = vld [vmem:[#allocation39_spill] sm:$0xff] }
 0x152   : > { %2001 = vmatpush.bf16.msrb.mxu2 %v4699_v53  ;;  %2014 = vmatpush.bf16.msrb.mxu3 %v4700_v52  ;;  %v4710_v53 = vld [vmem:[#allocation40_spill] sm:$0xff]  ;;  %v4711_v52 = vld [vmem:[#allocation41_spill] sm:$0xff] }
 0x155   : > { %1976 = vmatpush.bf16.msrb.mxu0 %v4701_v7  ;;  %1989 = vmatpush.bf16.msrb.mxu1 %v4702_v8  ;;  %v4712_v7 = vld [vmem:[#allocation42_spill] sm:$0xff] }
 0x156   : > { %2002 = vmatpush.bf16.msrb.mxu2 %v4703_v28  ;;  %2015 = vmatpush.bf16.msrb.mxu3 %v4704_v50 }
 0x159   : > { %1977 = vmatpush.bf16.msrb.mxu0 %v4705_v29  ;;  %1990 = vmatpush.bf16.msrb.mxu1 %v4706_v54 }
 0x15a   : > { %2003 = vmatpush.bf16.msrb.mxu2 %v4707_v36  ;;  %2016 = vmatpush.bf16.msrb.mxu3 %v4708_v20 }
 0x15d   : > { %1978 = vmatpush.bf16.msrb.mxu0 %v4709_v4  ;;  %1991 = vmatpush.bf16.msrb.mxu1 %v4710_v53 }
 0x15e   : > { %2004 = vmatpush.bf16.msrb.mxu2 %v4711_v52  ;;  %2017 = vmatpush.bf16.msrb.mxu3 %v4712_v7 }
 0x19c   : > { %v1562_v8 = vpop.f32.mrf.mxu0  ;;  %v1575_v28 = vpop.f32.mrf.mxu1 }
 0x19d   : > { %v1605_v50 = vadd.f32 %v1562_v8, %v4713_v38  ;;  %v1606_v29 = vadd.f32 %v1575_v28, %v4714_v19 }
 0x19f   : > { %v2906_v40 = vmul.f32 -1.442695, %v1605_v50  ;;  %v2907_v54 = vmul.f32 -1.442695, %v1606_v29  ;;  %v4717_v29 = vld [vmem:[#allocation64_spill] sm:$0xff] }
 0x1a1   : > { %3073 = vpow2.f32 %v2906_v40  ;;  %v4716_v40 = vld [vmem:[#allocation63_spill] sm:$0xff] }
 0x1a2   : > { %3075 = vpow2.f32 %v2907_v54 }
 0x1a3   : > { %v1588_v36 = vpop.f32.mrf.mxu2  ;;  %v1601_v20 = vpop.f32.mrf.mxu3 }
 0x1a4   : > { %v1608_v4 = vadd.f32 %v1601_v20, %v4715_v41  ;;  %v1564_v6 = vpop.f32.mrf.mxu0  ;;  %v1577_v53 = vpop.f32.mrf.mxu1 }
 0x1a5   : > { %v4718_v53 = vld [vmem:[#allocation45_spill] sm:$0xff] }
 0x1a6   : > { %v2908_v46 = vmul.f32 -1.442695, %v1608_v4 }
 0x1a7   : > { %v3074_v52 = vpop.eup %3073 }
 0x1a8   : > { %v3076_v48 = vpop.eup %3075  ;;  %v1612_v7 = vadd.f32 1.0, %v3074_v52  ;;  %3077 = vpow2.f32 %v2908_v46  ;;  %v1607_v52 = vadd.f32 %v1588_v36, %v4718_v53 }
 0x1a9   : > { %v1631_v55 = vadd.f32 1.0, %v3076_v48 }
 0x1aa   : > { %3079 = vrcp.f32 %v1612_v7  ;;  %v1622_v36 = vand.u32 2147483647, %v1612_v7  ;;  %vm1618_vm3 = vweird.f32 %v1612_v7 }
 0x1ab   : > { %3081 = vrcp.f32 %v1631_v55  ;;  %v1590_v38 = vpop.f32.mrf.mxu2  ;;  %v1603_v19 = vpop.f32.mrf.mxu3  ;;  %v1643_v53 = vand.u32 2147483648, %v1631_v55  ;;  %vm1637_vm4 = vweird.f32 %v1631_v55 }
 0x1ac   : > { %v1702_v8 = vpop.f32.mrf.mxu0  ;;  %v1715_v28 = vpop.f32.mrf.mxu1  ;;  %vm1623_vm6 = vcmp.eq.f32.partialorder %v1622_v36, 8.507059e+37 }
 0x1ad   : > { %v1745_v50 = vadd.f32 %v1702_v8, %v4716_v40  ;;  %v1746_v54 = vadd.f32 %v1715_v28, %v4717_v29  ;;  %v1624_v28 = vand.u32 2147483648, %v1612_v7  ;;  %v4222_v36 = vpop.permute.xlu1 %1676 }
 0x1ae   : > { %v3078_v42 = vpop.eup %3077  ;;  %vm1678_vm9 = vcmp.eq.s32.totalorder %v4222_v36, 1 }
 0x1af   : > { %v4205_v41 = vadd.f32 1.0, %v3078_v42  ;;  %v2910_v6 = vmul.f32 -1.442695, %v1745_v50  ;;  %v2911_v20 = vmul.f32 -1.442695, %v1746_v54  ;;  %v4719_v42 = vld [vmem:[#allocation66_spill] sm:$0xff] }
 0x1b0   : > { %v3080_v4 = vpop.eup %3079 }
 0x1b1   : > { %v3082_v46 = vpop.eup %3081  ;;  %v1614_v48 = vmul.f32 %v3080_v4, %v1612_v7  ;;  %3083 = vrcp.f32 %v4205_v41  ;;  %vm1619_vm1 = vweird.f32 %v3080_v4  ;;  %vm1657_vm13 = vweird.f32 %v4205_v41 }
 0x1b2   : > { %v1633_v38 = vmul.f32 %v3082_v46, %v1631_v55  ;;  %3085 = vpow2.f32 %v2910_v6  ;;  %vm1638_vm2 = vweird.f32 %v3082_v46  ;;  %vm1620_vm5 = vmor %vm1618_vm3, %vm1619_vm1 }
 0x1b3   : > { %v1615_v19 = vsub.f32 1.0, %v1614_v48  ;;  %3087 = vpow2.f32 %v2911_v20  ;;  %v1728_v0 = vpop.f32.mrf.mxu2  ;;  %v1741_v8 = vpop.f32.mrf.mxu3  ;;  %v1641_v20 = vand.u32 2147483647, %v1631_v55  ;;  %vm1639_vm7 = vmor %vm1637_vm4, %vm1638_vm2 }
 0x1b4   : > { %v1634_v40 = vsub.f32 1.0, %v1633_v38  ;;  %3089 = vtanh.f32 %v1607_v52  ;;  %v1748_v29 = vadd.f32 %v1741_v8, %v4719_v42  ;;  %v1704_v50 = vpop.f32.mrf.mxu0  ;;  %v1717_v54 = vpop.f32.mrf.mxu1  ;;  %v1625_v52 = vor.u32 1.1754944e-38, %v1624_v28 }
 0x1b5   : > { %v1616_v30 = vmul.f32 %v3080_v4, %v1615_v19  ;;  %vm1642_vm8 = vcmp.eq.f32.partialorder %v1641_v20, 8.507059e+37  ;;  %v1661_v20 = vand.u32 2147483647, %v4205_v41 }
 0x1b6   : > { %v1635_v10 = vmul.f32 %v3082_v46, %v1634_v40  ;;  %v2912_v24 = vmul.f32 -1.442695, %v1748_v29 }
 0x1b7   : > { %v4210_v22 = vpop.eup %3083  ;;  %v1617_v6 = vadd.f32 %v3080_v4, %v1616_v30  ;;  %v1644_v30 = vor.u32 1.1754944e-38, %v1643_v53  ;;  %vm4248_vm14 = vcmp.eq.f32.partialorder %v1661_v20, 8.507059e+37 }
 0x1b8   : > { %v3086_v48 = vpop.eup %3085  ;;  %v1653_v38 = vmul.f32 %v4210_v22, %v4205_v41  ;;  %3091 = vpow2.f32 %v2912_v24  ;;  %v1636_v19 = vadd.f32 %v3082_v46, %v1635_v10  ;;  %vm1658_vm11 = vweird.f32 %v4210_v22 }
 0x1b9   : > { %v3088_v8 = vpop.eup %3087  ;;  %v1621_v42 = vsel %vm1620_vm5, %v3080_v4, %v1617_v6  ;;  %v4214_v40 = vadd.f32 1.0, %v3086_v48  ;;  %vm4253_vm12 = vmor %vm1657_vm13, %vm1658_vm11 }
 0x1ba   : > { %v3090_v7 = vpop.eup %3089  ;;  %v1626_v29 = vsel %vm1623_vm6, %v1625_v52, %v1621_v42  ;;  %v1654_v55 = vsub.f32 1.0, %v1653_v38  ;;  %v4217_v50 = vadd.f32 1.0, %v3088_v8  ;;  %v1640_v28 = vsel %vm1639_vm7, %v3082_v46, %v1636_v19  ;;  %v4720_v19 = vld [vmem:[#allocation65_spill] sm:$0xff] }
 0x1bb   : > { %v1668_v54 = vmul.f32 %v3090_v7, %v1626_v29  ;;  %3093 = vrcp.f32 %v4214_v40  ;;  %v1730_v24 = vpop.f32.mrf.mxu2  ;;  %v1743_v10 = vpop.f32.mrf.mxu3  ;;  %v1645_v4 = vsel %vm1642_vm8, %v1644_v30, %v1640_v28  ;;  %v1951_v38 = vstv %s1830_s23  ;;  %v3169_v30 = vld [vmem:[%s4619_s8] sm:$0xff] }
 0x1bc   : > { %3095 = vrcp.f32 %v4217_v50  ;;  %v1655_v53 = vmul.f32 %v4210_v22, %v1654_v55  ;;  %v1667_v6 = vmul.f32 %v1645_v4, %v4080_v47  ;;  %v1747_v8 = vadd.f32 %v1728_v0, %v4720_v19 }
 0x1bd   : > { %v1663_v42 = vand.u32 2147483648, %v4205_v41  ;;  %vm1952_vm10 = vcmp.lt.s32.totalorder %v1951_v38, %v3169_v30  ;;  %v1762_v24 = vand.u32 2147483647, %v4214_v40  ;;  %v2090_v41 = vstv %s1969_s27 }
 0x1be   : > { %v3092_v48 = vpop.eup %3091  ;;  %v1669_v52 = vadd.f32 %v1668_v54, %v1667_v6  ;;  %v1656_v29 = vadd.f32 %v4210_v22, %v1655_v53  ;;  %v1953_v4 = vsel %vm1952_vm10, 1, %v4629_v12  ;;  %v1781_v38 = vand.u32 2147483647, %v4217_v50 }
 0x1bf   : > { %v4227_v46 = vadd.f32 1.0, %v3092_v48  ;;  %v1664_v6 = vor.u32 1.1754944e-38, %v1663_v42  ;;  %1955 = vperm.xlu2 %3040, %v1953_v4   ;;  %vm1758_vm15 = vweird.f32 %v4214_v40  ;;  %vm4264_vm1 = vcmp.eq.f32.partialorder %v1762_v24, 8.507059e+37  ;;  %v4758_v42 = vld [vmem:[#allocation41_spill] sm:$0xff] }
 0x1c0   : > { %v4241_v55 = vsel %vm1678_vm9, %v1669_v52, %v4080_v47  ;;  %v1660_v20 = vsel %vm4253_vm12, %v4210_v22, %v1656_v29  ;;  %vm2091_vm3 = vcmp.lt.s32.totalorder %v2090_v41, %v3169_v30  ;;  %vm1777_vm4 = vweird.f32 %v4217_v50  ;;  %v1817_v41 = vpop.permute.xlu1 %1816 }
 0x1c1   : > { %v3094_v7 = vpop.eup %3093  ;;  %3097 = vrcp.f32 %v4227_v46  ;;  %4721 = vst [vmem:[#allocation34_spill] sm:$0xff] %v4241_v55  ;;  %v1665_v29 = vsel %vm4248_vm14, %v1664_v6, %v1660_v20  ;;  %vm1782_vm6 = vcmp.eq.f32.partialorder %v1781_v38, 8.507059e+37  ;;  %v1803_v36 = vand.u32 2147483648, %v4227_v46 }
 0x1c2   : > { %v3096_v0 = vpop.eup %3095  ;;  %v1754_v28 = vmul.f32 %v3094_v7, %v4214_v40  ;;  %3099 = vtanh.f32 %v1669_v52  ;;  %v1764_v52 = vand.u32 2147483648, %v4214_v40  ;;  %vm1759_vm0 = vweird.f32 %v3094_v7 }
 0x1c3   : > { %v1773_v54 = vmul.f32 %v3096_v0, %v4217_v50  ;;  %3101 = vtanh.f32 %v1747_v8  ;;  %v1783_v8 = vand.u32 2147483648, %v4217_v50  ;;  %vm1778_vm2 = vweird.f32 %v3096_v0  ;;  %vm1760_vm5 = vmor %vm1758_vm15, %vm1759_vm0 }
 0x1c4   : > { %v1755_v53 = vsub.f32 1.0, %v1754_v28  ;;  %v1765_v40 = vor.u32 1.1754944e-38, %v1764_v52  ;;  %vm1779_vm7 = vmor %vm1777_vm4, %vm1778_vm2  ;;  %vm1797_vm10 = vweird.f32 %v4227_v46 }
 0x1c5   : > { %v1774_v48 = vsub.f32 1.0, %v1773_v54  ;;  %v1784_v62 = vor.u32 1.1754944e-38, %v1783_v8  ;;  %v4756_v8 = vld [vmem:[#allocation39_spill] sm:$0xff] }
 0x1c6   : > { %v1756_v19 = vmul.f32 %v3094_v7, %v1755_v53 }
 0x1c7   : > { %v3098_v28 = vpop.eup %3097  ;;  %v1775_v55 = vmul.f32 %v3096_v0, %v1774_v48 }
 0x1c8   : > { %v3100_v54 = vpop.eup %3099  ;;  %v1757_v4 = vadd.f32 %v3094_v7, %v1756_v19  ;;  %v1793_v22 = vmul.f32 %v3098_v28, %v4227_v46  ;;  %v2092_v19 = vsel %vm2091_vm3, 1, %v4629_v12  ;;  %vm1798_vm8 = vweird.f32 %v3098_v28 }
 0x1c9   : > { %v1671_v53 = vmul.f32 %v3100_v54, %v1665_v29  ;;  %v1776_v47 = vadd.f32 %v3096_v0, %v1775_v55  ;;  %v3102_v24 = vpop.eup %3101  ;;  %2094 = vperm.xlu2 %3040, %v2092_v19   ;;  %vm1799_vm11 = vmor %vm1797_vm10, %vm1798_vm8  ;;  %v4759_v54 = vld [vmem:[#allocation42_spill] sm:$0xff]  ;;  %v4760_v29 = vld [vmem:[#allocation47_spill] sm:$0xff] }
 0x1ca   : > { %v1761_v48 = vsel %vm1760_vm5, %v3094_v7, %v1757_v4  ;;  %v1794_v15 = vsub.f32 1.0, %v1793_v22 }
 0x1cb   : > { %v1766_v10 = vsel %vm4264_vm1, %v1765_v40, %v1761_v48  ;;  %v4280_v50 = vsel %vm1678_vm9, %v1671_v53, %v4112_v27  ;;  %v1681_v55 = vsel %vm1678_vm9, %v1671_v53, 0.0  ;;  %v1780_v6 = vsel %vm1779_vm7, %v3096_v0, %v1776_v47  ;;  %v4761_v53 = vld [vmem:[#allocation48_spill] sm:$0xff] }
 0x1cc   : > { %v1808_v7 = vmul.f32 %v3102_v24, %v1766_v10  ;;  %2909 = vst [vmem:[%s3330_s29 + $0x8] sm:$0xff] %v1681_v55  ;;  %v1831_v52 = vpack.c.bf16 %v4280_v50, %v4280_v50  ;;  %v1785_v20 = vsel %vm1782_vm6, %v1784_v62, %v1780_v6  ;;  %v1795_v30 = vmul.f32 %v3098_v28, %v1794_v15  ;;  %v4762_v55 = vld [vmem:[#allocation50_spill] sm:$0xff] }
 0x1cd   : > { %v1807_v12 = vmul.f32 %v1785_v20, %v4123_v35  ;;  %vm1818_vm9 = vcmp.eq.s32.totalorder %v1817_v41, 1  ;;  %v1801_v15 = vand.u32 2147483647, %v4227_v46  ;;  %v4755_v46 = vld [vmem:[#allocation38_spill] sm:$0xff] }
 0x1ce   : > { %1840 = vmatmul.bf16.vlgmr.msra.gmra.mxu0 %v1831_v52  ;;  %1853 = vmatmul.bf16.vlgmr.msra.gmra.mxu1 %v1831_v52  ;;  %v1796_v27 = vadd.f32 %v3098_v28, %v1795_v30 }
 0x1cf   : > { %v1809_v38 = vadd.f32 %v1808_v7, %v1807_v12  ;;  %1866 = vmatmul.bf16.vlgmr.msra.gmra.mxu2 %v1831_v52  ;;  %1879 = vmatmul.bf16.vlgmr.msra.gmra.mxu3 %v1831_v52  ;;  %vm1802_vm13 = vcmp.eq.f32.partialorder %v1801_v15, 8.507059e+37 }
 0x1d0   : > { %2110 = vmatpush.bf16.msra.mxu0 %v3452_v51  ;;  %2123 = vmatpush.bf16.msra.mxu1 %v3454_v56  ;;  %v1800_v0 = vsel %vm1799_vm11, %v3098_v28, %v1796_v27  ;;  %v1804_v51 = vor.u32 1.1754944e-38, %v1803_v36  ;;  %v4757_v28 = vld [vmem:[#allocation40_spill] sm:$0xff] }
 0x1d1   : > { %3103 = vtanh.f32 %v1809_v38  ;;  %v4293_v62 = vsel %vm1818_vm9, %v1809_v38, %v4123_v35  ;;  %2136 = vmatpush.bf16.msra.mxu2 %v3457_v60  ;;  %2149 = vmatpush.bf16.msra.mxu3 %v3459_v61  ;;  %v4751_v35 = vld [vmem:[#allocation33_spill] sm:$0xff] }
 0x1d2   : > { %v1805_v60 = vsel %vm1802_vm13, %v1804_v51, %v1800_v0  ;;  %v4763_v51 = vld [vmem:[#allocation59_spill] sm:$0xff] }
 0x1d4   : > { %2111 = vmatpush.bf16.msra.mxu0 %v3462_v1  ;;  %2124 = vmatpush.bf16.msra.mxu1 %v3464_v5 }
 0x1d5   : > { %2137 = vmatpush.bf16.msra.mxu2 %v3467_v9  ;;  %2150 = vmatpush.bf16.msra.mxu3 %v3471_v13  ;;  %v4728_v13 = vld [vmem:[#allocation10_spill] sm:$0xff] }
 0x1d7   : > { %v3104_v56 = vpop.eup %3103 }
 0x1d8   : > { %v1811_v61 = vmul.f32 %v3104_v56, %v1805_v60  ;;  %2112 = vmatpush.bf16.msra.mxu0 %v3473_v14  ;;  %2125 = vmatpush.bf16.msra.mxu1 %v3476_v17  ;;  %v4729_v14 = vld [vmem:[#allocation11_spill] sm:$0xff]  ;;  %v4730_v17 = vld [vmem:[#allocation12_spill] sm:$0xff] }
 0x1d9   : > { %2138 = vmatpush.bf16.msra.mxu2 %v3480_v21  ;;  %2151 = vmatpush.bf16.msra.mxu3 %v3484_v25  ;;  %v4731_v21 = vld [vmem:[#allocation13_spill] sm:$0xff]  ;;  %v4732_v25 = vld [vmem:[#allocation14_spill] sm:$0xff]  ;;  %v4764_v60 = vld [vmem:[#allocation60_spill] sm:$0xff] }
 0x1da   : > { %v4309_v1 = vsel %vm1818_vm9, %v1811_v61, %v4139_v26  ;;  %v1821_v5 = vsel %vm1818_vm9, %v1811_v61, 0.0  ;;  %v4752_v26 = vld [vmem:[#allocation35_spill] sm:$0xff] }
 0x1db   : > { %2913 = vst [vmem:[%s3335_s25 + $0x10] sm:$0xff] %v1821_v5  ;;  %v1970_v9 = vpack.c.bf16 %v4309_v1, %v4309_v1 }
 0x1dc   : > { %2113 = vmatpush.bf16.msra.mxu0 %v3487_v31  ;;  %2126 = vmatpush.bf16.msra.mxu1 %v3490_v32  ;;  %v4733_v31 = vld [vmem:[#allocation15_spill] sm:$0xff]  ;;  %v4734_v32 = vld [vmem:[#allocation16_spill] sm:$0xff] }
 0x1dd   : > { %2139 = vmatpush.bf16.msra.mxu2 %v3492_v33  ;;  %2152 = vmatpush.bf16.msra.mxu3 %v3496_v37  ;;  %v4735_v33 = vld [vmem:[#allocation17_spill] sm:$0xff]  ;;  %v4736_v37 = vld [vmem:[#allocation18_spill] sm:$0xff] }
 0x1de   : > { %1979 = vmatmul.bf16.vlgmr.msrb.gmra.mxu0 %v1970_v9  ;;  %1992 = vmatmul.bf16.vlgmr.msrb.gmra.mxu1 %v1970_v9 }
 0x1df   : > { %2005 = vmatmul.bf16.vlgmr.msrb.gmra.mxu2 %v1970_v9  ;;  %2018 = vmatmul.bf16.vlgmr.msrb.gmra.mxu3 %v1970_v9 }
 0x1e0   : > { %2114 = vmatpush.bf16.msra.mxu0 %v3502_v43  ;;  %2127 = vmatpush.bf16.msra.mxu1 %v3506_v44  ;;  %v4737_v43 = vld [vmem:[#allocation19_spill] sm:$0xff]  ;;  %v4738_v44 = vld [vmem:[#allocation20_spill] sm:$0xff] }
 0x1e1   : > { %2140 = vmatpush.bf16.msra.mxu2 %v3508_v45  ;;  %2153 = vmatpush.bf16.msra.mxu3 %v3511_v49  ;;  %v4739_v45 = vld [vmem:[#allocation21_spill] sm:$0xff]  ;;  %v4740_v49 = vld [vmem:[#allocation22_spill] sm:$0xff] }
 0x1e4   : > { %2115 = vmatpush.bf16.msra.mxu0 %v3514_v57  ;;  %2128 = vmatpush.bf16.msra.mxu1 %v3518_v58  ;;  %v4741_v57 = vld [vmem:[#allocation23_spill] sm:$0xff]  ;;  %v4742_v58 = vld [vmem:[#allocation24_spill] sm:$0xff] }
 0x1e5   : > { %2141 = vmatpush.bf16.msra.mxu2 %v3520_v59  ;;  %2154 = vmatpush.bf16.msra.mxu3 %v3523_v2  ;;  %v4743_v59 = vld [vmem:[#allocation25_spill] sm:$0xff]  ;;  %v4744_v2 = vld [vmem:[#allocation26_spill] sm:$0xff] }
 0x1e8   : > { %2116 = vmatpush.bf16.msra.mxu0 %v3527_v11  ;;  %2129 = vmatpush.bf16.msra.mxu1 %v3531_v16  ;;  %v4745_v11 = vld [vmem:[#allocation27_spill] sm:$0xff]  ;;  %v4746_v16 = vld [vmem:[#allocation28_spill] sm:$0xff] }
 0x1e9   : > { %2142 = vmatpush.bf16.msra.mxu2 %v3533_v18  ;;  %2155 = vmatpush.bf16.msra.mxu3 %v3536_v23  ;;  %v4747_v18 = vld [vmem:[#allocation29_spill] sm:$0xff]  ;;  %v4748_v23 = vld [vmem:[#allocation30_spill] sm:$0xff] }
 0x1ec   : > { %2117 = vmatpush.bf16.msra.mxu0 %v3548_v34  ;;  %2130 = vmatpush.bf16.msra.mxu1 %v3561_v39  ;;  %v4749_v34 = vld [vmem:[#allocation31_spill] sm:$0xff]  ;;  %v4750_v39 = vld [vmem:[#allocation32_spill] sm:$0xff] }
 0x1ed   : > { %2143 = vmatpush.bf16.msra.mxu2 %v4679_v3  ;;  %2156 = vmatpush.bf16.msra.mxu3 %v4683_v63  ;;  %v4753_v3 = vld [vmem:[#allocation36_spill] sm:$0xff]  ;;  %v4754_v63 = vld [vmem:[#allocation37_spill] sm:$0xff] }
 0x1f0   : > { %2248 = vmatpush.bf16.msrb.mxu0 %v4728_v13  ;;  %2261 = vmatpush.bf16.msrb.mxu1 %v4729_v14 }
 0x1f1   : > { %2274 = vmatpush.bf16.msrb.mxu2 %v4730_v17  ;;  %2287 = vmatpush.bf16.msrb.mxu3 %v4731_v21  ;;  %v4765_v21 = vld [vmem:[#allocation49_spill] sm:$0xff] }
 0x1f4   : > { %2249 = vmatpush.bf16.msrb.mxu0 %v4732_v25  ;;  %2262 = vmatpush.bf16.msrb.mxu1 %v4733_v31 }
 0x1f5   : > { %2275 = vmatpush.bf16.msrb.mxu2 %v4734_v32  ;;  %2288 = vmatpush.bf16.msrb.mxu3 %v4735_v33 }
 0x1f8   : > { %2250 = vmatpush.bf16.msrb.mxu0 %v4736_v37  ;;  %2263 = vmatpush.bf16.msrb.mxu1 %v4737_v43 }
 0x1f9   : > { %2276 = vmatpush.bf16.msrb.mxu2 %v4738_v44  ;;  %2289 = vmatpush.bf16.msrb.mxu3 %v4739_v45 }
 0x1fc   : > { %2251 = vmatpush.bf16.msrb.mxu0 %v4740_v49  ;;  %2264 = vmatpush.bf16.msrb.mxu1 %v4741_v57  ;;  %v4766_v57 = vld [vmem:[#allocation62_spill] sm:$0xff] }
 0x1fd   : > { %2277 = vmatpush.bf16.msrb.mxu2 %v4742_v58  ;;  %2290 = vmatpush.bf16.msrb.mxu3 %v4743_v59 }
 0x200   : > { %2252 = vmatpush.bf16.msrb.mxu0 %v4744_v2  ;;  %2265 = vmatpush.bf16.msrb.mxu1 %v4745_v11 }
 0x201   : > { %2278 = vmatpush.bf16.msrb.mxu2 %v4746_v16  ;;  %2291 = vmatpush.bf16.msrb.mxu3 %v4747_v18 }
 0x204   : > { %2253 = vmatpush.bf16.msrb.mxu0 %v4748_v23  ;;  %2266 = vmatpush.bf16.msrb.mxu1 %v4749_v34 }
 0x205   : > { %2279 = vmatpush.bf16.msrb.mxu2 %v4750_v39  ;;  %2292 = vmatpush.bf16.msrb.mxu3 %v4751_v35 }
 0x208   : > { %2254 = vmatpush.bf16.msrb.mxu0 %v4752_v26  ;;  %2267 = vmatpush.bf16.msrb.mxu1 %v4753_v3 }
 0x209   : > { %2280 = vmatpush.bf16.msrb.mxu2 %v4754_v63  ;;  %2293 = vmatpush.bf16.msrb.mxu3 %v4755_v46 }
 0x20c   : > { %2255 = vmatpush.bf16.msrb.mxu0 %v4756_v8  ;;  %2268 = vmatpush.bf16.msrb.mxu1 %v4757_v28 }
 0x20d   : > { %2281 = vmatpush.bf16.msrb.mxu2 %v4758_v42  ;;  %2294 = vmatpush.bf16.msrb.mxu3 %v4759_v54 }
 0x24b   : > { %v1841_v4 = vpop.f32.mrf.mxu0  ;;  %v1854_v22 = vpop.f32.mrf.mxu1 }
 0x24c   : > { %v1884_v40 = vadd.f32 %v1841_v4, %v4760_v29  ;;  %v1885_v47 = vadd.f32 %v1854_v22, %v4761_v53 }
 0x24e   : > { %v2914_v24 = vmul.f32 -1.442695, %v1884_v40  ;;  %v2915_v48 = vmul.f32 -1.442695, %v1885_v47  ;;  %v4389_v47 = vpop.permute.xlu2 %1955 }
 0x24f   : > { %vm1957_vm5 = vcmp.eq.s32.totalorder %v4389_v47, 1 }
 0x250   : > { %3105 = vpow2.f32 %v2914_v24 }
 0x251   : > { %3107 = vpow2.f32 %v2915_v48 }
 0x252   : > { %v1867_v19 = vpop.f32.mrf.mxu2  ;;  %v1880_v10 = vpop.f32.mrf.mxu3 }
 0x253   : > { %v1887_v6 = vadd.f32 %v1880_v10, %v4762_v55  ;;  %v1843_v7 = vpop.f32.mrf.mxu0  ;;  %v1856_v52 = vpop.f32.mrf.mxu1  ;;  %v1886_v25 = vadd.f32 %v1867_v19, %v4765_v21 }
 0x254   : > { %v4767_v7 = vld [vmem:[#allocation34_spill] sm:$0xff] }
 0x255   : > { %v2916_v20 = vmul.f32 -1.442695, %v1887_v6 }
 0x256   : > { %v3106_v30 = vpop.eup %3105 }
 0x257   : > { %v3108_v12 = vpop.eup %3107  ;;  %v1891_v41 = vadd.f32 1.0, %v3106_v30  ;;  %3109 = vpow2.f32 %v2916_v20 }
 0x258   : > { %v4370_v38 = vadd.f32 1.0, %v3108_v12 }
 0x259   : > { %3111 = vrcp.f32 %v1891_v41  ;;  %v1903_v49 = vand.u32 2147483648, %v1891_v41  ;;  %v1901_v16 = vand.u32 2147483647, %v1891_v41  ;;  %vm1897_vm15 = vweird.f32 %v1891_v41 }
 0x25a   : > { %3113 = vrcp.f32 %v4370_v38  ;;  %v1869_v27 = vpop.f32.mrf.mxu2  ;;  %v1882_v36 = vpop.f32.mrf.mxu3  ;;  %v1922_v18 = vand.u32 2147483648, %v4370_v38  ;;  %vm1916_vm0 = vweird.f32 %v4370_v38  ;;  %v1920_v26 = vand.u32 2147483647, %v4370_v38 }
 0x25b   : > { %v1980_v15 = vpop.f32.mrf.mxu0  ;;  %v1993_v0 = vpop.f32.mrf.mxu1  ;;  %v1904_v63 = vor.u32 1.1754944e-38, %v1903_v49  ;;  %vm1902_vm2 = vcmp.eq.f32.partialorder %v1901_v16, 8.507059e+37 }
 0x25c   : > { %v2023_v56 = vadd.f32 %v1980_v15, %v4763_v51  ;;  %v2024_v61 = vadd.f32 %v1993_v0, %v4764_v60  ;;  %v1923_v4 = vor.u32 1.1754944e-38, %v1922_v18  ;;  %vm1921_vm4 = vcmp.eq.f32.partialorder %v1920_v26, 8.507059e+37 }
 0x25d   : > { %v3110_v5 = vpop.eup %3109 }
 0x25e   : > { %v4375_v9 = vadd.f32 1.0, %v3110_v5  ;;  %v2918_v13 = vmul.f32 -1.442695, %v2023_v56  ;;  %v2919_v14 = vmul.f32 -1.442695, %v2024_v61 }
 0x25f   : > { %v3112_v17 = vpop.eup %3111 }
 0x260   : > { %v3114_v31 = vpop.eup %3113  ;;  %v1893_v32 = vmul.f32 %v3112_v17, %v1891_v41  ;;  %3115 = vrcp.f32 %v4375_v9  ;;  %vm1898_vm14 = vweird.f32 %v3112_v17  ;;  %v4768_v41 = vld [vmem:[#allocation61_spill] sm:$0xff]  ;;  %v1942_v27 = vand.u32 2147483648, %v4375_v9 }
 0x261   : > { %v1912_v33 = vmul.f32 %v3114_v31, %v4370_v38  ;;  %3117 = vpow2.f32 %v2918_v13  ;;  %vm1917_vm12 = vweird.f32 %v3114_v31  ;;  %vm1899_vm1 = vmor %vm1897_vm15, %vm1898_vm14  ;;  %vm1936_vm7 = vweird.f32 %v4375_v9 }
 0x262   : > { %v1894_v37 = vsub.f32 1.0, %v1893_v32  ;;  %3119 = vpow2.f32 %v2919_v14  ;;  %v2006_v43 = vpop.f32.mrf.mxu2  ;;  %v2019_v44 = vpop.f32.mrf.mxu3  ;;  %vm1918_vm3 = vmor %vm1916_vm0, %vm1917_vm12  ;;  %v1940_v61 = vand.u32 2147483647, %v4375_v9 }
 0x263   : > { %v1913_v45 = vsub.f32 1.0, %v1912_v33  ;;  %3121 = vtanh.f32 %v1886_v25  ;;  %v2026_v58 = vadd.f32 %v2019_v44, %v4766_v57  ;;  %v1982_v59 = vpop.f32.mrf.mxu0  ;;  %v1995_v2 = vpop.f32.mrf.mxu1  ;;  %v2025_v38 = vadd.f32 %v2006_v43, %v4768_v41 }
 0x264   : > { %v1895_v11 = vmul.f32 %v3112_v17, %v1894_v37  ;;  %vm1941_vm11 = vcmp.eq.f32.partialorder %v1940_v61, 8.507059e+37 }
 0x265   : > { %v1914_v23 = vmul.f32 %v3114_v31, %v1913_v45  ;;  %v2920_v34 = vmul.f32 -1.442695, %v2026_v58 }
 0x266   : > { %v4382_v39 = vpop.eup %3115  ;;  %v1896_v35 = vadd.f32 %v3112_v17, %v1895_v11 }
 0x267   : > { %v3118_v3 = vpop.eup %3117  ;;  %v1932_v46 = vmul.f32 %v4382_v39, %v4375_v9  ;;  %3123 = vpow2.f32 %v2920_v34  ;;  %v1915_v8 = vadd.f32 %v3114_v31, %v1914_v23  ;;  %vm1937_vm6 = vweird.f32 %v4382_v39 }
 0x268   : > { %v3120_v28 = vpop.eup %3119  ;;  %v1900_v42 = vsel %vm1899_vm1, %v3112_v17, %v1896_v35  ;;  %v2030_v54 = vadd.f32 1.0, %v3118_v3  ;;  %vm4408_vm8 = vmor %vm1936_vm7, %vm1937_vm6  ;;  %v1943_v17 = vor.u32 1.1754944e-38, %v1942_v27  ;;  %v4773_v27 = vld [vmem:[#allocation54_spill] sm:$0xff] }
 0x269   : > { %v3122_v22 = vpop.eup %3121  ;;  %v1905_v29 = vsel %vm1902_vm2, %v1904_v63, %v1900_v42  ;;  %v1933_v40 = vsub.f32 1.0, %v1932_v46  ;;  %v2049_v53 = vadd.f32 1.0, %v3120_v28  ;;  %v1919_v24 = vsel %vm1918_vm3, %v3114_v31, %v1915_v8  ;;  %v2095_v28 = vpop.permute.xlu2 %2094 }
 0x26a   : > { %v1947_v48 = vmul.f32 %v3122_v22, %v1905_v29  ;;  %3125 = vrcp.f32 %v2030_v54  ;;  %v2008_v19 = vpop.f32.mrf.mxu2  ;;  %v2021_v10 = vpop.f32.mrf.mxu3  ;;  %v1924_v55 = vsel %vm1921_vm4, %v1923_v4, %v1919_v24  ;;  %v2040_v13 = vand.u32 2147483647, %v2030_v54 }
 0x26b   : > { %3127 = vrcp.f32 %v2049_v53  ;;  %v1934_v6 = vmul.f32 %v4382_v39, %v1933_v40  ;;  %v1946_v52 = vmul.f32 %v1924_v55, %v4767_v7  ;;  %v2042_v25 = vand.u32 2147483648, %v2030_v54 }
 0x26c   : > { %v2059_v33 = vand.u32 2147483647, %v2049_v53  ;;  %v2061_v37 = vand.u32 2147483648, %v2049_v53  ;;  %vm2036_vm10 = vweird.f32 %v2030_v54  ;;  %vm2041_vm14 = vcmp.eq.f32.partialorder %v2040_v13, 8.507059e+37 }
 0x26d   : > { %v3124_v20 = vpop.eup %3123  ;;  %v1948_v12 = vadd.f32 %v1947_v48, %v1946_v52  ;;  %v1935_v15 = vadd.f32 %v4382_v39, %v1934_v6  ;;  %v2043_v58 = vor.u32 1.1754944e-38, %v2042_v25  ;;  %vm2055_vm15 = vweird.f32 %v2049_v53 }
 0x26e   : > { %v4394_v30 = vadd.f32 1.0, %v3124_v20  ;;  %vm2060_vm1 = vcmp.eq.f32.partialorder %v2059_v33, 8.507059e+37  ;;  %v2062_v16 = vor.u32 1.1754944e-38, %v2061_v37  ;;  %vm2096_vm3 = vcmp.eq.s32.totalorder %v2095_v28, 1  ;;  %v4772_v20 = vld [vmem:[#allocation52_spill] sm:$0xff] }
 0x26f   : > { %v4404_v0 = vsel %vm1957_vm5, %v1948_v12, %v4767_v7  ;;  %v1939_v31 = vsel %vm4408_vm8, %v4382_v39, %v1935_v15  ;;  %v4771_v7 = vld [vmem:[#allocation51_spill] sm:$0xff]  ;;  %v4775_v33 = vld [vmem:[#allocation56_spill] sm:$0xff] }
 0x270   : > { %v3126_v36 = vpop.eup %3125  ;;  %3129 = vrcp.f32 %v4394_v30  ;;  %v1944_v57 = vsel %vm1941_vm11, %v1943_v17, %v1939_v31  ;;  %v2081_v4 = vand.u32 2147483648, %v4394_v30  ;;  %vm2075_vm4 = vweird.f32 %v4394_v30  ;;  %v4774_v31 = vld [vmem:[#allocation55_spill] sm:$0xff] }
 0x271   : > { %v3128_v51 = vpop.eup %3127  ;;  %v2032_v56 = vmul.f32 %v3126_v36, %v2030_v54  ;;  %3131 = vtanh.f32 %v1948_v12  ;;  %vm2037_vm9 = vweird.f32 %v3126_v36  ;;  %v2079_v29 = vand.u32 2147483647, %v4394_v30 }
 0x272   : > { %v2051_v60 = vmul.f32 %v3128_v51, %v2049_v53  ;;  %3133 = vtanh.f32 %v2025_v38  ;;  %vm2056_vm13 = vweird.f32 %v3128_v51  ;;  %vm2038_vm12 = vmor %vm2036_vm10, %vm2037_vm9  ;;  %v2082_v53 = vor.u32 1.1754944e-38, %v2081_v4 }
 0x273   : > { %v2033_v5 = vsub.f32 1.0, %v2032_v56  ;;  %vm2057_vm0 = vmor %vm2055_vm15, %vm2056_vm13  ;;  %vm2080_vm6 = vcmp.eq.f32.partialorder %v2079_v29, 8.507059e+37 }
 0x274   : > { %v2052_v21 = vsub.f32 1.0, %v2051_v60 }
 0x275   : > { %v2034_v32 = vmul.f32 %v3126_v36, %v2033_v5 }
 0x276   : > { %v3130_v43 = vpop.eup %3129  ;;  %v2053_v9 = vmul.f32 %v3128_v51, %v2052_v21 }
 0x277   : > { %v3132_v44 = vpop.eup %3131  ;;  %v2035_v45 = vadd.f32 %v3126_v36, %v2034_v32  ;;  %v2071_v49 = vmul.f32 %v3130_v43, %v4394_v30  ;;  %vm2076_vm2 = vweird.f32 %v3130_v43 }
 0x278   : > { %v1950_v59 = vmul.f32 %v3132_v44, %v1944_v57  ;;  %v2054_v2 = vadd.f32 %v3128_v51, %v2053_v9  ;;  %v3134_v23 = vpop.eup %3133  ;;  %v4776_v9 = vld [vmem:[#allocation53_spill] sm:$0xff] }
 0x279   : > { %v2039_v11 = vsel %vm2038_vm12, %v3126_v36, %v2035_v45  ;;  %v2072_v18 = vsub.f32 1.0, %v2071_v49 }
 0x27a   : > { %v2044_v34 = vsel %vm2041_vm14, %v2043_v58, %v2039_v11  ;;  %v4419_v39 = vsel %vm1957_vm5, %v1950_v59, %v4280_v50  ;;  %v1960_v35 = vsel %vm1957_vm5, %v1950_v59, 0.0  ;;  %v2058_v26 = vsel %vm2057_vm0, %v3128_v51, %v2054_v2  ;;  %vm2077_vm5 = vmor %vm2075_vm4, %vm2076_vm2 }
 0x27b   : > { %v2086_v3 = vmul.f32 %v3134_v23, %v2044_v34  ;;  %2917 = vst [vmem:[%s3330_s29 + $0x10] sm:$0xff] %v1960_v35  ;;  %v2109_v63 = vpack.c.bf16 %v4419_v39, %v4419_v39  ;;  %v2063_v46 = vsel %vm2060_vm1, %v2062_v16, %v2058_v26  ;;  %v2073_v8 = vmul.f32 %v3130_v43, %v2072_v18 }
 0x27c   : > { %v2085_v42 = vmul.f32 %v2063_v46, %v4293_v62 }
 0x27d   : > { %2118 = vmatmul.bf16.vlgmr.msra.gmra.mxu0 %v2109_v63  ;;  %2131 = vmatmul.bf16.vlgmr.msra.gmra.mxu1 %v2109_v63  ;;  %v2074_v50 = vadd.f32 %v3130_v43, %v2073_v8 }
 0x27e   : > { %v2087_v54 = vadd.f32 %v2086_v3, %v2085_v42  ;;  %2144 = vmatmul.bf16.vlgmr.msra.gmra.mxu2 %v2109_v63  ;;  %2157 = vmatmul.bf16.vlgmr.msra.gmra.mxu3 %v2109_v63  ;;  %v4777_v42 = vld [vmem:[#allocation58_spill] sm:$0xff] }
 0x27f   : > { %v2078_v40 = vsel %vm2077_vm5, %v3130_v43, %v2074_v50 }
 0x280   : > { %3135 = vtanh.f32 %v2087_v54  ;;  %v4429_v22 = vsel %vm2096_vm3, %v2087_v54, %v4293_v62  ;;  %v2083_v24 = vsel %vm2080_vm6, %v2082_v53, %v2078_v40 }
 0x286   : > { %v3136_v47 = vpop.eup %3135 }
 0x287   : > { %v2089_v48 = vmul.f32 %v3136_v47, %v2083_v24 }
 0x289   : > { %v4434_v19 = vsel %vm2096_vm3, %v2089_v48, %v4309_v1  ;;  %v2099_v10 = vsel %vm2096_vm3, %v2089_v48, 0.0 }
 0x28a   : > { %2921 = vst [vmem:[%s3335_s25 + $0x8] sm:$0xff] %v2099_v10  ;;  %v2247_v62 = vpack.c.bf16 %v4434_v19, %v4434_v19 }
 0x28d   : > { %2256 = vmatmul.bf16.vlgmr.msrb.gmra.mxu0 %v2247_v62  ;;  %2269 = vmatmul.bf16.vlgmr.msrb.gmra.mxu1 %v2247_v62 }
 0x28e   : > { %2282 = vmatmul.bf16.vlgmr.msrb.gmra.mxu2 %v2247_v62  ;;  %2295 = vmatmul.bf16.vlgmr.msrb.gmra.mxu3 %v2247_v62 }
 0x2fa   : > { %v2119_v55 = vpop.f32.mrf.mxu0  ;;  %v2132_v6 = vpop.f32.mrf.mxu1 }
 0x2fb   : > { %v2162_v52 = vadd.f32 %v2119_v55, %v4771_v7  ;;  %v2163_v30 = vadd.f32 %v2132_v6, %v4772_v20 }
 0x2fd   : > { %v2922_v12 = vmul.f32 -1.442695, %v2162_v52  ;;  %v2923_v41 = vmul.f32 -1.442695, %v2163_v30 }
 0x2ff   : > { %3137 = vpow2.f32 %v2922_v12 }
 0x300   : > { %3139 = vpow2.f32 %v2923_v41 }
 0x301   : > { %v2145_v1 = vpop.f32.mrf.mxu2  ;;  %v2158_v38 = vpop.f32.mrf.mxu3 }
 0x302   : > { %v2165_v36 = vadd.f32 %v2158_v38, %v4773_v27  ;;  %v2121_v15 = vpop.f32.mrf.mxu0  ;;  %v2134_v51 = vpop.f32.mrf.mxu1  ;;  %v2164_v44 = vadd.f32 %v2145_v1, %v4776_v9 }
 0x304   : > { %v2924_v56 = vmul.f32 -1.442695, %v2165_v36  ;;  %v2234_v36 = vpop.permute.xlu0 %2233 }
 0x305   : > { %v3138_v60 = vpop.eup %3137  ;;  %vm2235_vm15 = vcmp.eq.s32.totalorder %v2234_v36, 1 }
 0x306   : > { %v3140_v61 = vpop.eup %3139  ;;  %v2169_v5 = vadd.f32 1.0, %v3138_v60  ;;  %3141 = vpow2.f32 %v2924_v56 }
 0x307   : > { %v2188_v13 = vadd.f32 1.0, %v3140_v61 }
 0x308   : > { %3143 = vrcp.f32 %v2169_v5  ;;  %v2179_v18 = vand.u32 2147483647, %v2169_v5  ;;  %v2181_v3 = vand.u32 2147483648, %v2169_v5  ;;  %vm2175_vm10 = vweird.f32 %v2169_v5 }
 0x309   : > { %3145 = vrcp.f32 %v2188_v13  ;;  %v2147_v14 = vpop.f32.mrf.mxu2  ;;  %v2160_v17 = vpop.f32.mrf.mxu3  ;;  %v2200_v26 = vand.u32 2147483648, %v2188_v13  ;;  %v2198_v28 = vand.u32 2147483647, %v2188_v13  ;;  %vm2194_vm9 = vweird.f32 %v2188_v13 }
 0x30a   : > { %v2257_v21 = vpop.f32.mrf.mxu0  ;;  %v2270_v25 = vpop.f32.mrf.mxu1  ;;  %vm2180_vm13 = vcmp.eq.f32.partialorder %v2179_v18, 8.507059e+37  ;;  %v2182_v47 = vor.u32 1.1754944e-38, %v2181_v3  ;;  %v4778_v17 = vld [vmem:[#allocation57_spill] sm:$0xff] }
 0x30b   : > { %v2300_v32 = vadd.f32 %v2257_v21, %v4774_v31  ;;  %v2301_v37 = vadd.f32 %v2270_v25, %v4775_v33  ;;  %v2201_v62 = vor.u32 1.1754944e-38, %v2200_v26  ;;  %vm2199_vm12 = vcmp.eq.f32.partialorder %v2198_v28, 8.507059e+37 }
 0x30c   : > { %v3142_v43 = vpop.eup %3141 }
 0x30d   : > { %v4445_v45 = vadd.f32 1.0, %v3142_v43  ;;  %v2926_v49 = vmul.f32 -1.442695, %v2300_v32  ;;  %v2927_v58 = vmul.f32 -1.442695, %v2301_v37 }
 0x30e   : > { %v3144_v57 = vpop.eup %3143 }
 0x30f   : > { %v3146_v59 = vpop.eup %3145  ;;  %v2171_v2 = vmul.f32 %v3144_v57, %v2169_v5  ;;  %3147 = vrcp.f32 %v4445_v45  ;;  %vm2176_vm7 = vweird.f32 %v3144_v57  ;;  %vm2214_vm1 = vweird.f32 %v4445_v45 }
 0x310   : > { %v2190_v11 = vmul.f32 %v3146_v59, %v2188_v13  ;;  %3149 = vtanh.f32 %v2164_v44  ;;  %vm2195_vm8 = vweird.f32 %v3146_v59  ;;  %vm2177_vm11 = vmor %vm2175_vm10, %vm2176_vm7  ;;  %v2220_v13 = vand.u32 2147483648, %v4445_v45 }
 0x311   : > { %v2172_v16 = vsub.f32 1.0, %v2171_v2  ;;  %3151 = vpow2.f32 %v2926_v49  ;;  %v2283_v23 = vpop.f32.mrf.mxu2  ;;  %v2296_v34 = vpop.f32.mrf.mxu3  ;;  %vm2196_vm14 = vmor %vm2194_vm9, %vm2195_vm8  ;;  %v2218_v14 = vand.u32 2147483647, %v4445_v45 }
 0x312   : > { %v2191_v35 = vsub.f32 1.0, %v2190_v11  ;;  %3153 = vpow2.f32 %v2927_v58  ;;  %v2259_v63 = vpop.f32.mrf.mxu0  ;;  %v2272_v46 = vpop.f32.mrf.mxu1  ;;  %v2303_v54 = vadd.f32 %v2296_v34, %v4777_v42  ;;  %v2302_v21 = vadd.f32 %v2283_v23, %v4778_v17 }
 0x313   : > { %v2173_v8 = vmul.f32 %v3144_v57, %v2172_v16  ;;  %v2221_v37 = vor.u32 1.1754944e-38, %v2220_v13  ;;  %vm2219_vm3 = vcmp.eq.f32.partialorder %v2218_v14, 8.507059e+37 }
 0x314   : > { %v2192_v50 = vmul.f32 %v3146_v59, %v2191_v35  ;;  %v2928_v40 = vmul.f32 -1.442695, %v2303_v54 }
 0x315   : > { %v3148_v4 = vpop.eup %3147  ;;  %v2174_v29 = vadd.f32 %v3144_v57, %v2173_v8 }
 0x316   : > { %v3150_v53 = vpop.eup %3149  ;;  %v2193_v24 = vadd.f32 %v3146_v59, %v2192_v50  ;;  %v2210_v48 = vmul.f32 %v3148_v4, %v4445_v45  ;;  %3155 = vpow2.f32 %v2928_v40  ;;  %vm2215_vm0 = vweird.f32 %v3148_v4  ;;  %v2372_v40 = vpop.permute.xlu1 %2371 }
 0x317   : > { %v3152_v10 = vpop.eup %3151  ;;  %v2178_v55 = vsel %vm2177_vm11, %v3144_v57, %v2174_v29  ;;  %vm2216_vm2 = vmor %vm2214_vm1, %vm2215_vm0 }
 0x318   : > { %v3154_v6 = vpop.eup %3153  ;;  %v2183_v7 = vsel %vm2180_vm13, %v2182_v47, %v2178_v55  ;;  %v2197_v52 = vsel %vm2196_vm14, %v3146_v59, %v2193_v24  ;;  %v2211_v20 = vsub.f32 1.0, %v2210_v48  ;;  %v4450_v30 = vadd.f32 1.0, %v3152_v10 }
 0x319   : > { %v2202_v12 = vsel %vm2199_vm12, %v2201_v62, %v2197_v52  ;;  %v2225_v41 = vmul.f32 %v3150_v53, %v2183_v7  ;;  %v4452_v1 = vadd.f32 1.0, %v3154_v6  ;;  %v2285_v38 = vpop.f32.mrf.mxu2  ;;  %v2298_v27 = vpop.f32.mrf.mxu3  ;;  %vm2373_vm13 = vcmp.eq.s32.totalorder %v2372_v40, 1 }
 0x31a   : > { %v2224_v15 = vmul.f32 %v2202_v12, %v4404_v0  ;;  %v2212_v51 = vmul.f32 %v3148_v4, %v2211_v20  ;;  %3157 = vrcp.f32 %v4450_v30  ;;  %v2319_v58 = vand.u32 2147483648, %v4450_v30 }
 0x31b   : > { %3159 = vrcp.f32 %v4452_v1  ;;  %v2338_v57 = vand.u32 2147483648, %v4452_v1  ;;  %v2317_v11 = vand.u32 2147483647, %v4450_v30  ;;  %v2336_v18 = vand.u32 2147483647, %v4452_v1 }
 0x31c   : > { %v2226_v56 = vadd.f32 %v2225_v41, %v2224_v15  ;;  %v3156_v60 = vpop.eup %3155  ;;  %v2213_v61 = vadd.f32 %v3148_v4, %v2212_v51  ;;  %vm2313_vm6 = vweird.f32 %v4450_v30  ;;  %vm2332_vm7 = vweird.f32 %v4452_v1 }
 0x31d   : > { %v4466_v25 = vadd.f32 1.0, %v3156_v60  ;;  %v2320_v3 = vor.u32 1.1754944e-38, %v2319_v58  ;;  %vm2318_vm10 = vcmp.eq.f32.partialorder %v2317_v11, 8.507059e+37  ;;  %vm2337_vm11 = vcmp.eq.f32.partialorder %v2336_v18, 8.507059e+37 }
 0x31e   : > { %3161 = vtanh.f32 %v2226_v56  ;;  %v2237_v5 = vsel %vm2235_vm15, %v2226_v56, %v4404_v0  ;;  %v2217_v33 = vsel %vm2216_vm2, %v3148_v4, %v2213_v61 }
 0x31f   : > { %2379 = vst [vmem:[%s4517_s12] sm:$0xff] %v2237_v5  ;;  %3163 = vrcp.f32 %v4466_v25  ;;  %v2222_v45 = vsel %vm2219_vm3, %v2221_v37, %v2217_v33  ;;  %v2358_v62 = vand.u32 2147483648, %v4466_v25  ;;  %vm2352_vm12 = vweird.f32 %v4466_v25 }
 0x320   : > { %v3158_v31 = vpop.eup %3157  ;;  %3165 = vtanh.f32 %v2302_v21  ;;  %v2356_v55 = vand.u32 2147483647, %v4466_v25 }
 0x321   : > { %v3160_v32 = vpop.eup %3159  ;;  %v2309_v0 = vmul.f32 %v3158_v31, %v4450_v30  ;;  %vm2314_vm4 = vweird.f32 %v3158_v31  ;;  %v2359_v7 = vor.u32 1.1754944e-38, %v2358_v62 }
 0x322   : > { %v2328_v43 = vmul.f32 %v3160_v32, %v4452_v1  ;;  %vm2333_vm5 = vweird.f32 %v3160_v32  ;;  %vm2315_vm8 = vmor %vm2313_vm6, %vm2314_vm4  ;;  %vm2357_vm0 = vcmp.eq.f32.partialorder %v2356_v55, 8.507059e+37 }
 0x323   : > { %v2310_v9 = vsub.f32 1.0, %v2309_v0  ;;  %vm2334_vm9 = vmor %vm2332_vm7, %vm2333_vm5 }
 0x324   : > { %v3162_v44 = vpop.eup %3161  ;;  %v2329_v49 = vsub.f32 1.0, %v2328_v43 }
 0x325   : > { %v2228_v59 = vmul.f32 %v3162_v44, %v2222_v45  ;;  %v2311_v2 = vmul.f32 %v3158_v31, %v2310_v9  ;;  %v3164_v23 = vpop.eup %3163 }
 0x326   : > { %v2330_v16 = vmul.f32 %v3160_v32, %v2329_v49  ;;  %v2348_v46 = vmul.f32 %v3164_v23, %v4466_v25  ;;  %v3166_v8 = vpop.eup %3165  ;;  %vm2353_vm14 = vweird.f32 %v3164_v23 }
 0x327   : > { %v2236_v34 = vsel %vm2235_vm15, %v2228_v59, %v4419_v39  ;;  %v2238_v35 = vsel %vm2235_vm15, %v2228_v59, 0.0  ;;  %v2312_v26 = vadd.f32 %v3158_v31, %v2311_v2  ;;  %v2339_v39 = vor.u32 1.1754944e-38, %v2338_v57  ;;  %vm2354_vm15 = vmor %vm2352_vm12, %vm2353_vm14 }
 0x328   : > { %2925 = vst [vmem:[%s3330_s29 + $0x18] sm:$0xff] %v2238_v35  ;;  %v2331_v63 = vadd.f32 %v3160_v32, %v2330_v16  ;;  %v2349_v50 = vsub.f32 1.0, %v2348_v46 }
 0x329   : > { %2378 = vst [vmem:[%s4516_s11] sm:$0xff] %v2236_v34  ;;  %v2316_v28 = vsel %vm2315_vm8, %v3158_v31, %v2312_v26 }
 0x32a   : > { %v2321_v42 = vsel %vm2318_vm10, %v2320_v3, %v2316_v28  ;;  %v2335_v54 = vsel %vm2334_vm9, %v3160_v32, %v2331_v63  ;;  %v2350_v47 = vmul.f32 %v3164_v23, %v2349_v50 }
 0x32b   : > { %v2340_v4 = vsel %vm2337_vm11, %v2339_v39, %v2335_v54  ;;  %v2363_v29 = vmul.f32 %v3166_v8, %v2321_v42 }
 0x32c   : > { %v2362_v53 = vmul.f32 %v2340_v4, %v4429_v22  ;;  %v2351_v48 = vadd.f32 %v3164_v23, %v2350_v47 }
 0x32e   : > { %v2364_v24 = vadd.f32 %v2363_v29, %v2362_v53  ;;  %v2355_v6 = vsel %vm2354_vm15, %v3164_v23, %v2351_v48 }
 0x32f   : > { %v2360_v20 = vsel %vm2357_vm0, %v2359_v7, %v2355_v6 }
 0x330   : > { %3167 = vtanh.f32 %v2364_v24  ;;  %v2375_v10 = vsel %vm2373_vm13, %v2364_v24, %v4429_v22 }
 0x331   : > { %2381 = vst [vmem:[%s4519_s14] sm:$0xff] %v2375_v10 }
 0x336   : > { %v3168_v52 = vpop.eup %3167 }
 0x337   : > { %v2366_v30 = vmul.f32 %v3168_v52, %v2360_v20 }
 0x339   : > { %v2374_v22 = vsel %vm2373_vm13, %v2366_v30, %v4434_v19  ;;  %v2376_v12 = vsel %vm2373_vm13, %v2366_v30, 0.0 }
 0x33a   : > { %2377 = vst [vmem:[%s3335_s25] sm:$0xff] %v2376_v12 }
 0x33b   : > { %2380 = vst [vmem:[%s4518_s13] sm:$0xff] %v2374_v22 }
 0x33c PF: > { %s4779_s0 = sld [smem:[#allocation7_spill]] }
 0x342   : > { %s26_s29 = sadd.s32 1, %s4779_s0  }
 0x343   : > { %p23_p9 = scmp.ge.s32.totalorder %s26_s29, 4  }
 0x345   :  { %25 = sbr.rel (!%p23_p9) target bundleno = 6 (0x6), region = 156 }
 0x34a   :  { %2448 = vsyncpa [#allocation5], 1 }
 0x34b   :  { %2450 = vsyncpa [#allocation5 + $0x1], 1 }

</bundles_post_ra>
